<compile_context>
chip_gen: v6e
topology: v6e:2x2x1
jax: 0.10.0
libtpu: 0.0.40
codegen_flags: <defaults>
</compile_context>

<pallas_src>
import jax
import jax.numpy as jnp
from jax import lax
from jax.experimental import pallas as pl
from jax.experimental.pallas import tpu as pltpu


def _mlp_kernel(ci_ref, xt_ref, w1x_ref, ew1_ref, b1_ref,
                w2_ref, b2_ref, w3_ref, b3_ref, w4_ref, b4_ref, out_ref):
    """One batch tile. Activations are (features, bm): batch on the lane axis."""
    bm = xt_ref.shape[-1]
    n_chan_pad = ew1_ref.shape[-1]

    # ---- layer 1: W1x @ x.T + (W1e @ embed.T) @ onehot(idx) + b1 ----------
    # Embedding gather expressed as a one-hot matmul: onehot[c, j] = (idx[j]==c).
    chan_iota = lax.broadcasted_iota(jnp.int32, (n_chan_pad, bm), 0)
    onehot = (chan_iota == ci_ref[...]).astype(jnp.bfloat16)

    h = jnp.dot(w1x_ref[...], xt_ref[...], preferred_element_type=jnp.float32)
    h += jnp.dot(ew1_ref[...], onehot, preferred_element_type=jnp.float32)
    h = jnp.maximum(h + b1_ref[...], 0.0)                      # f32 bias + ReLU

    # ---- layers 2/3: bf16 operands, f32 accumulation -----------------------
    h = jnp.dot(w2_ref[...], h.astype(jnp.bfloat16),
                preferred_element_type=jnp.float32)
    h = jnp.maximum(h + b2_ref[...], 0.0)
    h = jnp.dot(w3_ref[...], h.astype(jnp.bfloat16),
                preferred_element_type=jnp.float32)
    h = jnp.maximum(h + b3_ref[...], 0.0)

    # ---- layer 4 (hidden -> 1): VPU multiply + sublane (XLU) reduction -----
    y = jnp.sum(h * w4_ref[...], axis=0, keepdims=True) + b4_ref[...]   # (1, bm)
    out_ref[...] = y.astype(out_ref.dtype)


def _choose_bm(batch):
    if batch >= 512:
        return 512
    if batch >= 256:
        return 256
    if batch >= 128:
        return 128
    return pl.cdiv(max(batch, 8), 8) * 8      # tiny-batch fallback (full-extent block)


def prepare_kernel_params(params, *, vit_dim):
    """One-time repack of PyTorch-layout parameters for the kernel."""
    w1 = params["w1"]                          # (hidden, vit_dim + channel_dim)
    w1x = w1[:, :vit_dim]                      # (hidden, vit_dim)
    w1e = w1[:, vit_dim:]                      # (hidden, channel_dim)
    embed = params["embed"]                    # (n_channels, channel_dim)
    n_channels = embed.shape[0]
    n_chan_pad = pl.cdiv(n_channels, 128) * 128
    # Fold the embedding table into layer 1:  W1e @ e.T == (W1e @ embed.T)[:, idx]
    ew1 = jnp.dot(w1e, embed.T)                # (hidden, n_channels), f32 precompute
    ew1 = jnp.pad(ew1, ((0, 0), (0, n_chan_pad - n_channels)))

    col = lambda b: b.reshape(-1, 1).astype(jnp.float32)
    return {
        "w1x": w1x.astype(jnp.bfloat16),
        "ew1": ew1.astype(jnp.bfloat16),
        "b1": col(params["b1"]),
        "w2": params["w2"].astype(jnp.bfloat16),
        "b2": col(params["b2"]),
        "w3": params["w3"].astype(jnp.bfloat16),
        "b3": col(params["b3"]),
        "w4": params["w4"].reshape(-1, 1).astype(jnp.float32),   # (hidden, 1)
        "b4": params["b4"].reshape(1, 1).astype(jnp.float32),
    }


def lfp_channel_embedding_forward(x, channel_idx, prep, *, bm=None):
    """x: [B, vit_dim] float32, channel_idx: [B] int -> [B] float32."""
    B, vit_dim = x.shape
    hidden = prep["w2"].shape[0]
    n_chan_pad = prep["ew1"].shape[1]

    if bm is None:
        bm = _choose_bm(B)
    Bp = pl.cdiv(B, bm) * bm

    # Feature-major (transposed) input; padded rows produce junk sliced off below.
    xt = jnp.pad(x, ((0, Bp - B), (0, 0))).astype(jnp.bfloat16).T       # (vit_dim, Bp)
    ci = jnp.pad(channel_idx.astype(jnp.int32), (0, Bp - B)).reshape(1, Bp)

    full = lambda shape: pl.BlockSpec(shape, lambda i: (0, 0))

    out = pl.pallas_call(
        _mlp_kernel,
        out_shape=jax.ShapeDtypeStruct((1, Bp), jnp.float32),
        grid_spec=pltpu.PrefetchScalarGridSpec(
            num_scalar_prefetch=0,
            grid=(Bp // bm,),
            in_specs=[
                pl.BlockSpec((1, bm), lambda i: (0, i)),         # channel idx tile
                pl.BlockSpec((vit_dim, bm), lambda i: (0, i)),   # x.T tile
                full((hidden, vit_dim)),                         # w1x   (bf16)
                full((hidden, n_chan_pad)),                      # W1e @ embed.T (bf16)
                full((hidden, 1)),                               # b1    (f32)
                full((hidden, hidden)),                          # w2    (bf16)
                full((hidden, 1)),                               # b2
                full((hidden, hidden)),                          # w3    (bf16)
                full((hidden, 1)),                               # b3
                full((hidden, 1)),                               # w4 as column (f32)
                full((1, 1)),                                    # b4
            ],
            out_specs=pl.BlockSpec((1, bm), lambda i: (0, i)),   # lane-dense output
        ),
        compiler_params=pltpu.CompilerParams(
            dimension_semantics=("parallel",)),
    )(ci, xt, prep["w1x"], prep["ew1"], prep["b1"], prep["w2"], prep["b2"],
      prep["w3"], prep["b3"], prep["w4"], prep["b4"])

    return out[0, :B]


def init_params(key, n_channels=95, vit_dim=64 * 3, channel_dim=64, hidden_dim=512):
    """Deterministic synthetic parameters with the PyTorch module's layouts."""
    ks = jax.random.split(key, 9)
    d_in = vit_dim + channel_dim

    def lin(kw, kb, fan_in, fan_out):
        # nn.Linear layout: weight (out_features, in_features), bias (out_features,)
        w = jax.random.normal(kw, (fan_out, fan_in), jnp.float32) / jnp.sqrt(fan_in)
        b = jax.random.normal(kb, (fan_out,), jnp.float32) * 0.01
        return w, b

    w1, b1 = lin(ks[1], ks[2], d_in, hidden_dim)
    w2, b2 = lin(ks[3], ks[4], hidden_dim, hidden_dim)
    w3, b3 = lin(ks[5], ks[6], hidden_dim, hidden_dim)
    w4, b4 = lin(ks[7], ks[8], hidden_dim, 1)
    embed = jax.random.normal(ks[0], (n_channels, channel_dim), jnp.float32)
    return {"embed": embed, "w1": w1, "b1": b1, "w2": w2, "b2": b2,
            "w3": w3, "b3": b3, "w4": w4, "b4": b4}


def reference_forward_f32(x, channel_idx, params):
    """Pure-JAX f32 reference matching the PyTorch forward semantics."""
    e = params["embed"][channel_idx]
    h = jnp.concatenate([x, e], axis=-1)
    h = jnp.maximum(h @ params["w1"].T + params["b1"], 0.0)
    h = jnp.maximum(h @ params["w2"].T + params["b2"], 0.0)
    h = jnp.maximum(h @ params["w3"].T + params["b3"], 0.0)
    return (h @ params["w4"].T + params["b4"])[:, 0]


def reference_forward_matched(x, channel_idx, prep):
    """Same math as the kernel (bf16 operands, f32 accumulation) in plain JAX."""
    xb = x.astype(jnp.bfloat16)
    h = jnp.dot(xb, prep["w1x"].T, preferred_element_type=jnp.float32)
    h = h + prep["ew1"][:, channel_idx].astype(jnp.float32).T
    h = jnp.maximum(h + prep["b1"][:, 0], 0.0)
    h = jnp.dot(h.astype(jnp.bfloat16), prep["w2"].T, preferred_element_type=jnp.float32)
    h = jnp.maximum(h + prep["b2"][:, 0], 0.0)
    h = jnp.dot(h.astype(jnp.bfloat16), prep["w3"].T, preferred_element_type=jnp.float32)
    h = jnp.maximum(h + prep["b3"][:, 0], 0.0)
    return jnp.sum(h * prep["w4"][:, 0], axis=-1) + prep["b4"][0, 0]


if __name__ == "__main__":
    n_channels, vit_dim, channel_dim, hidden_dim = 95, 64 * 3, 64, 512
    key = jax.random.PRNGKey(0)
    kp, kx, kc = jax.random.split(key, 3)

    params = init_params(kp, n_channels, vit_dim, channel_dim, hidden_dim)
    prep = prepare_kernel_params(params, vit_dim=vit_dim)

    # Test both the tiny full-extent-block path (B=8) and the tiled + padded
    # lane-dense path (B=200 -> bm=128, padded to 256, 2 grid steps).
    for B in (8, 200):
        kxb, kcb = jax.random.split(jax.random.fold_in(kx, B))
        x = jax.random.normal(kxb, (B, vit_dim), jnp.float32)
        channel_idx = jax.random.randint(kcb, (B,), 0, n_channels, dtype=jnp.int32)

        y = jax.block_until_ready(
            lfp_channel_embedding_forward(x, channel_idx, prep))
        assert y.shape == (B,)

        # Tight check against a matched-precision (bf16 operand) reference.
        y_matched = reference_forward_matched(x, channel_idx, prep)
        assert jnp.allclose(y, y_matched, atol=1e-2, rtol=1e-2), \
            "kernel vs matched-precision reference mismatch"

        # Sanity check against the full-f32 PyTorch-semantics reference
        # (loose bound covering bf16 weight/activation quantization).
        y_f32 = reference_forward_f32(x, channel_idx, params)
        assert float(jnp.max(jnp.abs(y - y_f32))) < 0.15, \
            "kernel drifted too far from the f32 reference"

    print("KERNEL_OK")
</pallas_src>

<mosaic_0001>
module attributes {stable_mosaic.version = 11 : i64} {
  func.func @_mlp_kernel(%arg0: i32, %arg1: memref<1x8xi32, #tpu.memory_space<vmem>>, %arg2: memref<192x8xbf16, #tpu.memory_space<vmem>>, %arg3: memref<512x192xbf16, #tpu.memory_space<vmem>>, %arg4: memref<512x128xbf16, #tpu.memory_space<vmem>>, %arg5: memref<512x1xf32, #tpu.memory_space<vmem>>, %arg6: memref<512x512xbf16, #tpu.memory_space<vmem>>, %arg7: memref<512x1xf32, #tpu.memory_space<vmem>>, %arg8: memref<512x512xbf16, #tpu.memory_space<vmem>>, %arg9: memref<512x1xf32, #tpu.memory_space<vmem>>, %arg10: memref<512x1xf32, #tpu.memory_space<vmem>>, %arg11: memref<1x1xf32, #tpu.memory_space<vmem>>, %arg12: memref<1x8xf32, #tpu.memory_space<vmem>>) attributes {dimension_semantics = [#tpu.dimension_semantics<parallel>], iteration_bounds = array<i64: 1>, scalar_prefetch = 0 : i64, scratch_operands = 0 : i64, tpu.core_type = #tpu.core_type<tc>, window_params = [{transform_indices = @transform_0, window_bounds = array<i64: 1, 8>}, {transform_indices = @transform_1, window_bounds = array<i64: 192, 8>}, {pipeline_mode = #tpu.pipeline_mode<synchronous>, transform_indices = @transform_2, window_bounds = array<i64: 512, 192>}, {pipeline_mode = #tpu.pipeline_mode<synchronous>, transform_indices = @transform_3, window_bounds = array<i64: 512, 128>}, {pipeline_mode = #tpu.pipeline_mode<synchronous>, transform_indices = @transform_4, window_bounds = array<i64: 512, 1>}, {pipeline_mode = #tpu.pipeline_mode<synchronous>, transform_indices = @transform_5, window_bounds = array<i64: 512, 512>}, {pipeline_mode = #tpu.pipeline_mode<synchronous>, transform_indices = @transform_6, window_bounds = array<i64: 512, 1>}, {pipeline_mode = #tpu.pipeline_mode<synchronous>, transform_indices = @transform_7, window_bounds = array<i64: 512, 512>}, {pipeline_mode = #tpu.pipeline_mode<synchronous>, transform_indices = @transform_8, window_bounds = array<i64: 512, 1>}, {pipeline_mode = #tpu.pipeline_mode<synchronous>, transform_indices = @transform_9, window_bounds = array<i64: 512, 1>}, {pipeline_mode = #tpu.pipeline_mode<synchronous>, transform_indices = @transform_10, window_bounds = array<i64: 1, 1>}, {transform_indices = @transform_11, window_bounds = array<i64: 1, 8>}]} {
    %0 = tpu.iota {dimensions = array<i32: 0>} : vector<128x8xi32>
    %c0 = arith.constant 0 : index
    %c0_0 = arith.constant 0 : index
    %1 = vector.load %arg1[%c0, %c0_0] : memref<1x8xi32, #tpu.memory_space<vmem>>, vector<1x8xi32>
    %2 = vector.broadcast %1 : vector<1x8xi32> to vector<128x8xi32>
    %3 = arith.cmpi eq, %0, %2 : vector<128x8xi32>
    %4 = arith.extui %3 : vector<128x8xi1> to vector<128x8xi32>
    %5 = arith.sitofp %4 : vector<128x8xi32> to vector<128x8xf32>
    %6 = arith.truncf %5 : vector<128x8xf32> to vector<128x8xbf16>
    %c0_1 = arith.constant 0 : index
    %c0_2 = arith.constant 0 : index
    %7 = vector.load %arg3[%c0_1, %c0_2] : memref<512x192xbf16, #tpu.memory_space<vmem>>, vector<512x192xbf16>
    %c0_3 = arith.constant 0 : index
    %c0_4 = arith.constant 0 : index
    %8 = vector.load %arg2[%c0_3, %c0_4] : memref<192x8xbf16, #tpu.memory_space<vmem>>, vector<192x8xbf16>
    %cst = arith.constant dense<0.000000e+00> : vector<512x8xf32>
    %9 = tpu.matmul %7, %8, %cst {dimension_numbers = #tpu.dot_dimension_numbers<[1], [0], [0], [1], [0, 0, 1, 1], [], []>} : vector<512x192xbf16>, vector<192x8xbf16>, vector<512x8xf32> -> vector<512x8xf32>
    %c0_5 = arith.constant 0 : index
    %c0_6 = arith.constant 0 : index
    %10 = vector.load %arg4[%c0_5, %c0_6] : memref<512x128xbf16, #tpu.memory_space<vmem>>, vector<512x128xbf16>
    %cst_7 = arith.constant dense<0.000000e+00> : vector<512x8xf32>
    %11 = tpu.matmul %10, %6, %cst_7 {dimension_numbers = #tpu.dot_dimension_numbers<[1], [0], [0], [1], [0, 0, 1, 1], [], []>} : vector<512x128xbf16>, vector<128x8xbf16>, vector<512x8xf32> -> vector<512x8xf32>
    %12 = arith.addf %9, %11 : vector<512x8xf32>
    %c0_8 = arith.constant 0 : index
    %c0_9 = arith.constant 0 : index
    %13 = vector.load %arg5[%c0_8, %c0_9] : memref<512x1xf32, #tpu.memory_space<vmem>>, vector<512x1xf32>
    %14 = vector.broadcast %13 : vector<512x1xf32> to vector<512x8xf32>
    %15 = arith.addf %12, %14 : vector<512x8xf32>
    %cst_10 = arith.constant 0.000000e+00 : f32
    %16 = vector.broadcast %cst_10 : f32 to vector<512x8xf32>
    %17 = arith.maximumf %15, %16 : vector<512x8xf32>
    %c0_11 = arith.constant 0 : index
    %c0_12 = arith.constant 0 : index
    %18 = vector.load %arg6[%c0_11, %c0_12] : memref<512x512xbf16, #tpu.memory_space<vmem>>, vector<512x512xbf16>
    %19 = arith.truncf %17 : vector<512x8xf32> to vector<512x8xbf16>
    %cst_13 = arith.constant dense<0.000000e+00> : vector<512x8xf32>
    %20 = tpu.matmul %18, %19, %cst_13 {dimension_numbers = #tpu.dot_dimension_numbers<[1], [0], [0], [1], [0, 0, 1, 1], [], []>} : vector<512x512xbf16>, vector<512x8xbf16>, vector<512x8xf32> -> vector<512x8xf32>
    %c0_14 = arith.constant 0 : index
    %c0_15 = arith.constant 0 : index
    %21 = vector.load %arg7[%c0_14, %c0_15] : memref<512x1xf32, #tpu.memory_space<vmem>>, vector<512x1xf32>
    %22 = vector.broadcast %21 : vector<512x1xf32> to vector<512x8xf32>
    %23 = arith.addf %20, %22 : vector<512x8xf32>
    %cst_16 = arith.constant 0.000000e+00 : f32
    %24 = vector.broadcast %cst_16 : f32 to vector<512x8xf32>
    %25 = arith.maximumf %23, %24 : vector<512x8xf32>
    %c0_17 = arith.constant 0 : index
    %c0_18 = arith.constant 0 : index
    %26 = vector.load %arg8[%c0_17, %c0_18] : memref<512x512xbf16, #tpu.memory_space<vmem>>, vector<512x512xbf16>
    %27 = arith.truncf %25 : vector<512x8xf32> to vector<512x8xbf16>
    %cst_19 = arith.constant dense<0.000000e+00> : vector<512x8xf32>
    %28 = tpu.matmul %26, %27, %cst_19 {dimension_numbers = #tpu.dot_dimension_numbers<[1], [0], [0], [1], [0, 0, 1, 1], [], []>} : vector<512x512xbf16>, vector<512x8xbf16>, vector<512x8xf32> -> vector<512x8xf32>
    %c0_20 = arith.constant 0 : index
    %c0_21 = arith.constant 0 : index
    %29 = vector.load %arg9[%c0_20, %c0_21] : memref<512x1xf32, #tpu.memory_space<vmem>>, vector<512x1xf32>
    %30 = vector.broadcast %29 : vector<512x1xf32> to vector<512x8xf32>
    %31 = arith.addf %28, %30 : vector<512x8xf32>
    %cst_22 = arith.constant 0.000000e+00 : f32
    %32 = vector.broadcast %cst_22 : f32 to vector<512x8xf32>
    %33 = arith.maximumf %31, %32 : vector<512x8xf32>
    %c0_23 = arith.constant 0 : index
    %c0_24 = arith.constant 0 : index
    %34 = vector.load %arg10[%c0_23, %c0_24] : memref<512x1xf32, #tpu.memory_space<vmem>>, vector<512x1xf32>
    %35 = vector.broadcast %34 : vector<512x1xf32> to vector<512x8xf32>
    %36 = arith.mulf %33, %35 : vector<512x8xf32>
    %cst_25 = arith.constant dense<0.000000e+00> : vector<8xf32>
    %37 = vector.multi_reduction <add>, %36, %cst_25 [0] : vector<512x8xf32> to vector<8xf32>
    %38 = vector.shape_cast %37 : vector<8xf32> to vector<1x8xf32>
    %c0_26 = arith.constant 0 : index
    %c0_27 = arith.constant 0 : index
    %39 = vector.load %arg11[%c0_26, %c0_27] : memref<1x1xf32, #tpu.memory_space<vmem>>, vector<1x1xf32>
    %40 = vector.broadcast %39 : vector<1x1xf32> to vector<1x8xf32>
    %41 = arith.addf %38, %40 : vector<1x8xf32>
    %c0_28 = arith.constant 0 : index
    %c0_29 = arith.constant 0 : index
    %42 = vector.load %arg12[%c0_28, %c0_29] : memref<1x8xf32, #tpu.memory_space<vmem>>, vector<1x8xf32>
    tpu.vector_store %arg12[%c0_28, %c0_29], %41 {strides = array<i32>} : memref<1x8xf32, #tpu.memory_space<vmem>>, vector<1x8xf32>,
    return
  }
  func.func @transform_0(%arg0: i32) -> (i32, i32) {
    %c0_i32 = arith.constant 0 : i32
    %c0_i32_0 = arith.constant 0 : i32
    return %c0_i32, %arg0 : i32, i32
  }
  func.func @transform_1(%arg0: i32) -> (i32, i32) {
    %c0_i32 = arith.constant 0 : i32
    %c0_i32_0 = arith.constant 0 : i32
    return %c0_i32, %arg0 : i32, i32
  }
  func.func @transform_2(%arg0: i32) -> (i32, i32) {
    %c0_i32 = arith.constant 0 : i32
    %c0_i32_0 = arith.constant 0 : i32
    %c0_i32_1 = arith.constant 0 : i32
    return %c0_i32, %c0_i32_0 : i32, i32
  }
  func.func @transform_3(%arg0: i32) -> (i32, i32) {
    %c0_i32 = arith.constant 0 : i32
    %c0_i32_0 = arith.constant 0 : i32
    %c0_i32_1 = arith.constant 0 : i32
    return %c0_i32, %c0_i32_0 : i32, i32
  }
  func.func @transform_4(%arg0: i32) -> (i32, i32) {
    %c0_i32 = arith.constant 0 : i32
    %c0_i32_0 = arith.constant 0 : i32
    %c0_i32_1 = arith.constant 0 : i32
    return %c0_i32, %c0_i32_0 : i32, i32
  }
  func.func @transform_5(%arg0: i32) -> (i32, i32) {
    %c0_i32 = arith.constant 0 : i32
    %c0_i32_0 = arith.constant 0 : i32
    %c0_i32_1 = arith.constant 0 : i32
    return %c0_i32, %c0_i32_0 : i32, i32
  }
  func.func @transform_6(%arg0: i32) -> (i32, i32) {
    %c0_i32 = arith.constant 0 : i32
    %c0_i32_0 = arith.constant 0 : i32
    %c0_i32_1 = arith.constant 0 : i32
    return %c0_i32, %c0_i32_0 : i32, i32
  }
  func.func @transform_7(%arg0: i32) -> (i32, i32) {
    %c0_i32 = arith.constant 0 : i32
    %c0_i32_0 = arith.constant 0 : i32
    %c0_i32_1 = arith.constant 0 : i32
    return %c0_i32, %c0_i32_0 : i32, i32
  }
  func.func @transform_8(%arg0: i32) -> (i32, i32) {
    %c0_i32 = arith.constant 0 : i32
    %c0_i32_0 = arith.constant 0 : i32
    %c0_i32_1 = arith.constant 0 : i32
    return %c0_i32, %c0_i32_0 : i32, i32
  }
  func.func @transform_9(%arg0: i32) -> (i32, i32) {
    %c0_i32 = arith.constant 0 : i32
    %c0_i32_0 = arith.constant 0 : i32
    %c0_i32_1 = arith.constant 0 : i32
    return %c0_i32, %c0_i32_0 : i32, i32
  }
  func.func @transform_10(%arg0: i32) -> (i32, i32) {
    %c0_i32 = arith.constant 0 : i32
    %c0_i32_0 = arith.constant 0 : i32
    %c0_i32_1 = arith.constant 0 : i32
    return %c0_i32, %c0_i32_0 : i32, i32
  }
  func.func @transform_11(%arg0: i32) -> (i32, i32) {
    %c0_i32 = arith.constant 0 : i32
    %c0_i32_0 = arith.constant 0 : i32
    return %c0_i32, %arg0 : i32, i32
  }
}

</mosaic_0001>

<bundles_post_ra>
// kernel: tpu_custom_call.1
= control target key start
LH: loop header
LB: loop body
LE: loop exit
PB: predicated region body
PF: predicated region fallthrough
CT: control target
= control target key end

     0   :  { %s10893_s0 = inlined_call_operand.vmem [shape: s32[1,8], index: 0, kind: input, shape index: {}]   ;;  %s10894_s1 = inlined_call_operand.vmem [shape: bf16[192,8], index: 1, kind: input, shape index: {}]   ;;  %s10895_s2 = inlined_call_operand.vmem [shape: bf16[512,192], index: 2, kind: input, shape index: {}]   ;;  %s10896_s3 = inlined_call_operand.vmem [shape: bf16[512,128], index: 3, kind: input, shape index: {}]   ;;  %s10897_s4 = inlined_call_operand.vmem [shape: f32[512,1], index: 4, kind: input, shape index: {}]   ;;  %s10898_s5 = inlined_call_operand.vmem [shape: bf16[512,512], index: 5, kind: input, shape index: {}]   ;;  %s10899_s6 = inlined_call_operand.vmem [shape: f32[512,1], index: 6, kind: input, shape index: {}]   ;;  %s10900_s7 = inlined_call_operand.vmem [shape: bf16[512,512], index: 7, kind: input, shape index: {}]   ;;  %s10901_s8 = inlined_call_operand.vmem [shape: f32[512,1], index: 8, kind: input, shape index: {}]   ;;  %s10902_s9 = inlined_call_operand.vmem [shape: f32[512,1], index: 9, kind: input, shape index: {}]   ;;  %s10903_s10 = inlined_call_operand.<no memory space> [shape: f32[1,1], index: 10, kind: input, shape index: {}]   ;;  %s10904_s11 = inlined_call_operand.hbm [shape: f32[1,8], index: 11, kind: output, shape index: {}]  }
   0x1   :  { %v16_v0 = vstv %s10903_s10 }
   0x2   :  { %17 = vst [vmem:[#allocation2] sm:$0x1] %v16_v0 }
   0x3   :  { %v1545_v1 = vld [vmem:[%s10897_s4 + $0x170] sm:$0xff]  ;;  %v42_v3 = vlaneseq  ;;  %v10905_v4 = vmov 0   ;;  %v7473_v5 = vld [vmem:[%s10894_s1 + $0x38] sm:$0xff]   ;;  %v7487_v9 = vld [vmem:[%s10893_s0] ss:$0 sm:$0xff] }
   0x4   :  { %v1513_v2 = vld [vmem:[%s10897_s4 + $0x70] sm:$0xff]  ;;  %6849 = vset.pattern.permute.xlu1 %v10905_v4  ;;  %6848 = vset.pattern.permute.xlu0 %v10905_v4  ;;  %v1546_v7 = vld [vmem:[%s10897_s4 + $0x178] sm:$0xff]  ;;  %v1512_v15 = vld [vmem:[%s10897_s4 + $0x68] sm:$0xff]  ;;  %v7397_v20 = vmov 1.0|1.0  }
   0x5   :  { %1795 = vperm.xlu1 %6849, %v1545_v1   ;;  %1635 = vperm.xlu0 %6848, %v1513_v2   ;;  %v7475_v6 = vshrl.u32 %v42_v3, 7  ;;  %v1514_v8 = vld [vmem:[%s10897_s4 + $0x78] sm:$0xff]  ;;  %v7493_v10 = vld [vmem:[%s10894_s1 + $0x30] sm:$0xff]   ;;  %v1511_v17 = vld [vmem:[%s10897_s4 + $0x60] sm:$0xff] }
   0x6   :  { %6821 = vmatprep.subr.bf16.mxu1 %v10905_v4  ;;  %v7512_v18 = vld [vmem:[%s10894_s1 + $0x28] sm:$0xff]   ;;  %v1543_v25 = vld [vmem:[%s10897_s4 + $0x160] sm:$0xff]  ;;  %v1510_v30 = vld [vmem:[%s10897_s4 + $0x58] sm:$0xff] }
   0x7   :  { %10908 = vst [vmem:[#allocation6_spill] sm:$0xff] %v7475_v6  ;;  %6833 = vmatpush1.bf16.msra.mxu1 %v7473_v5  ;;  %v57_v11 = vadd.s32 112, %v7475_v6  ;;  %v58_v12 = vadd.s32 120, %v7475_v6  ;;  %v55_v13 = vadd.s32 96, %v7475_v6  ;;  %v56_v14 = vadd.s32 104, %v7475_v6  ;;  %v1544_v24 = vld [vmem:[%s10897_s4 + $0x168] sm:$0xff] }
   0x8   :  { %6822 = vmatprep.subr.bf16.mxu1 %v10905_v4  ;;  %v53_v16 = vadd.s32 80, %v7475_v6  ;;  %v54_v19 = vadd.s32 88, %v7475_v6  ;;  %v51_v22 = vadd.s32 64, %v7475_v6  ;;  %v52_v23 = vadd.s32 72, %v7475_v6  ;;  %v7542_v26 = vld [vmem:[%s10894_s1 + $0x20] sm:$0xff]   ;;  %v1509_v31 = vld [vmem:[%s10897_s4 + $0x50] sm:$0xff] }
   0x9   :  { %1800 = vperm.xlu1 %6849, %v1546_v7   ;;  %1640 = vperm.xlu0 %6848, %v1514_v8   ;;  %vm78_vm0 = vcmp.eq.s32.totalorder %v57_v11, %v7487_v9  ;;  %vm79_vm1 = vcmp.eq.s32.totalorder %v58_v12, %v7487_v9  ;;  %vm76_vm3 = vcmp.eq.s32.totalorder %v55_v13, %v7487_v9  ;;  %v49_v28 = vadd.s32 48, %v7475_v6  ;;  %v7569_v32 = vld [vmem:[%s10894_s1 + $0x18] sm:$0xff]   ;;  %v1541_v37 = vld [vmem:[%s10897_s4 + $0x150] sm:$0xff]  ;;  %v6859_v39 = vld [vmem:[%s10896_s3] sm:$0xff]  }
   0xa   :  { %vm6321_vm2 = vmpackc.low %vm79_vm1, %vm78_vm0  ;;  %vm77_vm4 = vcmp.eq.s32.totalorder %v56_v14, %v7487_v9  ;;  %vm74_vm6 = vcmp.eq.s32.totalorder %v53_v16, %v7487_v9  ;;  %vm75_vm7 = vcmp.eq.s32.totalorder %v54_v19, %v7487_v9  ;;  %vm72_vm9 = vcmp.eq.s32.totalorder %v51_v22, %v7487_v9  ;;  %v1542_v34 = vld [vmem:[%s10897_s4 + $0x158] sm:$0xff]  ;;  %v7592_v38 = vld [vmem:[%s10894_s1 + $0x10] sm:$0xff]   ;;  %6757 = vmatprep.mubr.bf16.mxu0 %v6859_v39 }
   0xb   :  { %6834 = vmatpush1.bf16.msra.mxu1 %v7493_v10  ;;  %6741 = vmatprep.subr.msk.bf16.mxu0 %vm6321_vm2, %v7397_v20  ;;  %vm7519_vm5 = vmpackc.low %vm77_vm4, %vm76_vm3  ;;  %vm73_vm10 = vcmp.eq.s32.totalorder %v52_v23, %v7487_v9  ;;  %v50_v29 = vadd.s32 56, %v7475_v6  ;;  %vm70_vm12 = vcmp.eq.s32.totalorder %v49_v28, %v7487_v9  ;;  %v47_v35 = vadd.s32 32, %v7475_v6  ;;  %v1508_v43 = vld [vmem:[%s10897_s4 + $0x48] sm:$0xff]  ;;  %v1507_v44 = vld [vmem:[%s10897_s4 + $0x40] sm:$0xff] }
   0xc   :  { %6742 = vmatpush3.bf16.msk.msra.mxu0 %vm6321_vm2, %v7397_v20  ;;  %6823 = vmatprep.subr.bf16.mxu1 %v10905_v4  ;;  %vm7544_vm8 = vmpackc.low %vm75_vm7, %vm74_vm6  ;;  %v48_v36 = vadd.s32 40, %v7475_v6  ;;  %v45_v41 = vadd.s32 16, %v7475_v6  ;;  %v46_v42 = vadd.s32 24, %v7475_v6  ;;  %v7625_v45 = vld [vmem:[%s10894_s1 + $0x8] sm:$0xff]   ;;  %v44_v47 = vadd.s32 8, %v7475_v6  ;;  %v1539_v49 = vld [vmem:[%s10897_s4 + $0x140] sm:$0xff] }
   0xd   :  { %1630 = vperm.xlu1 %6849, %v1512_v15   ;;  %1625 = vperm.xlu0 %6848, %v1511_v17   ;;  %vm7571_vm11 = vmpackc.low %vm73_vm10, %vm72_vm9  ;;  %vm71_vm13 = vcmp.eq.s32.totalorder %v50_v29, %v7487_v9  ;;  %vm68_vm15 = vcmp.eq.s32.totalorder %v47_v35, %v7487_v9  ;;  %v1540_v48 = vld [vmem:[%s10897_s4 + $0x148] sm:$0xff]  ;;  %v7652_v50 = vld [vmem:[%s10894_s1] sm:$0xff]   ;;  %vm64_vm6 = vcmp.eq.s32.totalorder %v7475_v6, %v7487_v9 }
   0xe   :  { %6743 = vmatprep.subr.msk.bf16.mxu0 %vm7519_vm5, %v7397_v20  ;;  %vm7601_vm14 = vmpackc.low %vm71_vm13, %vm70_vm12  ;;  %vm69_vm0 = vcmp.eq.s32.totalorder %v48_v36, %v7487_v9  ;;  %vm66_vm2 = vcmp.eq.s32.totalorder %v45_v41, %v7487_v9  ;;  %vm67_vm3 = vcmp.eq.s32.totalorder %v46_v42, %v7487_v9  ;;  %v6868_v52 = vld [vmem:[%s10895_s2 + $0x94] ss:$8 sps:$4 sm:$0xff]   ;;  %vm65_vm7 = vcmp.eq.s32.totalorder %v44_v47, %v7487_v9  ;;  %v6861_v59 = vld [vmem:[%s10896_s3 + $0x8] sm:$0xff]  }
   0xf   :  { %6835 = vmatpush1.bf16.msra.mxu1 %v7512_v18  ;;  %vm7628_vm1 = vmpackc.low %vm69_vm0, %vm68_vm15  ;;  %v1506_v53 = vld [vmem:[%s10897_s4 + $0x38] sm:$0xff]  ;;  %v1505_v54 = vld [vmem:[%s10897_s4 + $0x30] sm:$0xff] }
  0x10   :  { %6744 = vmatpush3.bf16.msk.msra.mxu0 %vm7519_vm5, %v7397_v20  ;;  %6824 = vmatprep.subr.bf16.mxu1 %v10905_v4  ;;  %vm7654_vm4 = vmpackc.low %vm67_vm3, %vm66_vm2  ;;  %vm1113_vm5 = vcmask 523264   ;;  %v7682_v55 = vld [vmem:[%s10894_s1 + $0x58] sm:$0xff]   ;;  %v1537_v57 = vld [vmem:[%s10897_s4 + $0x130] sm:$0xff] }
  0x11   :  { %1790 = vperm.xlu1 %6849, %v1544_v24   ;;  %1785 = vperm.xlu0 %6848, %v1543_v25   ;;  %v1538_v56 = vld [vmem:[%s10897_s4 + $0x138] sm:$0xff]  ;;  %v7698_v58 = vld [vmem:[%s10894_s1 + $0x50] sm:$0xff]   ;;  %v1504_v61 = vld [vmem:[%s10897_s4 + $0x28] sm:$0xff] }
  0x12   :  { %6745 = vmatprep.subr.msk.bf16.mxu0 %vm7544_vm8, %v7397_v20  ;;  %6422 = vmatprep.mubr.msk.bf16.mxu1 %vm1113_vm5, %v6868_v52  ;;  %v6863_v60 = vld [vmem:[%s10896_s3 + $0x10] sm:$0xff]   ;;  %v1503_v62 = vld [vmem:[%s10897_s4 + $0x20] sm:$0xff]  ;;  %v7720_v63 = vld [vmem:[%s10894_s1 + $0x48] sm:$0xff]  }
  0x13   :  { %6836 = vmatpush1.bf16.msra.mxu1 %v7542_v26  ;;  %v1536_v0 = vld [vmem:[%s10897_s4 + $0x128] sm:$0xff]  ;;  %v1535_v1 = vld [vmem:[%s10897_s4 + $0x120] sm:$0xff]  ;;  %v6865_v3 = vld [vmem:[%s10896_s3 + $0x18] sm:$0xff]  }
  0x14   :  { %6746 = vmatpush3.bf16.msk.msra.mxu0 %vm7544_vm8, %v7397_v20  ;;  %6825 = vmatprep.subr.bf16.mxu1 %v10905_v4  ;;  %vm6335_vm8 = vmpackc.low %vm65_vm7, %vm64_vm6  ;;  %v7732_v2 = vld [vmem:[%s10894_s1 + $0x40] sm:$0xff]   ;;  %v1502_v8 = vld [vmem:[%s10897_s4 + $0x18] sm:$0xff] }
  0x15   :  { %1620 = vperm.xlu1 %6849, %v1510_v30   ;;  %1615 = vperm.xlu0 %6848, %v1509_v31   ;;  %v6869_v7 = vld [vmem:[%s10896_s3 + $0x20] sm:$0xff]   ;;  %v1501_v9 = vld [vmem:[%s10897_s4 + $0x10] sm:$0xff]  ;;  %v1534_v12 = vld [vmem:[%s10897_s4 + $0x118] sm:$0xff] }
  0x16   :  { %6747 = vmatprep.subr.msk.bf16.mxu0 %vm7571_vm11, %v7397_v20  ;;  %v6871_v11 = vld [vmem:[%s10895_s2 + $0xa4] ss:$8 sps:$4 sm:$0xff]   ;;  %v6874_v15 = vld [vmem:[%s10896_s3 + $0x30] sm:$0xff]   ;;  %v6873_v17 = vld [vmem:[%s10895_s2 + $0xa0] ss:$8 sps:$4 sm:$0xff]  }
  0x17   :  { %6837 = vmatpush1.bf16.msra.mxu1 %v7569_v32  ;;  %v6870_v13 = vld [vmem:[%s10896_s3 + $0x28] sm:$0xff]   ;;  %v1499_v16 = vld [vmem:[%s10897_s4] sm:$0xff]  ;;  %v6875_v21 = vld [vmem:[%s10896_s3 + $0x38] sm:$0xff]  }
  0x18   :  { %6748 = vmatpush3.bf16.msk.msra.mxu0 %vm7571_vm11, %v7397_v20  ;;  %6826 = vmatprep.subr.bf16.mxu1 %v10905_v4  ;;  %v1500_v14 = vld [vmem:[%s10897_s4 + $0x8] sm:$0xff]  ;;  %v1530_v22 = vld [vmem:[%s10897_s4 + $0xf8] sm:$0xff]  ;;  %v6879_v23 = vld [vmem:[%s10896_s3 + $0x40] sm:$0xff]  }
  0x19   :  { %1780 = vperm.xlu1 %6849, %v1542_v34   ;;  %1775 = vperm.xlu0 %6848, %v1541_v37   ;;  %v1532_v19 = vld [vmem:[%s10897_s4 + $0x108] sm:$0xff]  ;;  %v1529_v24 = vld [vmem:[%s10897_s4 + $0xf0] sm:$0xff]  ;;  %v1562_v27 = vld [vmem:[%s10897_s4 + $0x1f8] sm:$0xff] }
  0x1a   :  { %6749 = vmatprep.subr.msk.bf16.mxu0 %vm7601_vm14, %v7397_v20  ;;  %v6878_v25 = vld [vmem:[%s10895_s2 + $0xb0] ss:$8 sps:$4 sm:$0xff]   ;;  %v6880_v29 = vld [vmem:[%s10896_s3 + $0x48] sm:$0xff]   ;;  %v6886_v34 = vld [vmem:[%s10895_s2 + $0xd4] ss:$8 sps:$4 sm:$0xff]  }
  0x1b   :  { %6838 = vmatpush1.bf16.msra.mxu1 %v7592_v38  ;;  %v1561_v28 = vld [vmem:[%s10897_s4 + $0x1f0] sm:$0xff]  ;;  %v1528_v31 = vld [vmem:[%s10897_s4 + $0xe8] sm:$0xff]  ;;  %v1559_v36 = vld [vmem:[%s10897_s4 + $0x1e0] sm:$0xff] }
  0x1c   :  { %6750 = vmatpush3.bf16.msk.msra.mxu0 %vm7601_vm14, %v7397_v20  ;;  %6827 = vmatprep.subr.bf16.mxu1 %v10905_v4  ;;  %v6884_v30 = vld [vmem:[%s10896_s3 + $0x50] sm:$0xff]   ;;  %v6883_v33 = vld [vmem:[%s10895_s2 + $0xc0] ss:$8 sps:$4 sm:$0xff]   ;;  %v6885_v37 = vld [vmem:[%s10896_s3 + $0x58] sm:$0xff]  }
  0x1d   :  { %1610 = vperm.xlu1 %6849, %v1508_v43   ;;  %1605 = vperm.xlu0 %6848, %v1507_v44   ;;  %v1560_v35 = vld [vmem:[%s10897_s4 + $0x1e8] sm:$0xff]  ;;  %v1526_v39 = vld [vmem:[%s10897_s4 + $0xd8] sm:$0xff]  ;;  %v1525_v40 = vld [vmem:[%s10897_s4 + $0xd0] sm:$0xff] }
  0x1e   :  { %6751 = vmatprep.subr.msk.bf16.mxu0 %vm7628_vm1, %v7397_v20  ;;  %v6888_v41 = vld [vmem:[%s10895_s2 + $0xd0] ss:$8 sps:$4 sm:$0xff]   ;;  %v6891_v42 = vld [vmem:[%s10895_s2 + $0xe4] ss:$8 sps:$4 sm:$0xff]  }
  0x1f   :  { %6839 = vmatpush1.bf16.msra.mxu1 %v7625_v45  ;;  %v1558_v43 = vld [vmem:[%s10897_s4 + $0x1d8] sm:$0xff]  ;;  %v1557_v44 = vld [vmem:[%s10897_s4 + $0x1d0] sm:$0xff]  ;;  %v1524_v46 = vld [vmem:[%s10897_s4 + $0xc8] sm:$0xff] }
  0x20   :  { %6752 = vmatpush3.bf16.msk.msra.mxu0 %vm7628_vm1, %v7397_v20  ;;  %6828 = vmatprep.subr.bf16.mxu1 %v10905_v4  ;;  %v6894_v47 = vld [vmem:[%s10896_s3 + $0x70] sm:$0xff]   ;;  %v1556_v51 = vld [vmem:[%s10897_s4 + $0x1c8] sm:$0xff]  ;;  %v1555_v52 = vld [vmem:[%s10897_s4 + $0x1c0] sm:$0xff] }
  0x21   :  { %1770 = vperm.xlu1 %6849, %v1540_v48   ;;  %1765 = vperm.xlu0 %6848, %v1539_v49   ;;  %v1523_v48 = vld [vmem:[%s10897_s4 + $0xc0] sm:$0xff] }
  0x22   :  { %6753 = vmatprep.subr.msk.bf16.mxu0 %vm7654_vm4, %v7397_v20  ;;  %v6893_v49 = vld [vmem:[%s10895_s2 + $0xe0] ss:$8 sps:$4 sm:$0xff]  }
  0x23   :  { %6840 = vmatpush1.bf16.msra.mxu1 %v7652_v50 }
  0x24   :  { %6754 = vmatpush3.bf16.msk.msra.mxu0 %vm7654_vm4, %v7397_v20  ;;  %6829 = vmatprep.subr.bf16.mxu1 %v10905_v4 }
  0x25   :  { %1600 = vperm.xlu1 %6849, %v1506_v53   ;;  %1595 = vperm.xlu0 %6848, %v1505_v54   ;;  %v6895_v53 = vld [vmem:[%s10896_s3 + $0x78] sm:$0xff]   ;;  %v6899_v54 = vld [vmem:[%s10896_s3 + $0x80] sm:$0xff]  }
  0x26   :  { %6755 = vmatprep.subr.msk.bf16.mxu0 %vm6335_vm8, %v7397_v20 }
  0x27   :  { %6841 = vmatpush2.bf16.msra.mxu1 %v7682_v55 }
  0x28   :  { %6756 = vmatpush3.bf16.msk.msra.mxu0 %vm6335_vm8, %v7397_v20  ;;  %6830 = vmatprep.subr.bf16.mxu1 %v10905_v4  ;;  %v1531_v20 = vld [vmem:[%s10897_s4 + $0x100] sm:$0xff] }
  0x29   :  { %1760 = vperm.xlu1 %6849, %v1538_v56   ;;  %1755 = vperm.xlu0 %6848, %v1537_v57   ;;  %v1521_v56 = vld [vmem:[%s10897_s4 + $0xb0] sm:$0xff] }
  0x2a   :  { %1210 = vmatprep.subr.bf16.mxu0 %v10905_v4  ;;  %v6898_v57 = vld [vmem:[%s10895_s2 + $0xf0] ss:$8 sps:$4 sm:$0xff]  }
  0x2b   :  { %6842 = vmatpush2.bf16.msra.mxu1 %v7698_v58  ;;  %6758 = vmatmul.mubr.bf16.vlgmr.msra.gmra.mxu0 %v6861_v59  ;;  %v1554_v59 = vld [vmem:[%s10897_s4 + $0x1b8] sm:$0xff] }
  0x2c   :  { %6831 = vmatprep.subr.bf16.mxu1 %v10905_v4  ;;  %6761 = vmatprep.mubr.bf16.mxu0 %v6863_v60  ;;  %v1553_v60 = vld [vmem:[%s10897_s4 + $0x1b0] sm:$0xff] }
  0x2d   :  { %1590 = vperm.xlu1 %6849, %v1504_v61   ;;  %1585 = vperm.xlu0 %6848, %v1503_v62   ;;  %v6900_v61 = vld [vmem:[%s10896_s3 + $0x88] sm:$0xff]   ;;  %v6904_v62 = vld [vmem:[%s10896_s3 + $0x90] sm:$0xff]  }
  0x2e   :  { %1211 = vmatpush1.bf16.msra.mxu0 %v7473_v5  ;;  %v6866_v5 = vld [vmem:[%s10895_s2 + $0x90] ss:$8 sps:$4 sm:$0xff]  }
  0x2f   :  { %6843 = vmatpush2.bf16.msra.mxu1 %v7720_v63  ;;  %1212 = vmatprep.subr.bf16.mxu0 %v10905_v4 }
  0x30   :  { %6832 = vmatprep.subr.bf16.mxu1 %v10905_v4 }
  0x31   :  { %1750 = vperm.xlu1 %6849, %v1536_v0   ;;  %1745 = vperm.xlu0 %6848, %v1535_v1   ;;  %v1519_v0 = vld [vmem:[%s10897_s4 + $0xa0] sm:$0xff] }
  0x32   :  { %1213 = vmatpush1.bf16.msra.mxu0 %v7493_v10  ;;  %v1533_v10 = vld [vmem:[%s10897_s4 + $0x110] sm:$0xff]  ;;  %v6903_v1 = vld [vmem:[%s10895_s2 + $0x100] ss:$8 sps:$4 sm:$0xff]  }
  0x33   :  { %6844 = vmatpush2.bf16.msra.mxu1 %v7732_v2  ;;  %6762 = vmatmul.mubr.bf16.gmra.mxu0 %v6865_v3  ;;  %v1552_v3 = vld [vmem:[%s10897_s4 + $0x1a8] sm:$0xff] }
  0x34   :  { %6765 = vmatprep.mubr.bf16.mxu0 %v6869_v7  ;;  %1214 = vmatprep.subr.bf16.mxu0 %v10905_v4  ;;  %v1551_v7 = vld [vmem:[%s10897_s4 + $0x1a0] sm:$0xff] }
  0x35   :  { %1580 = vperm.xlu1 %6849, %v1502_v8   ;;  %1575 = vperm.xlu0 %6848, %v1501_v9   ;;  %v6909_v8 = vld [vmem:[%s10896_s3 + $0xa0] sm:$0xff]   ;;  %v1518_v9 = vld [vmem:[%s10897_s4 + $0x98] sm:$0xff] }
  0x36   :  { %1315 = vmatmul.mubr.bf16.vlgmr.msra.gmra.mxu1 %v6866_v5  ;;  %1215 = vmatpush1.bf16.msra.mxu0 %v7512_v18  ;;  %v6876_v18 = vld [vmem:[%s10895_s2 + $0xb4] ss:$8 sps:$4 sm:$0xff]  }
  0x37   :  { %6423 = vmatprep.mubr.msk.bf16.mxu1 %vm1113_vm5, %v6871_v11  ;;  %1216 = vmatprep.subr.bf16.mxu0 %v10905_v4  ;;  %v6905_v5 = vld [vmem:[%s10896_s3 + $0x98] sm:$0xff]   ;;  %v1517_v11 = vld [vmem:[%s10897_s4 + $0x90] sm:$0xff] }
  0x38   :  { %3484 = vmatprep.subr.bf16.mxu1 %v10905_v4 }
  0x39   :  { %1740 = vperm.xlu1 %6849, %v1534_v12   ;;  %1735 = vperm.xlu0 %6848, %v1533_v10   ;;  %v6908_v12 = vld [vmem:[%s10895_s2 + $0x110] ss:$8 sps:$4 sm:$0xff]   ;;  %v6911_v10 = vld [vmem:[%s10895_s2 + $0x124] ss:$8 sps:$4 sm:$0xff]  }
  0x3a   :  { %1217 = vmatpush1.bf16.msra.mxu0 %v7542_v26  ;;  %v6881_v26 = vld [vmem:[%s10895_s2 + $0xc4] ss:$8 sps:$4 sm:$0xff]  }
  0x3b   :  { %6766 = vmatmul.mubr.bf16.gmra.mxu0 %v6870_v13  ;;  %1218 = vmatprep.subr.bf16.mxu0 %v10905_v4  ;;  %v1550_v13 = vld [vmem:[%s10897_s4 + $0x198] sm:$0xff] }
  0x3c   :  { %6769 = vmatprep.mubr.bf16.mxu0 %v6874_v15  ;;  %v6910_v15 = vld [vmem:[%s10896_s3 + $0xa8] sm:$0xff]  }
  0x3d   :  { %1570 = vperm.xlu1 %6849, %v1500_v14   ;;  %1565 = vperm.xlu0 %6848, %v1499_v16   ;;  %v1549_v14 = vld [vmem:[%s10897_s4 + $0x190] sm:$0xff] }
  0x3e   :  { %1323 = vmatmul.mubr.bf16.gmra.mxu1 %v6873_v17  ;;  %1219 = vmatpush1.bf16.msra.mxu0 %v7569_v32  ;;  %v1527_v32 = vld [vmem:[%s10897_s4 + $0xe0] sm:$0xff]  ;;  %v6914_v16 = vld [vmem:[%s10896_s3 + $0xb0] sm:$0xff]   ;;  %v1516_v17 = vld [vmem:[%s10897_s4 + $0x88] sm:$0xff] }
  0x3f   :  { %6424 = vmatprep.mubr.msk.bf16.mxu1 %vm1113_vm5, %v6876_v18  ;;  %1220 = vmatprep.subr.bf16.mxu0 %v10905_v4  ;;  %v1515_v18 = vld [vmem:[%s10897_s4 + $0x80] sm:$0xff] }
  0x41   :  { %1730 = vperm.xlu1 %6849, %v1532_v19   ;;  %1725 = vperm.xlu0 %6848, %v1531_v20   ;;  %v6913_v19 = vld [vmem:[%s10895_s2 + $0x120] ss:$8 sps:$4 sm:$0xff]   ;;  %v6916_v20 = vld [vmem:[%s10895_s2 + $0x134] ss:$8 sps:$4 sm:$0xff]  }
  0x42   :  { %1221 = vmatpush1.bf16.msra.mxu0 %v7592_v38  ;;  %v6889_v38 = vld [vmem:[%s10896_s3 + $0x60] sm:$0xff]  }
  0x43   :  { %6770 = vmatmul.mubr.bf16.gmra.mxu0 %v6875_v21  ;;  %1222 = vmatprep.subr.bf16.mxu0 %v10905_v4  ;;  %v1548_v21 = vld [vmem:[%s10897_s4 + $0x188] sm:$0xff] }
  0x44   :  { %6773 = vmatprep.mubr.bf16.mxu0 %v6879_v23  ;;  %v6915_v23 = vld [vmem:[%s10896_s3 + $0xb8] sm:$0xff]  }
  0x45   :  { %1720 = vperm.xlu1 %6849, %v1530_v22   ;;  %1715 = vperm.xlu0 %6848, %v1529_v24   ;;  %v1547_v22 = vld [vmem:[%s10897_s4 + $0x180] sm:$0xff] }
  0x46   :  { %1331 = vmatmul.mubr.bf16.gmra.mxu1 %v6878_v25  ;;  %1223 = vmatpush1.bf16.msra.mxu0 %v7625_v45  ;;  %v6890_v45 = vld [vmem:[%s10896_s3 + $0x68] sm:$0xff]  }
  0x47   :  { %6425 = vmatprep.mubr.msk.bf16.mxu1 %vm1113_vm5, %v6881_v26  ;;  %1224 = vmatprep.subr.bf16.mxu0 %v10905_v4  ;;  %v6919_v26 = vld [vmem:[%s10896_s3 + $0xc0] sm:$0xff]  }
  0x49   :  { %1880 = vperm.xlu1 %6849, %v1562_v27   ;;  %1875 = vperm.xlu0 %6848, %v1561_v28   ;;  %v2172_v27 = vld [vmem:[%s10899_s6 + $0x8] sm:$0xff]  ;;  %v2171_v28 = vld [vmem:[%s10899_s6] sm:$0xff] }
  0x4a   :  { %1225 = vmatpush1.bf16.msra.mxu0 %v7652_v50  ;;  %v6896_v50 = vld [vmem:[%s10895_s2 + $0xf4] ss:$8 sps:$4 sm:$0xff]  }
  0x4b   :  { %6774 = vmatmul.mubr.bf16.gmra.mxu0 %v6880_v29  ;;  %1234 = vmatprep.subr.bf16.mxu0 %v10905_v4  ;;  %v6918_v29 = vld [vmem:[%s10895_s2 + $0x130] ss:$8 sps:$4 sm:$0xff]  }
  0x4c   :  { %6777 = vmatprep.mubr.bf16.mxu0 %v6884_v30  ;;  %v6921_v30 = vld [vmem:[%s10895_s2 + $0x144] ss:$8 sps:$4 sm:$0xff]  }
  0x4d   :  { %1710 = vperm.xlu1 %6849, %v1528_v31   ;;  %1705 = vperm.xlu0 %6848, %v1527_v32  }
  0x4e   :  { %1339 = vmatmul.mubr.bf16.gmra.mxu1 %v6883_v33  ;;  %1235 = vmatpush2.bf16.msra.mxu0 %v7682_v55  ;;  %v1522_v55 = vld [vmem:[%s10897_s4 + $0xb8] sm:$0xff] }
  0x4f   :  { %6426 = vmatprep.mubr.msk.bf16.mxu1 %vm1113_vm5, %v6886_v34  ;;  %1236 = vmatprep.subr.bf16.mxu0 %v10905_v4  ;;  %v2174_v33 = vld [vmem:[%s10899_s6 + $0x18] sm:$0xff]  ;;  %v2173_v34 = vld [vmem:[%s10899_s6 + $0x10] sm:$0xff] }
  0x51   :  { %1870 = vperm.xlu1 %6849, %v1560_v35   ;;  %1865 = vperm.xlu0 %6848, %v1559_v36   ;;  %v6920_v35 = vld [vmem:[%s10896_s3 + $0xc8] sm:$0xff]   ;;  %v6924_v36 = vld [vmem:[%s10896_s3 + $0xd0] sm:$0xff]  }
  0x52   :  { %1237 = vmatpush2.bf16.msra.mxu0 %v7698_v58  ;;  %v6901_v58 = vld [vmem:[%s10895_s2 + $0x104] ss:$8 sps:$4 sm:$0xff]  }
  0x53   :  { %6778 = vmatmul.mubr.bf16.gmra.mxu0 %v6885_v37  ;;  %1238 = vmatprep.subr.bf16.mxu0 %v10905_v4 }
  0x54   :  { %6781 = vmatprep.mubr.bf16.mxu0 %v6889_v38 }
  0x55   :  { %1700 = vperm.xlu1 %6849, %v1526_v39   ;;  %1695 = vperm.xlu0 %6848, %v1525_v40   ;;  %v2176_v39 = vld [vmem:[%s10899_s6 + $0x28] sm:$0xff]  ;;  %v2175_v40 = vld [vmem:[%s10899_s6 + $0x20] sm:$0xff] }
  0x56   :  { %1347 = vmatmul.mubr.bf16.gmra.mxu1 %v6888_v41  ;;  %1239 = vmatpush2.bf16.msra.mxu0 %v7720_v63  ;;  %v1520_v63 = vld [vmem:[%s10897_s4 + $0xa8] sm:$0xff] }
  0x57   :  { %6427 = vmatprep.mubr.msk.bf16.mxu1 %vm1113_vm5, %v6891_v42  ;;  %1240 = vmatprep.subr.bf16.mxu0 %v10905_v4  ;;  %v6923_v41 = vld [vmem:[%s10895_s2 + $0x140] ss:$8 sps:$4 sm:$0xff]   ;;  %v6926_v42 = vld [vmem:[%s10895_s2 + $0x154] ss:$8 sps:$4 sm:$0xff]  }
  0x59   :  { %1860 = vperm.xlu1 %6849, %v1558_v43   ;;  %1855 = vperm.xlu0 %6848, %v1557_v44  }
  0x5a   :  { %1241 = vmatpush2.bf16.msra.mxu0 %v7732_v2  ;;  %v6906_v2 = vld [vmem:[%s10895_s2 + $0x114] ss:$8 sps:$4 sm:$0xff]  }
  0x5b   :  { %6782 = vmatmul.mubr.bf16.gmra.mxu0 %v6890_v45  ;;  %3195 = vmatprep.subr.bf16.mxu0 %v10905_v4  ;;  %v2178_v45 = vld [vmem:[%s10899_s6 + $0x38] sm:$0xff] }
  0x5c   :  { %6785 = vmatprep.mubr.bf16.mxu0 %v6894_v47  ;;  %v6925_v47 = vld [vmem:[%s10896_s3 + $0xd8] sm:$0xff]  }
  0x5d   :  { %1690 = vperm.xlu1 %6849, %v1524_v46   ;;  %1685 = vperm.xlu0 %6848, %v1523_v48   ;;  %v2177_v46 = vld [vmem:[%s10899_s6 + $0x30] sm:$0xff]  ;;  %v6929_v48 = vld [vmem:[%s10896_s3 + $0xe0] sm:$0xff]  }
  0x5e   :  { %1355 = vmatmul.mubr.bf16.gmra.mxu1 %v6893_v49 }
  0x5f   :  { %6428 = vmatprep.mubr.msk.bf16.mxu1 %vm1113_vm5, %v6896_v50 }
  0x61   :  { %1850 = vperm.xlu1 %6849, %v1556_v51   ;;  %1845 = vperm.xlu0 %6848, %v1555_v52   ;;  %v2180_v51 = vld [vmem:[%s10899_s6 + $0x48] sm:$0xff]  ;;  %v2179_v52 = vld [vmem:[%s10899_s6 + $0x40] sm:$0xff] }
  0x63   :  { %6786 = vmatmul.mubr.bf16.gmra.mxu0 %v6895_v53  ;;  %v6928_v53 = vld [vmem:[%s10895_s2 + $0x150] ss:$8 sps:$4 sm:$0xff]  }
  0x64   :  { %6789 = vmatprep.mubr.bf16.mxu0 %v6899_v54  ;;  %v6931_v54 = vld [vmem:[%s10895_s2 + $0x164] ss:$8 sps:$4 sm:$0xff]  }
  0x65   :  { %1680 = vperm.xlu1 %6849, %v1522_v55   ;;  %1675 = vperm.xlu0 %6848, %v1521_v56  }
  0x66   :  { %1363 = vmatmul.mubr.bf16.gmra.mxu1 %v6898_v57  ;;  %v2182_v57 = vld [vmem:[%s10899_s6 + $0x58] sm:$0xff] }
  0x67   :  { %6429 = vmatprep.mubr.msk.bf16.mxu1 %vm1113_vm5, %v6901_v58  ;;  %v2181_v58 = vld [vmem:[%s10899_s6 + $0x50] sm:$0xff] }
  0x69   :  { %1840 = vperm.xlu1 %6849, %v1554_v59   ;;  %1835 = vperm.xlu0 %6848, %v1553_v60   ;;  %v6930_v59 = vld [vmem:[%s10896_s3 + $0xe8] sm:$0xff]   ;;  %v6934_v60 = vld [vmem:[%s10896_s3 + $0xf0] sm:$0xff]  }
  0x6b   :  { %6790 = vmatmul.mubr.bf16.gmra.mxu0 %v6900_v61 }
  0x6c   :  { %6793 = vmatprep.mubr.bf16.mxu0 %v6904_v62 }
  0x6d   :  { %1670 = vperm.xlu1 %6849, %v1520_v63   ;;  %1665 = vperm.xlu0 %6848, %v1519_v0   ;;  %v2184_v63 = vld [vmem:[%s10899_s6 + $0x68] sm:$0xff]  ;;  %v2183_v0 = vld [vmem:[%s10899_s6 + $0x60] sm:$0xff] }
  0x6e   :  { %1371 = vmatmul.mubr.bf16.gmra.mxu1 %v6903_v1  ;;  %v6933_v1 = vld [vmem:[%s10895_s2 + $0x160] ss:$8 sps:$4 sm:$0xff]  }
  0x6f   :  { %6430 = vmatprep.mubr.msk.bf16.mxu1 %vm1113_vm5, %v6906_v2  ;;  %v6936_v2 = vld [vmem:[%s10895_s2 + $0x174] ss:$8 sps:$4 sm:$0xff]  }
  0x71   :  { %1830 = vperm.xlu1 %6849, %v1552_v3   ;;  %1825 = vperm.xlu0 %6848, %v1551_v7  }
  0x73   :  { %6794 = vmatmul.mubr.bf16.gmra.mxu0 %v6905_v5  ;;  %v2186_v5 = vld [vmem:[%s10899_s6 + $0x78] sm:$0xff] }
  0x74   :  { %6797 = vmatprep.mubr.bf16.mxu0 %v6909_v8  ;;  %v2185_v8 = vld [vmem:[%s10899_s6 + $0x70] sm:$0xff] }
  0x75   :  { %1660 = vperm.xlu1 %6849, %v1518_v9   ;;  %1655 = vperm.xlu0 %6848, %v1517_v11   ;;  %v6935_v9 = vld [vmem:[%s10896_s3 + $0xf8] sm:$0xff]   ;;  %v6941_v11 = vld [vmem:[%s10895_s2 + $0x4] ss:$8 sps:$4 sm:$0xff]  }
  0x76   :  { %1379 = vmatmul.mubr.bf16.gmra.mxu1 %v6908_v12 }
  0x77   :  { %6431 = vmatprep.mubr.msk.bf16.mxu1 %vm1113_vm5, %v6911_v10 }
  0x79   :  { %1820 = vperm.xlu1 %6849, %v1550_v13   ;;  %1815 = vperm.xlu0 %6848, %v1549_v14   ;;  %v2188_v13 = vld [vmem:[%s10899_s6 + $0x88] sm:$0xff]  ;;  %v2187_v14 = vld [vmem:[%s10899_s6 + $0x80] sm:$0xff] }
  0x7b   :  { %6798 = vmatmul.mubr.bf16.gmra.mxu0 %v6910_v15  ;;  %v6938_v15 = vld [vmem:[%s10895_s2 + $0x170] ss:$8 sps:$4 sm:$0xff]  }
  0x7c   :  { %6801 = vmatprep.mubr.bf16.mxu0 %v6914_v16  ;;  %v6942_v16 = vld [vmem:[%s10895_s2 + $0x184] ss:$8 sps:$4 sm:$0xff]  }
  0x7d   :  { %1650 = vperm.xlu1 %6849, %v1516_v17   ;;  %1645 = vperm.xlu0 %6848, %v1515_v18  }
  0x7e   :  { %1387 = vmatmul.mubr.bf16.gmra.mxu1 %v6913_v19  ;;  %v2190_v19 = vld [vmem:[%s10899_s6 + $0x98] sm:$0xff] }
  0x7f   :  { %6432 = vmatprep.mubr.msk.bf16.mxu1 %vm1113_vm5, %v6916_v20  ;;  %v2189_v20 = vld [vmem:[%s10899_s6 + $0x90] sm:$0xff] }
  0x80   :  { %v8015_v24 = vpop.permute.xlu1 %1795  ;;  %v8017_v25 = vpop.permute.xlu0 %1635 }
  0x81   :  { %10921 = vst [vmem:[#allocation7_spill] sm:$0xff] %v8017_v25  ;;  %1810 = vperm.xlu1 %6849, %v1548_v21   ;;  %1805 = vperm.xlu0 %6848, %v1547_v22   ;;  %v6939_v21 = vld [vmem:[%s10895_s2] ss:$8 sps:$4 sm:$0xff]   ;;  %v6945_v22 = vld [vmem:[%s10895_s2 + $0x14] ss:$8 sps:$4 sm:$0xff]  }
  0x83   :  { %6802 = vmatmul.mubr.bf16.gmra.mxu0 %v6915_v23 }
  0x84   :  { %v8034_v31 = vpop.permute.xlu1 %1800  ;;  %v8036_v32 = vpop.permute.xlu0 %1640  ;;  %6805 = vmatprep.mubr.bf16.mxu0 %v6919_v26 }
  0x85   :  { %10922 = vst [vmem:[#allocation8_spill] sm:$0xff] %v8036_v32  ;;  %2242 = vperm.xlu1 %6849, %v2172_v27   ;;  %2237 = vperm.xlu0 %6848, %v2171_v28   ;;  %v2192_v27 = vld [vmem:[%s10899_s6 + $0xa8] sm:$0xff]  ;;  %v2191_v28 = vld [vmem:[%s10899_s6 + $0xa0] sm:$0xff] }
  0x86   :  { %1395 = vmatmul.mubr.bf16.gmra.mxu1 %v6918_v29  ;;  %v6944_v29 = vld [vmem:[%s10895_s2 + $0x180] ss:$8 sps:$4 sm:$0xff]  }
  0x87   :  { %6433 = vmatprep.mubr.msk.bf16.mxu1 %vm1113_vm5, %v6921_v30  ;;  %v6948_v30 = vld [vmem:[%s10895_s2 + $0x194] ss:$8 sps:$4 sm:$0xff]  }
  0x88   :  { %v8051_v37 = vpop.permute.xlu1 %1630  ;;  %v8053_v38 = vpop.permute.xlu0 %1625 }
  0x89   :  { %10923 = vst [vmem:[#allocation9_spill] sm:$0xff] %v8051_v37  ;;  %10924 = vst [vmem:[#allocation10_spill] sm:$0xff] %v8053_v38  ;;  %2252 = vperm.xlu1 %6849, %v2174_v33   ;;  %2247 = vperm.xlu0 %6848, %v2173_v34  }
  0x8b   :  { %6806 = vmatmul.mubr.bf16.gmra.mxu0 %v6920_v35  ;;  %v2194_v35 = vld [vmem:[%s10899_s6 + $0xb8] sm:$0xff] }
  0x8c   :  { %v8067_v43 = vpop.permute.xlu1 %1790  ;;  %v8069_v44 = vpop.permute.xlu0 %1785  ;;  %6809 = vmatprep.mubr.bf16.mxu0 %v6924_v36  ;;  %v2193_v36 = vld [vmem:[%s10899_s6 + $0xb0] sm:$0xff] }
  0x8d   :  { %2262 = vperm.xlu1 %6849, %v2176_v39   ;;  %2257 = vperm.xlu0 %6848, %v2175_v40   ;;  %v6947_v39 = vld [vmem:[%s10895_s2 + $0x10] ss:$8 sps:$4 sm:$0xff]   ;;  %v6951_v40 = vld [vmem:[%s10895_s2 + $0x24] ss:$8 sps:$4 sm:$0xff]  }
  0x8e   :  { %1403 = vmatmul.mubr.bf16.gmra.mxu1 %v6923_v41 }
  0x8f   :  { %6434 = vmatprep.mubr.msk.bf16.mxu1 %vm1113_vm5, %v6926_v42 }
  0x90   :  { %v8084_v49 = vpop.permute.xlu1 %1620  ;;  %v8086_v50 = vpop.permute.xlu0 %1615 }
  0x91   :  { %10925 = vst [vmem:[#allocation11_spill] sm:$0xff] %v8084_v49  ;;  %10926 = vst [vmem:[#allocation12_spill] sm:$0xff] %v8086_v50  ;;  %2272 = vperm.xlu1 %6849, %v2178_v45   ;;  %2267 = vperm.xlu0 %6848, %v2177_v46   ;;  %v2196_v45 = vld [vmem:[%s10899_s6 + $0xc8] sm:$0xff]  ;;  %v2195_v46 = vld [vmem:[%s10899_s6 + $0xc0] sm:$0xff] }
  0x93   :  { %6810 = vmatmul.mubr.bf16.gmra.mxu0 %v6925_v47  ;;  %v6950_v47 = vld [vmem:[%s10895_s2 + $0x190] ss:$8 sps:$4 sm:$0xff]  }
  0x94   :  { %v8100_v55 = vpop.permute.xlu1 %1780  ;;  %v8102_v56 = vpop.permute.xlu0 %1775  ;;  %6813 = vmatprep.mubr.bf16.mxu0 %v6929_v48  ;;  %v6954_v48 = vld [vmem:[%s10895_s2 + $0x1a4] ss:$8 sps:$4 sm:$0xff]  }
  0x95   :  { %2282 = vperm.xlu1 %6849, %v2180_v51   ;;  %2277 = vperm.xlu0 %6848, %v2179_v52  }
  0x96   :  { %1411 = vmatmul.mubr.bf16.gmra.mxu1 %v6928_v53  ;;  %v2198_v53 = vld [vmem:[%s10899_s6 + $0xd8] sm:$0xff] }
  0x97   :  { %6435 = vmatprep.mubr.msk.bf16.mxu1 %vm1113_vm5, %v6931_v54  ;;  %v2197_v54 = vld [vmem:[%s10899_s6 + $0xd0] sm:$0xff] }
  0x98   :  { %v8117_v61 = vpop.permute.xlu1 %1610  ;;  %v8119_v62 = vpop.permute.xlu0 %1605 }
  0x99   :  { %10927 = vst [vmem:[#allocation13_spill] sm:$0xff] %v8117_v61  ;;  %10928 = vst [vmem:[#allocation14_spill] sm:$0xff] %v8119_v62  ;;  %2292 = vperm.xlu1 %6849, %v2182_v57   ;;  %2287 = vperm.xlu0 %6848, %v2181_v58   ;;  %v6953_v57 = vld [vmem:[%s10895_s2 + $0x20] ss:$8 sps:$4 sm:$0xff]   ;;  %v6957_v58 = vld [vmem:[%s10895_s2 + $0x34] ss:$8 sps:$4 sm:$0xff]  }
  0x9b   :  { %6814 = vmatmul.mubr.bf16.gmra.mxu0 %v6930_v59 }
  0x9c   :  { %v8133_v3 = vpop.permute.xlu1 %1770  ;;  %v8135_v7 = vpop.permute.xlu0 %1765  ;;  %6817 = vmatprep.mubr.bf16.mxu0 %v6934_v60 }
  0x9d   :  { %2302 = vperm.xlu1 %6849, %v2184_v63   ;;  %2297 = vperm.xlu0 %6848, %v2183_v0   ;;  %v2200_v63 = vld [vmem:[%s10899_s6 + $0xe8] sm:$0xff]  ;;  %v2199_v0 = vld [vmem:[%s10899_s6 + $0xe0] sm:$0xff] }
  0x9e   :  { %1419 = vmatmul.mubr.bf16.gmra.mxu1 %v6933_v1  ;;  %v6956_v1 = vld [vmem:[%s10895_s2 + $0x1a0] ss:$8 sps:$4 sm:$0xff]  }
  0x9f   :  { %6436 = vmatprep.mubr.msk.bf16.mxu1 %vm1113_vm5, %v6936_v2  ;;  %v6960_v2 = vld [vmem:[%s10895_s2 + $0x1b4] ss:$8 sps:$4 sm:$0xff]  }
  0xa0   :  { %v8150_v12 = vpop.permute.xlu1 %1600  ;;  %v8152_v10 = vpop.permute.xlu0 %1595 }
  0xa1   :  { %10929 = vst [vmem:[#allocation15_spill] sm:$0xff] %v8150_v12  ;;  %10930 = vst [vmem:[#allocation16_spill] sm:$0xff] %v8152_v10  ;;  %2312 = vperm.xlu1 %6849, %v2186_v5   ;;  %2307 = vperm.xlu0 %6848, %v2185_v8  }
  0xa3   :  { %6818 = vmatmul.mubr.bf16.gmra.mxu0 %v6935_v9  ;;  %v2202_v9 = vld [vmem:[%s10899_s6 + $0xf8] sm:$0xff] }
  0xa4   :  { %v8166_v17 = vpop.permute.xlu1 %1760  ;;  %v8168_v18 = vpop.permute.xlu0 %1755  ;;  %6413 = vmatprep.mubr.msk.bf16.mxu0 %vm1113_vm5, %v6941_v11  ;;  %v2201_v11 = vld [vmem:[%s10899_s6 + $0xf0] sm:$0xff] }
  0xa5   :  { %2322 = vperm.xlu1 %6849, %v2188_v13   ;;  %2317 = vperm.xlu0 %6848, %v2187_v14   ;;  %v6959_v13 = vld [vmem:[%s10895_s2 + $0x30] ss:$8 sps:$4 sm:$0xff]   ;;  %v6963_v14 = vld [vmem:[%s10895_s2 + $0x44] ss:$8 sps:$4 sm:$0xff]  }
  0xa6   :  { %1427 = vmatmul.mubr.bf16.gmra.mxu1 %v6938_v15 }
  0xa7   :  { %6437 = vmatprep.mubr.msk.bf16.mxu1 %vm1113_vm5, %v6942_v16 }
  0xa8   :  { %v8184_v23 = vpop.permute.xlu1 %1590  ;;  %v8186_v26 = vpop.permute.xlu0 %1585 }
  0xa9   :  { %10931 = vst [vmem:[#allocation17_spill] sm:$0xff] %v8184_v23  ;;  %10932 = vst [vmem:[#allocation18_spill] sm:$0xff] %v8186_v26  ;;  %2332 = vperm.xlu1 %6849, %v2190_v19   ;;  %2327 = vperm.xlu0 %6848, %v2189_v20   ;;  %v2204_v19 = vld [vmem:[%s10899_s6 + $0x108] sm:$0xff]  ;;  %v2203_v20 = vld [vmem:[%s10899_s6 + $0x100] sm:$0xff] }
  0xab   :  { %1243 = vmatmul.mubr.bf16.vlgmr.msra.gmra.mxu0 %v6939_v21  ;;  %v6962_v21 = vld [vmem:[%s10895_s2 + $0x1b0] ss:$8 sps:$4 sm:$0xff]  }
  0xac   :  { %v8200_v33 = vpop.permute.xlu1 %1750  ;;  %v8202_v34 = vpop.permute.xlu0 %1745  ;;  %6414 = vmatprep.mubr.msk.bf16.mxu0 %vm1113_vm5, %v6945_v22  ;;  %v6966_v22 = vld [vmem:[%s10895_s2 + $0x1c4] ss:$8 sps:$4 sm:$0xff]  }
  0xad   :  { %2342 = vperm.xlu1 %6849, %v2192_v27   ;;  %2337 = vperm.xlu0 %6848, %v2191_v28  }
  0xae   :  { %1435 = vmatmul.mubr.bf16.gmra.mxu1 %v6944_v29  ;;  %v2206_v29 = vld [vmem:[%s10899_s6 + $0x118] sm:$0xff] }
  0xaf   :  { %6438 = vmatprep.mubr.msk.bf16.mxu1 %vm1113_vm5, %v6948_v30  ;;  %v2205_v30 = vld [vmem:[%s10899_s6 + $0x110] sm:$0xff] }
  0xb0   :  { %v8218_v41 = vpop.permute.xlu1 %1580  ;;  %v8220_v42 = vpop.permute.xlu0 %1575 }
  0xb1   :  { %2352 = vperm.xlu1 %6849, %v2194_v35   ;;  %2347 = vperm.xlu0 %6848, %v2193_v36   ;;  %v6965_v35 = vld [vmem:[%s10895_s2 + $0x40] ss:$8 sps:$4 sm:$0xff]   ;;  %v6969_v36 = vld [vmem:[%s10895_s2 + $0x54] ss:$8 sps:$4 sm:$0xff]  }
  0xb3   :  { %1251 = vmatmul.mubr.bf16.gmra.mxu0 %v6947_v39 }
  0xb4   :  { %v8234_v51 = vpop.permute.xlu1 %1740  ;;  %v8236_v52 = vpop.permute.xlu0 %1735  ;;  %6415 = vmatprep.mubr.msk.bf16.mxu0 %vm1113_vm5, %v6951_v40 }
  0xb5   :  { %2362 = vperm.xlu1 %6849, %v2196_v45   ;;  %2357 = vperm.xlu0 %6848, %v2195_v46   ;;  %v2208_v45 = vld [vmem:[%s10899_s6 + $0x128] sm:$0xff]  ;;  %v2207_v46 = vld [vmem:[%s10899_s6 + $0x120] sm:$0xff] }
  0xb6   :  { %1443 = vmatmul.mubr.bf16.gmra.mxu1 %v6950_v47  ;;  %v6968_v47 = vld [vmem:[%s10895_s2 + $0x1c0] ss:$8 sps:$4 sm:$0xff]  }
  0xb7   :  { %6439 = vmatprep.mubr.msk.bf16.mxu1 %vm1113_vm5, %v6954_v48  ;;  %v6972_v48 = vld [vmem:[%s10895_s2 + $0x1d4] ss:$8 sps:$4 sm:$0xff]  }
  0xb8   :  { %v8252_v59 = vpop.permute.xlu1 %1570  ;;  %v8254_v60 = vpop.permute.xlu0 %1565 }
  0xb9   :  { %2372 = vperm.xlu1 %6849, %v2198_v53   ;;  %2367 = vperm.xlu0 %6848, %v2197_v54  }
  0xbb   :  { %1259 = vmatmul.mubr.bf16.gmra.mxu0 %v6953_v57  ;;  %v2210_v57 = vld [vmem:[%s10899_s6 + $0x138] sm:$0xff] }
  0xbc   :  { %v8268_v5 = vpop.permute.xlu1 %1730  ;;  %v8270_v8 = vpop.permute.xlu0 %1725  ;;  %6416 = vmatprep.mubr.msk.bf16.mxu0 %vm1113_vm5, %v6957_v58  ;;  %v2209_v58 = vld [vmem:[%s10899_s6 + $0x130] sm:$0xff] }
  0xbd   :  { %2382 = vperm.xlu1 %6849, %v2200_v63   ;;  %2377 = vperm.xlu0 %6848, %v2199_v0   ;;  %v6971_v63 = vld [vmem:[%s10895_s2 + $0x50] ss:$8 sps:$4 sm:$0xff]   ;;  %v6975_v0 = vld [vmem:[%s10895_s2 + $0x64] ss:$8 sps:$4 sm:$0xff]  }
  0xbe   :  { %1451 = vmatmul.mubr.bf16.gmra.mxu1 %v6956_v1 }
  0xbf   :  { %6440 = vmatprep.mubr.msk.bf16.mxu1 %vm1113_vm5, %v6960_v2 }
  0xc0   :  { %v8286_v15 = vpop.permute.xlu1 %1720  ;;  %v8288_v16 = vpop.permute.xlu0 %1715 }
  0xc1   :  { %2392 = vperm.xlu1 %6849, %v2202_v9   ;;  %2387 = vperm.xlu0 %6848, %v2201_v11   ;;  %v2212_v9 = vld [vmem:[%s10899_s6 + $0x148] sm:$0xff]  ;;  %v2211_v11 = vld [vmem:[%s10899_s6 + $0x140] sm:$0xff] }
  0xc3   :  { %1267 = vmatmul.mubr.bf16.gmra.mxu0 %v6959_v13  ;;  %v6974_v13 = vld [vmem:[%s10895_s2 + $0x1d0] ss:$8 sps:$4 sm:$0xff]  }
  0xc4   :  { %v8302_v27 = vpop.permute.xlu1 %1880  ;;  %v8304_v28 = vpop.permute.xlu0 %1875  ;;  %6417 = vmatprep.mubr.msk.bf16.mxu0 %vm1113_vm5, %v6963_v14  ;;  %v6978_v14 = vld [vmem:[%s10895_s2 + $0x1e4] ss:$8 sps:$4 sm:$0xff]  }
  0xc5   :  { %10933 = vst [vmem:[#allocation19_spill] sm:$0xff] %v8302_v27  ;;  %10934 = vst [vmem:[#allocation20_spill] sm:$0xff] %v8304_v28  ;;  %2402 = vperm.xlu1 %6849, %v2204_v19   ;;  %2397 = vperm.xlu0 %6848, %v2203_v20  }
  0xc6   :  { %1459 = vmatmul.mubr.bf16.gmra.mxu1 %v6962_v21  ;;  %v2217_v21 = vld [vmem:[%s10899_s6 + $0x170] sm:$0xff] }
  0xc7   :  { %6441 = vmatprep.mubr.msk.bf16.mxu1 %vm1113_vm5, %v6966_v22  ;;  %v2213_v22 = vld [vmem:[%s10899_s6 + $0x150] sm:$0xff] }
  0xc8   :  { %v8320_v39 = vpop.permute.xlu1 %1710  ;;  %v8322_v40 = vpop.permute.xlu0 %1705 }
  0xc9   :  { %2412 = vperm.xlu1 %6849, %v2206_v29   ;;  %2407 = vperm.xlu0 %6848, %v2205_v30   ;;  %v6977_v29 = vld [vmem:[%s10895_s2 + $0x60] ss:$8 sps:$4 sm:$0xff]   ;;  %v6981_v30 = vld [vmem:[%s10895_s2 + $0x74] ss:$8 sps:$4 sm:$0xff]  }
  0xcb   :  { %1275 = vmatmul.mubr.bf16.gmra.mxu0 %v6965_v35 }
  0xcc   :  { %v8336_v53 = vpop.permute.xlu1 %1870  ;;  %v8338_v54 = vpop.permute.xlu0 %1865  ;;  %6418 = vmatprep.mubr.msk.bf16.mxu0 %vm1113_vm5, %v6969_v36 }
  0xcd   :  { %10935 = vst [vmem:[#allocation21_spill] sm:$0xff] %v8336_v53  ;;  %10936 = vst [vmem:[#allocation22_spill] sm:$0xff] %v8338_v54  ;;  %2422 = vperm.xlu1 %6849, %v2208_v45   ;;  %2417 = vperm.xlu0 %6848, %v2207_v46   ;;  %v2215_v45 = vld [vmem:[%s10899_s6 + $0x160] sm:$0xff]  ;;  %v2218_v46 = vld [vmem:[%s10899_s6 + $0x178] sm:$0xff] }
  0xce   :  { %1467 = vmatmul.mubr.bf16.gmra.mxu1 %v6968_v47  ;;  %v6980_v47 = vld [vmem:[%s10895_s2 + $0x1e0] ss:$8 sps:$4 sm:$0xff]  }
  0xcf   :  { %6442 = vmatprep.mubr.msk.bf16.mxu1 %vm1113_vm5, %v6972_v48  ;;  %v6984_v48 = vld [vmem:[%s10895_s2 + $0x1f4] ss:$8 sps:$4 sm:$0xff]  }
  0xd0   :  { %v8354_v1 = vpop.permute.xlu1 %1700  ;;  %v8356_v2 = vpop.permute.xlu0 %1695 }
  0xd1   :  { %2432 = vperm.xlu1 %6849, %v2210_v57   ;;  %2427 = vperm.xlu0 %6848, %v2209_v58  }
  0xd3   :  { %1283 = vmatmul.mubr.bf16.gmra.mxu0 %v6971_v63  ;;  %v2214_v63 = vld [vmem:[%s10899_s6 + $0x158] sm:$0xff] }
  0xd4   :  { %v8370_v19 = vpop.permute.xlu1 %1860  ;;  %v8372_v20 = vpop.permute.xlu0 %1855  ;;  %6419 = vmatprep.mubr.msk.bf16.mxu0 %vm1113_vm5, %v6975_v0  ;;  %v2216_v0 = vld [vmem:[%s10899_s6 + $0x168] sm:$0xff] }
  0xd5   :  { %10937 = vst [vmem:[#allocation23_spill] sm:$0xff] %v8370_v19  ;;  %10938 = vst [vmem:[#allocation24_spill] sm:$0xff] %v8372_v20  ;;  %2442 = vperm.xlu1 %6849, %v2212_v9   ;;  %2437 = vperm.xlu0 %6848, %v2211_v11   ;;  %v6983_v9 = vld [vmem:[%s10895_s2 + $0x70] ss:$8 sps:$4 sm:$0xff]   ;;  %v6987_v11 = vld [vmem:[%s10895_s2 + $0x84] ss:$8 sps:$4 sm:$0xff]  }
  0xd6   :  { %1475 = vmatmul.mubr.bf16.gmra.mxu1 %v6974_v13 }
  0xd7   :  { %6443 = vmatprep.mubr.msk.bf16.mxu1 %vm1113_vm5, %v6978_v14 }
  0xd8   :  { %v8388_v35 = vpop.permute.xlu1 %1690  ;;  %v8390_v36 = vpop.permute.xlu0 %1685 }
  0xd9   :  { %2467 = vperm.xlu1 %6849, %v2217_v21   ;;  %2447 = vperm.xlu0 %6848, %v2213_v22   ;;  %v2220_v21 = vld [vmem:[%s10899_s6 + $0x188] sm:$0xff]  ;;  %v2219_v22 = vld [vmem:[%s10899_s6 + $0x180] sm:$0xff] }
  0xdb   :  { %1291 = vmatmul.mubr.bf16.gmra.mxu0 %v6977_v29  ;;  %v6986_v29 = vld [vmem:[%s10895_s2 + $0x1f0] ss:$8 sps:$4 sm:$0xff]  }
  0xdc   :  { %v8404_v57 = vpop.permute.xlu1 %1850  ;;  %v8406_v58 = vpop.permute.xlu0 %1845  ;;  %6420 = vmatprep.mubr.msk.bf16.mxu0 %vm1113_vm5, %v6981_v30 }
  0xdd   :  { %10939 = vst [vmem:[#allocation25_spill] sm:$0xff] %v8404_v57  ;;  %10940 = vst [vmem:[#allocation26_spill] sm:$0xff] %v8406_v58  ;;  %2457 = vperm.xlu1 %6849, %v2215_v45   ;;  %2472 = vperm.xlu0 %6848, %v2218_v46   ;;  %v2233_v46 = vld [vmem:[%s10899_s6 + $0x1f0] sm:$0xff] }
  0xde   :  { %1483 = vmatmul.mubr.bf16.gmra.mxu1 %v6980_v47  ;;  %v2221_v47 = vld [vmem:[%s10899_s6 + $0x190] sm:$0xff] }
  0xdf   :  { %6444 = vmatprep.mubr.msk.bf16.mxu1 %vm1113_vm5, %v6984_v48  ;;  %v6989_v48 = vld [vmem:[%s10895_s2 + $0x80] ss:$8 sps:$4 sm:$0xff]  }
  0xe0   :  { %v8422_v13 = vpop.permute.xlu1 %1680  ;;  %v8424_v14 = vpop.permute.xlu0 %1675 }
  0xe1   :  { %2452 = vperm.xlu1 %6849, %v2214_v63   ;;  %2462 = vperm.xlu0 %6848, %v2216_v0  }
  0xe3   :  { %1299 = vmatmul.mubr.bf16.gmra.mxu0 %v6983_v9  ;;  %v2231_v9 = vld [vmem:[%s10899_s6 + $0x1e0] sm:$0xff] }
  0xe4   :  { %v8435_v30 = vpop.permute.xlu1 %1840  ;;  %v8437_v45 = vpop.permute.xlu0 %1835  ;;  %6421 = vmatprep.mubr.msk.bf16.mxu0 %vm1113_vm5, %v6987_v11  ;;  %v2234_v11 = vld [vmem:[%s10899_s6 + $0x1f8] sm:$0xff] }
  0xe5   :  { %2482 = vperm.xlu1 %6849, %v2220_v21   ;;  %2477 = vperm.xlu0 %6848, %v2219_v22  }
  0xe6   :  { %1491 = vmatmul.mubr.bf16.gmra.mxu1 %v6986_v29 }
  0xe8   :  { %v8449_v63 = vpop.permute.xlu1 %1670  ;;  %v8451_v0 = vpop.permute.xlu0 %1665 }
  0xe9   :  { %2547 = vperm.xlu1 %6849, %v2233_v46   ;;  %2487 = vperm.xlu0 %6848, %v2221_v47   ;;  %v2229_v46 = vld [vmem:[%s10899_s6 + $0x1d0] sm:$0xff]  ;;  %v2232_v47 = vld [vmem:[%s10899_s6 + $0x1e8] sm:$0xff] }
  0xeb   :  { %v8459_v21 = vpop.f32.mrf.mxu0  ;;  %1307 = vmatmul.mubr.bf16.gmra.mxu0 %v6989_v48 }
  0xec   :  { %v8461_v22 = vpop.permute.xlu1 %1830  ;;  %v8463_v29 = vpop.permute.xlu0 %1825 }
  0xed   :  { %10941 = vst [vmem:[#allocation27_spill] sm:$0xff] %v8461_v22  ;;  %10942 = vst [vmem:[#allocation28_spill] sm:$0xff] %v8463_v29  ;;  %2537 = vperm.xlu1 %6849, %v2231_v9   ;;  %2552 = vperm.xlu0 %6848, %v2234_v11   ;;  %v8465_v4 = vpop.f32.mrf.mxu0 }
  0xee   :  { %18 = vsyncpa [#allocation4], 0  ;;  %v2227_v11 = vld [vmem:[%s10899_s6 + $0x1c0] sm:$0xff]  ;;  %v2230_v29 = vld [vmem:[%s10899_s6 + $0x1d8] sm:$0xff]  ;;  %vm6111_vm9 = vcmask 64512   ;;  %vm6256_vm10 = vcmask 57344  }
  0xef   :  { %v8473_v6 = vpop.f32.mrf.mxu0  ;;  %v2225_v58 = vld [vmem:[%s10899_s6 + $0x1b0] sm:$0xff]  ;;  %v2228_v12 = vld [vmem:[%s10899_s6 + $0x1c8] sm:$0xff]  ;;  %v2226_v50 = vld [vmem:[%s10899_s6 + $0x1b8] sm:$0xff] }
  0xf0   :  { %v8475_v48 = vpop.permute.xlu1 %1660  ;;  %v8477_v22 = vpop.permute.xlu0 %1655  ;;  %v3997_v38 = vld [vmem:[%s10901_s8] sm:$0xff]  ;;  %v3999_v28 = vld [vmem:[%s10901_s8 + $0x10] sm:$0xff]  ;;  %v4006_v19 = vld [vmem:[%s10901_s8 + $0x48] sm:$0xff] }
  0xf1   :  { %2527 = vperm.xlu1 %6849, %v2229_v46   ;;  %2542 = vperm.xlu0 %6848, %v2232_v47   ;;  %v8479_v9 = vpop.f32.mrf.mxu0  ;;  %v4008_v20 = vld [vmem:[%s10901_s8 + $0x58] sm:$0xff] }
  0xf3   :  { %v8487_v26 = vpop.f32.mrf.mxu0 }
  0xf4   :  { %10943 = vst [vmem:[#allocation29_spill] sm:$0xff] %v8487_v26  ;;  %v8489_v23 = vpop.permute.xlu1 %1820  ;;  %v8491_v10 = vpop.permute.xlu0 %1815 }
  0xf5   :  { %2517 = vperm.xlu1 %6849, %v2227_v11   ;;  %2532 = vperm.xlu0 %6848, %v2230_v29   ;;  %v8493_v46 = vpop.f32.mrf.mxu0 }
  0xf6   :  { %10944 = vst [vmem:[#allocation30_spill] sm:$0xff] %v8493_v46  ;;  %v1316_v47 = vpop.f32.mrf.mxu1  ;;  %v2223_v46 = vld [vmem:[%s10899_s6 + $0x1a0] sm:$0xff] }
  0xf7   :  { %v8501_v57 = vpop.f32.mrf.mxu0 }
  0xf8   :  { %10945 = vst [vmem:[#allocation31_spill] sm:$0xff] %v8501_v57  ;;  %v1318_v62 = vpop.f32.mrf.mxu1  ;;  %v8503_v26 = vpop.permute.xlu1 %1650 }
  0xf9   :  { %10946 = vst [vmem:[#allocation32_spill] sm:$0xff] %v8503_v26  ;;  %v8505_v61 = vpop.permute.xlu0 %1645  ;;  %2507 = vperm.xlu1 %6849, %v2225_v58   ;;  %2522 = vperm.xlu0 %6848, %v2228_v12   ;;  %v8507_v29 = vpop.f32.mrf.mxu0 }
  0xfa   :  { %10947 = vst [vmem:[#allocation33_spill] sm:$0xff] %v8505_v61  ;;  %10948 = vst [vmem:[#allocation34_spill] sm:$0xff] %v8507_v29  ;;  %v1319_v11 = vpop.f32.mrf.mxu1  ;;  %v2222_v61 = vld [vmem:[%s10899_s6 + $0x198] sm:$0xff]  ;;  %v2224_v29 = vld [vmem:[%s10899_s6 + $0x1a8] sm:$0xff] }
  0xfb   :  { %v8515_v54 = vpop.f32.mrf.mxu0 }
  0xfc   :  { %10949 = vst [vmem:[#allocation35_spill] sm:$0xff] %v8515_v54  ;;  %v1321_v62 = vpop.f32.mrf.mxu1  ;;  %v8517_v57 = vpop.permute.xlu1 %1810 }
  0xfd   :  { %v8519_v26 = vpop.permute.xlu0 %1805  ;;  %2497 = vperm.xlu1 %6849, %v2223_v46   ;;  %2512 = vperm.xlu0 %6848, %v2226_v50   ;;  %v8521_v12 = vpop.f32.mrf.mxu0 }
  0xfe   :  { %10950 = vst [vmem:[#allocation36_spill] sm:$0xff] %v8521_v12  ;;  %v8523_v58 = vpop.f32.mrf.mxu1  ;;  %v3998_v12 = vld [vmem:[%s10901_s8 + $0x8] sm:$0xff] }
  0xff   :  { %v8531_v49 = vpop.f32.mrf.mxu0 }
 0x100   :  { %10951 = vst [vmem:[#allocation37_spill] sm:$0xff] %v8531_v49  ;;  %v1326_v62 = vpop.f32.mrf.mxu1  ;;  %v8533_v27 = vpop.permute.xlu1 %2242  ;;  %v4001_v49 = vld [vmem:[%s10901_s8 + $0x20] sm:$0xff] }
 0x101   :  { %10952 = vst [vmem:[#allocation38_spill] sm:$0xff] %v8533_v27  ;;  %v8535_v53 = vpop.permute.xlu0 %2237  ;;  %2492 = vperm.xlu1 %6849, %v2222_v61   ;;  %2502 = vperm.xlu0 %6848, %v2224_v29   ;;  %v8537_v50 = vpop.f32.mrf.mxu0 }
 0x102   :  { %10953 = vst [vmem:[#allocation39_spill] sm:$0xff] %v8535_v53  ;;  %10954 = vst [vmem:[#allocation40_spill] sm:$0xff] %v8537_v50  ;;  %v8539_v46 = vpop.f32.mrf.mxu1  ;;  %v4000_v50 = vld [vmem:[%s10901_s8 + $0x18] sm:$0xff] }
 0x103   :  { %v8547_v54 = vpop.f32.mrf.mxu0 }
 0x104   :  { %10955 = vst [vmem:[#allocation41_spill] sm:$0xff] %v8547_v54  ;;  %v1329_v62 = vpop.f32.mrf.mxu1  ;;  %v8549_v27 = vpop.permute.xlu1 %2252 }
 0x105   :  { %10956 = vst [vmem:[#allocation42_spill] sm:$0xff] %v8549_v27  ;;  %v8551_v53 = vpop.permute.xlu0 %2247  ;;  %4068 = vperm.xlu1 %6849, %v3998_v12   ;;  %4063 = vperm.xlu0 %6848, %v3997_v38   ;;  %v8553_v61 = vpop.f32.mrf.mxu0 }
 0x106   :  { %10957 = vst [vmem:[#allocation43_spill] sm:$0xff] %v8551_v53  ;;  %10958 = vst [vmem:[#allocation44_spill] sm:$0xff] %v8553_v61  ;;  %v1332_v29 = vpop.f32.mrf.mxu1  ;;  %v4002_v53 = vld [vmem:[%s10901_s8 + $0x28] sm:$0xff] }
 0x107   :  { %v8561_v32 = vpop.f32.mrf.mxu0 }
 0x108   :  { %10959 = vst [vmem:[#allocation45_spill] sm:$0xff] %v8561_v32  ;;  %v1334_v62 = vpop.f32.mrf.mxu1  ;;  %v8563_v37 = vpop.permute.xlu1 %2262 }
 0x109   :  { %10960 = vst [vmem:[#allocation46_spill] sm:$0xff] %v8563_v37  ;;  %v8565_v27 = vpop.permute.xlu0 %2257  ;;  %4078 = vperm.xlu1 %6849, %v4000_v50   ;;  %4073 = vperm.xlu0 %6848, %v3999_v28   ;;  %v8567_v38 = vpop.f32.mrf.mxu0 }
 0x10a   :  { %10961 = vst [vmem:[#allocation47_spill] sm:$0xff] %v8565_v27  ;;  %10962 = vst [vmem:[#allocation48_spill] sm:$0xff] %v8567_v38  ;;  %v1335_v12 = vpop.f32.mrf.mxu1  ;;  %v4004_v27 = vld [vmem:[%s10901_s8 + $0x38] sm:$0xff]  ;;  %v4003_v38 = vld [vmem:[%s10901_s8 + $0x30] sm:$0xff] }
 0x10b   :  { %v6775_v25 = vpop.f32.mrf.mxu0 }
 0x10c   :  { %v1317_v32 = vadd.f32 %v6775_v25, %v1316_v47  ;;  %v1337_v62 = vpop.f32.mrf.mxu1  ;;  %v8575_v61 = vpop.permute.xlu1 %2272 }
 0x10d   :  { %10963 = vst [vmem:[#allocation49_spill] sm:$0xff] %v8575_v61  ;;  %v8577_v37 = vpop.permute.xlu0 %2267  ;;  %4088 = vperm.xlu1 %6849, %v4002_v53   ;;  %4083 = vperm.xlu0 %6848, %v4001_v49   ;;  %v8579_v28 = vpop.f32.mrf.mxu0 }
 0x10e   :  { %10964 = vst [vmem:[#allocation50_spill] sm:$0xff] %v8577_v37  ;;  %10965 = vst [vmem:[#allocation51_spill] sm:$0xff] %v8579_v28  ;;  %v1340_v50 = vpop.f32.mrf.mxu1  ;;  %v1901_v25 = vadd.f32 %v8477_v22, %v1317_v32  ;;  %v4005_v32 = vld [vmem:[%s10901_s8 + $0x40] sm:$0xff] }
 0x10f   :  { %v6776_v54 = vpop.f32.mrf.mxu0 }
 0x110   :  { %v1320_v47 = vadd.f32 %v6776_v54, %v1319_v11  ;;  %v1342_v62 = vpop.f32.mrf.mxu1  ;;  %v8588_v61 = vpop.permute.xlu1 %2282  ;;  %v1965_v22 = vmax.f32 %v1901_v25, 0.0 }
 0x111   :  { %10966 = vst [vmem:[#allocation52_spill] sm:$0xff] %v8588_v61  ;;  %v8590_v53 = vpop.permute.xlu0 %2277  ;;  %4098 = vperm.xlu1 %6849, %v4004_v27   ;;  %4093 = vperm.xlu0 %6848, %v4003_v38   ;;  %v8592_v49 = vpop.f32.mrf.mxu0 }
 0x112   :  { %10967 = vst [vmem:[#allocation53_spill] sm:$0xff] %v8590_v53  ;;  %10968 = vst [vmem:[#allocation54_spill] sm:$0xff] %v8592_v49  ;;  %v1902_v37 = vadd.f32 %v8475_v48, %v1320_v47  ;;  %v8595_v28 = vpop.f32.mrf.mxu1 }
 0x113   :  { %v6779_v54 = vpop.f32.mrf.mxu0 }
 0x114   :  { %v1966_v11 = vmax.f32 %v1902_v37, 0.0  ;;  %v1333_v62 = vadd.f32 %v6779_v54, %v1332_v29  ;;  %v1345_v27 = vpop.f32.mrf.mxu1  ;;  %v8603_v38 = vpop.permute.xlu1 %2292  ;;  %v4007_v37 = vld [vmem:[%s10901_s8 + $0x50] sm:$0xff] }
 0x115   :  { %10969 = vst [vmem:[#allocation55_spill] sm:$0xff] %v8603_v38  ;;  %v8605_v61 = vpop.permute.xlu0 %2287  ;;  %4108 = vperm.xlu1 %6849, %v4006_v19   ;;  %4103 = vperm.xlu0 %6848, %v4005_v32   ;;  %v578_v48 = vpop.f32.mrf.mxu0 }
 0x116   :  { %10970 = vst [vmem:[#allocation56_spill] sm:$0xff] %v8605_v61  ;;  %v8607_v47 = vpack.c.bf16 %v1966_v11, %v1965_v22  ;;  %v1325_v53 = vadd.f32 %v8523_v58, %v578_v48  ;;  %v1348_v49 = vpop.f32.mrf.mxu1  ;;  %v1905_v25 = vadd.f32 %v8424_v14, %v1333_v62  ;;  %v4010_v14 = vld [vmem:[%s10901_s8 + $0x68] sm:$0xff] }
 0x117   :  { %v6780_v29 = vpop.f32.mrf.mxu0 }
 0x118   :  { %10971 = vst [vmem:[#allocation57_spill] sm:$0xff] %v8607_v47  ;;  %v1336_v54 = vadd.f32 %v6780_v29, %v1335_v12  ;;  %v1350_v19 = vpop.f32.mrf.mxu1  ;;  %v8617_v32 = vpop.permute.xlu1 %2302  ;;  %v1903_v11 = vadd.f32 %v8451_v0, %v1325_v53  ;;  %v4009_v12 = vld [vmem:[%s10901_s8 + $0x60] sm:$0xff]  ;;  %v1969_v29 = vmax.f32 %v1905_v25, 0.0  ;;  %v4012_v25 = vld [vmem:[%s10901_s8 + $0x78] sm:$0xff] }
 0x119   :  { %10972 = vst [vmem:[#allocation58_spill] sm:$0xff] %v8617_v32  ;;  %v8619_v22 = vpop.permute.xlu0 %2297  ;;  %4118 = vperm.xlu1 %6849, %v4008_v20   ;;  %4113 = vperm.xlu0 %6848, %v4007_v37   ;;  %v581_v58 = vpop.f32.mrf.mxu0 }
 0x11a   :  { %10973 = vst [vmem:[#allocation59_spill] sm:$0xff] %v8619_v22  ;;  %v1906_v27 = vadd.f32 %v8422_v13, %v1336_v54  ;;  %v1328_v48 = vadd.f32 %v8539_v46, %v581_v58  ;;  %v1351_v61 = vpop.f32.mrf.mxu1  ;;  %v1967_v54 = vmax.f32 %v1903_v11, 0.0 }
 0x11b   :  { %v6783_v62 = vpop.f32.mrf.mxu0 }
 0x11c   :  { %v1970_v20 = vmax.f32 %v1906_v27, 0.0  ;;  %v1904_v37 = vadd.f32 %v8449_v63, %v1328_v48  ;;  %v1349_v19 = vadd.f32 %v6783_v62, %v1348_v49  ;;  %v1353_v0 = vpop.f32.mrf.mxu1  ;;  %v8631_v53 = vpop.permute.xlu1 %2312  ;;  %v4011_v63 = vld [vmem:[%s10901_s8 + $0x70] sm:$0xff] }
 0x11d   :  { %10974 = vst [vmem:[#allocation60_spill] sm:$0xff] %v8631_v53  ;;  %v8633_v13 = vpop.permute.xlu0 %2307  ;;  %4128 = vperm.xlu1 %6849, %v4010_v14   ;;  %4123 = vperm.xlu0 %6848, %v4009_v12   ;;  %v594_v46 = vpop.f32.mrf.mxu0  ;;  %v4042_v53 = vld [vmem:[%s10901_s8 + $0x168] sm:$0xff] }
 0x11e   :  { %10975 = vst [vmem:[#allocation61_spill] sm:$0xff] %v8633_v13  ;;  %v8635_v58 = vpack.c.bf16 %v1970_v20, %v1969_v29  ;;  %v1968_v38 = vmax.f32 %v1904_v37, 0.0  ;;  %v1341_v22 = vadd.f32 %v1340_v50, %v594_v46  ;;  %v1356_v32 = vpop.f32.mrf.mxu1  ;;  %v1909_v48 = vadd.f32 %v8356_v2, %v1349_v19  ;;  %v4014_v2 = vld [vmem:[%s10901_s8 + $0x88] sm:$0xff]  ;;  %v4041_v13 = vld [vmem:[%s10901_s8 + $0x160] sm:$0xff] }
 0x11f   :  { %v6784_v49 = vpop.f32.mrf.mxu0 }
 0x120   :  { %10976 = vst [vmem:[#allocation62_spill] sm:$0xff] %v8635_v58  ;;  %v8643_v27 = vpack.c.bf16 %v1968_v38, %v1967_v54  ;;  %v1352_v14 = vadd.f32 %v6784_v49, %v1351_v61  ;;  %v1358_v11 = vpop.f32.mrf.mxu1  ;;  %v8646_v12 = vpop.permute.xlu1 %2322  ;;  %v1907_v29 = vadd.f32 %v8390_v36, %v1341_v22  ;;  %v4013_v61 = vld [vmem:[%s10901_s8 + $0x80] sm:$0xff]  ;;  %v1973_v19 = vmax.f32 %v1909_v48, 0.0  ;;  %v4016_v48 = vld [vmem:[%s10901_s8 + $0x98] sm:$0xff] }
 0x121   :  { %10978 = vst [vmem:[#allocation64_spill] sm:$0xff] %v8646_v12  ;;  %v8648_v62 = vpop.permute.xlu0 %2317  ;;  %4138 = vperm.xlu1 %6849, %v4012_v25   ;;  %4133 = vperm.xlu0 %6848, %v4011_v63   ;;  %v597_v50 = vpop.f32.mrf.mxu0 }
 0x122   :  { %10977 = vst [vmem:[#allocation63_spill] sm:$0xff] %v8643_v27  ;;  %10979 = vst [vmem:[#allocation65_spill] sm:$0xff] %v8648_v62  ;;  %v1910_v20 = vadd.f32 %v8354_v1, %v1352_v14  ;;  %v1344_v37 = vadd.f32 %v8595_v28, %v597_v50  ;;  %v1359_v0 = vpop.f32.mrf.mxu1  ;;  %v1971_v22 = vmax.f32 %v1907_v29, 0.0 }
 0x123   :  { %v6787_v38 = vpop.f32.mrf.mxu0 }
 0x124   :  { %v1974_v46 = vmax.f32 %v1910_v20, 0.0  ;;  %v1908_v54 = vadd.f32 %v8388_v35, %v1344_v37  ;;  %v1361_v25 = vpop.f32.mrf.mxu1  ;;  %v8660_v36 = vpop.permute.xlu1 %2332  ;;  %v4015_v35 = vld [vmem:[%s10901_s8 + $0x90] sm:$0xff] }
 0x125   :  { %10980 = vst [vmem:[#allocation66_spill] sm:$0xff] %v8660_v36  ;;  %v8662_v1 = vpop.permute.xlu0 %2327  ;;  %4148 = vperm.xlu1 %6849, %v4014_v2   ;;  %4143 = vperm.xlu0 %6848, %v4013_v61   ;;  %v610_v28 = vpop.f32.mrf.mxu0  ;;  %v4018_v25 = vld [vmem:[%s10901_s8 + $0xa8] sm:$0xff] }
 0x126   :  { %10981 = vst [vmem:[#allocation67_spill] sm:$0xff] %v8662_v1  ;;  %v8664_v63 = vpack.c.bf16 %v1974_v46, %v1973_v19  ;;  %v1972_v49 = vmax.f32 %v1908_v54, 0.0  ;;  %v1357_v14 = vadd.f32 %v1356_v32, %v610_v28  ;;  %v1364_v11 = vpop.f32.mrf.mxu1 }
 0x127   :  { %v1365_v50 = vadd.f32 %v6787_v38, %v1364_v11  ;;  %v6788_v20 = vpop.f32.mrf.mxu0  ;;  %v4017_v38 = vld [vmem:[%s10901_s8 + $0xa0] sm:$0xff] }
 0x128   :  { %10982 = vst [vmem:[#allocation68_spill] sm:$0xff] %v8664_v63  ;;  %v8672_v37 = vpack.c.bf16 %v1972_v49, %v1971_v22  ;;  %v1366_v2 = vpop.f32.mrf.mxu1  ;;  %v8674_v61 = vpop.permute.xlu1 %2342  ;;  %v1911_v19 = vadd.f32 %v8322_v40, %v1357_v14  ;;  %v4045_v63 = vld [vmem:[%s10901_s8 + $0x180] sm:$0xff] }
 0x129   :  { %10984 = vst [vmem:[#allocation70_spill] sm:$0xff] %v8674_v61  ;;  %v8676_v29 = vpop.permute.xlu0 %2337  ;;  %4158 = vperm.xlu1 %6849, %v4016_v48   ;;  %4153 = vperm.xlu0 %6848, %v4015_v35   ;;  %v613_v32 = vpop.f32.mrf.mxu0  ;;  %v1913_v28 = vadd.f32 %v8288_v16, %v1365_v50  ;;  %v4020_v61 = vld [vmem:[%s10901_s8 + $0xb8] sm:$0xff]  ;;  %v4019_v16 = vld [vmem:[%s10901_s8 + $0xb0] sm:$0xff] }
 0x12a   :  { %10983 = vst [vmem:[#allocation69_spill] sm:$0xff] %v8672_v37  ;;  %10985 = vst [vmem:[#allocation71_spill] sm:$0xff] %v8676_v29  ;;  %v1360_v46 = vadd.f32 %v1359_v0, %v613_v32  ;;  %v1367_v54 = vpop.f32.mrf.mxu1  ;;  %v1975_v14 = vmax.f32 %v1911_v19, 0.0 }
 0x12b   :  { %v1368_v22 = vadd.f32 %v6788_v20, %v1367_v54  ;;  %v6791_v49 = vpop.f32.mrf.mxu0 }
 0x12c   :  { %v1912_v11 = vadd.f32 %v8320_v39, %v1360_v46  ;;  %v1369_v48 = vpop.f32.mrf.mxu1  ;;  %v1977_v39 = vmax.f32 %v1913_v28, 0.0  ;;  %v8696_v20 = vpop.permute.xlu1 %2352  ;;  %v4021_v28 = vld [vmem:[%s10901_s8 + $0xc0] sm:$0xff] }
 0x12d   :  { %v1914_v35 = vadd.f32 %v8286_v15, %v1368_v22  ;;  %v8688_v40 = vpop.permute.xlu0 %2347  ;;  %4168 = vperm.xlu1 %6849, %v4018_v25   ;;  %4163 = vperm.xlu0 %6848, %v4017_v38   ;;  %v626_v0 = vpop.f32.mrf.mxu0  ;;  %10987 = vst [vmem:[#allocation73_spill] sm:$0xff] %v8696_v20 }
 0x12e   :  { %10986 = vst [vmem:[#allocation72_spill] sm:$0xff] %v8688_v40  ;;  %v1976_v2 = vmax.f32 %v1912_v11, 0.0  ;;  %v1372_v32 = vpop.f32.mrf.mxu1  ;;  %v4022_v11 = vld [vmem:[%s10901_s8 + $0xc8] sm:$0xff]  ;;  %v4033_v40 = vld [vmem:[%s10901_s8 + $0x120] sm:$0xff] }
 0x12f   :  { %v1978_v50 = vmax.f32 %v1914_v35, 0.0  ;;  %v1373_v15 = vadd.f32 %v1372_v32, %v626_v0  ;;  %v6792_v46 = vpop.f32.mrf.mxu0 }
 0x130   :  { %v8698_v54 = vpack.c.bf16 %v1976_v2, %v1975_v14  ;;  %v1374_v25 = vpop.f32.mrf.mxu1  ;;  %v8711_v32 = vpop.permute.xlu1 %2362 }
 0x131   :  { %v8700_v19 = vpack.c.bf16 %v1978_v50, %v1977_v39  ;;  %4178 = vperm.xlu1 %6849, %v4020_v61   ;;  %4173 = vperm.xlu0 %6848, %v4019_v16   ;;  %v629_v38 = vpop.f32.mrf.mxu0  ;;  %v1915_v48 = vadd.f32 %v8270_v8, %v1373_v15  ;;  %v8709_v35 = vpop.permute.xlu0 %2357  ;;  %10991 = vst [vmem:[#allocation77_spill] sm:$0xff] %v8711_v32  ;;  %v4024_v50 = vld [vmem:[%s10901_s8 + $0xd8] sm:$0xff]  ;;  %v4023_v8 = vld [vmem:[%s10901_s8 + $0xd0] sm:$0xff] }
 0x132   :  { %10988 = vst [vmem:[#allocation74_spill] sm:$0xff] %v8698_v54  ;;  %v1375_v22 = vpop.f32.mrf.mxu1  ;;  %10990 = vst [vmem:[#allocation76_spill] sm:$0xff] %v8709_v35 }
 0x133   :  { %10989 = vst [vmem:[#allocation75_spill] sm:$0xff] %v8700_v19  ;;  %v1376_v0 = vadd.f32 %v1375_v22, %v629_v38  ;;  %v6795_v14 = vpop.f32.mrf.mxu0  ;;  %v1979_v15 = vmax.f32 %v1915_v48, 0.0  ;;  %v4025_v48 = vld [vmem:[%s10901_s8 + $0xe0] sm:$0xff] }
 0x134   :  { %v1377_v2 = vpop.f32.mrf.mxu1 }
 0x135   :  { %v1916_v61 = vadd.f32 %v8268_v5, %v1376_v0  ;;  %4188 = vperm.xlu1 %6849, %v4022_v11   ;;  %4183 = vperm.xlu0 %6848, %v4021_v28   ;;  %v642_v16 = vpop.f32.mrf.mxu0  ;;  %v8722_v5 = vpop.permute.xlu0 %2367  ;;  %v4026_v0 = vld [vmem:[%s10901_s8 + $0xe8] sm:$0xff] }
 0x136   :  { %v1380_v39 = vpop.f32.mrf.mxu1  ;;  %10992 = vst [vmem:[#allocation78_spill] sm:$0xff] %v8722_v5  ;;  %v4028_v5 = vld [vmem:[%s10901_s8 + $0xf8] sm:$0xff] }
 0x137   :  { %v1980_v25 = vmax.f32 %v1916_v61, 0.0  ;;  %v1381_v38 = vadd.f32 %v6791_v49, %v1380_v39  ;;  %v6796_v22 = vpop.f32.mrf.mxu0  ;;  %v8732_v49 = vpop.permute.xlu1 %2372 }
 0x138   :  { %v1382_v2 = vpop.f32.mrf.mxu1  ;;  %10993 = vst [vmem:[#allocation79_spill] sm:$0xff] %v8732_v49  ;;  %v4027_v49 = vld [vmem:[%s10901_s8 + $0xf0] sm:$0xff] }
 0x139   :  { %v8720_v32 = vpack.c.bf16 %v1980_v25, %v1979_v15  ;;  %4198 = vperm.xlu1 %6849, %v4024_v50   ;;  %4193 = vperm.xlu0 %6848, %v4023_v8   ;;  %v8724_v11 = vpop.f32.mrf.mxu0  ;;  %v1917_v61 = vadd.f32 %v8236_v52, %v1381_v38 }
 0x13a   :  { %v1383_v28 = vpop.f32.mrf.mxu1 }
 0x13b   :  { %v1384_v39 = vadd.f32 %v6792_v46, %v1383_v28  ;;  %v8735_v15 = vpop.f32.mrf.mxu0  ;;  %v1981_v52 = vmax.f32 %v1917_v61, 0.0  ;;  %v8746_v46 = vpop.permute.xlu0 %2377  ;;  %v4030_v61 = vld [vmem:[%s10901_s8 + $0x108] sm:$0xff] }
 0x13c   :  { %v1385_v50 = vpop.f32.mrf.mxu1  ;;  %10994 = vst [vmem:[#allocation80_spill] sm:$0xff] %v8746_v46 }
 0x13d   :  { %v1918_v8 = vadd.f32 %v8234_v51, %v1384_v39  ;;  %4208 = vperm.xlu1 %6849, %v4026_v0   ;;  %4203 = vperm.xlu0 %6848, %v4025_v48   ;;  %v8738_v25 = vpop.f32.mrf.mxu0  ;;  %v8752_v48 = vpop.permute.xlu1 %2382 }
 0x13e   :  { %v1388_v2 = vpop.f32.mrf.mxu1  ;;  %10995 = vst [vmem:[#allocation81_spill] sm:$0xff] %v8752_v48 }
 0x13f   :  { %v1982_v38 = vmax.f32 %v1918_v8, 0.0  ;;  %v8748_v28 = vadd.f32 %v1388_v2, %v642_v16  ;;  %v8750_v51 = vpop.f32.mrf.mxu0  ;;  %v4029_v16 = vld [vmem:[%s10901_s8 + $0x100] sm:$0xff] }
 0x140   :  { %v1390_v0 = vpop.f32.mrf.mxu1 }
 0x141   :  { %v8754_v39 = vpack.c.bf16 %v1982_v38, %v1981_v52  ;;  %4218 = vperm.xlu1 %6849, %v4028_v5   ;;  %4213 = vperm.xlu0 %6848, %v4027_v49   ;;  %v8756_v50 = vpop.f32.mrf.mxu0  ;;  %v8768_v0 = vpop.permute.xlu0 %2387  ;;  %v4032_v52 = vld [vmem:[%s10901_s8 + $0x118] sm:$0xff]  ;;  %v4031_v38 = vld [vmem:[%s10901_s8 + $0x110] sm:$0xff] }
 0x142   :  { %v8758_v35 = vpop.f32.mrf.mxu1  ;;  %10996 = vst [vmem:[#allocation82_spill] sm:$0xff] %v8768_v0  ;;  %v8778_v46 = vpop.permute.xlu1 %2392  ;;  %v4034_v0 = vld [vmem:[%s10901_s8 + $0x128] sm:$0xff] }
 0x143   :  { %v8766_v8 = vpop.f32.mrf.mxu0  ;;  %10997 = vst [vmem:[#allocation83_spill] sm:$0xff] %v8778_v46 }
 0x144   :  { %v1393_v2 = vpop.f32.mrf.mxu1 }
 0x145   :  { %4228 = vperm.xlu1 %6849, %v4030_v61   ;;  %4223 = vperm.xlu0 %6848, %v4029_v16   ;;  %v8770_v5 = vpop.f32.mrf.mxu0  ;;  %v8790_v29 = vpop.permute.xlu0 %2397 }
 0x146   :  { %v1396_v49 = vpop.f32.mrf.mxu1  ;;  %10998 = vst [vmem:[#allocation84_spill] sm:$0xff] %v8790_v29  ;;  %v4036_v29 = vld [vmem:[%s10901_s8 + $0x138] sm:$0xff] }
 0x147   :  { %v1397_v48 = vadd.f32 %v6795_v14, %v1396_v49  ;;  %v8780_v20 = vpop.f32.mrf.mxu0 }
 0x148   :  { %v1398_v2 = vpop.f32.mrf.mxu1 }
 0x149   :  { %4238 = vperm.xlu1 %6849, %v4032_v52   ;;  %4233 = vperm.xlu0 %6848, %v4031_v38   ;;  %v8782_v61 = vpop.f32.mrf.mxu0  ;;  %v1921_v14 = vadd.f32 %v8168_v18, %v1397_v48  ;;  %v8795_v38 = vpop.permute.xlu1 %2402  ;;  %v4035_v18 = vld [vmem:[%s10901_s8 + $0x130] sm:$0xff] }
 0x14a   :  { %v1399_v16 = vpop.f32.mrf.mxu1  ;;  %10999 = vst [vmem:[#allocation85_spill] sm:$0xff] %v8795_v38  ;;  %v4038_v38 = vld [vmem:[%s10901_s8 + $0x148] sm:$0xff] }
 0x14b   :  { %v1400_v49 = vadd.f32 %v6796_v22, %v1399_v16  ;;  %v8793_v46 = vpop.f32.mrf.mxu0  ;;  %v1985_v22 = vmax.f32 %v1921_v14, 0.0  ;;  %v4037_v14 = vld [vmem:[%s10901_s8 + $0x140] sm:$0xff] }
 0x14c   :  { %v1401_v52 = vpop.f32.mrf.mxu1 }
 0x14d   :  { %v1922_v2 = vadd.f32 %v8166_v17, %v1400_v49  ;;  %4248 = vperm.xlu1 %6849, %v4034_v0   ;;  %4243 = vperm.xlu0 %6848, %v4033_v40   ;;  %v8798_v36 = vpop.f32.mrf.mxu0  ;;  %v8810_v17 = vpop.permute.xlu0 %2407 }
 0x14e   :  { %v8800_v1 = vpop.f32.mrf.mxu1  ;;  %11000 = vst [vmem:[#allocation86_spill] sm:$0xff] %v8810_v17  ;;  %v4039_v17 = vld [vmem:[%s10901_s8 + $0x150] sm:$0xff] }
 0x14f   :  { %v1986_v48 = vmax.f32 %v1922_v2, 0.0  ;;  %v8808_v16 = vpop.f32.mrf.mxu0  ;;  %v8824_v2 = vpop.permute.xlu1 %2412 }
 0x150   :  { %v1406_v52 = vpop.f32.mrf.mxu1  ;;  %11001 = vst [vmem:[#allocation87_spill] sm:$0xff] %v8824_v2 }
 0x151   :  { %v8812_v40 = vpack.c.bf16 %v1986_v48, %v1985_v22  ;;  %4258 = vperm.xlu1 %6849, %v4036_v29   ;;  %4253 = vperm.xlu0 %6848, %v4035_v18   ;;  %v8814_v0 = vpop.f32.mrf.mxu0  ;;  %v4040_v48 = vld [vmem:[%s10901_s8 + $0x158] sm:$0xff]  ;;  %v8838_v12 = vpop.permute.xlu0 %2417 }
 0x152   :  { %v8816_v49 = vpop.f32.mrf.mxu1  ;;  %11002 = vst [vmem:[#allocation88_spill] sm:$0xff] %v8838_v12 }
 0x153   :  { %v8826_v52 = vpop.f32.mrf.mxu0 }
 0x154   :  { %v1409_v22 = vpop.f32.mrf.mxu1 }
 0x155   :  { %4268 = vperm.xlu1 %6849, %v4038_v38   ;;  %4263 = vperm.xlu0 %6848, %v4037_v14   ;;  %v8828_v29 = vpop.f32.mrf.mxu0  ;;  %v8842_v22 = vpop.permute.xlu1 %2422 }
 0x156   :  { %v8830_v18 = vpop.f32.mrf.mxu1  ;;  %11003 = vst [vmem:[#allocation89_spill] sm:$0xff] %v8842_v22  ;;  %v8854_v27 = vpop.permute.xlu0 %2427  ;;  %v4043_v22 = vld [vmem:[%s10901_s8 + $0x170] sm:$0xff] }
 0x157   :  { %v8840_v2 = vpop.f32.mrf.mxu0  ;;  %11006 = vst [vmem:[#allocation92_spill] sm:$0xff] %v8854_v27  ;;  %v4046_v27 = vld [vmem:[%s10901_s8 + $0x188] sm:$0xff] }
 0x158   :  { %v1414_v62 = vpop.f32.mrf.mxu1 }
 0x159   :  { %4278 = vperm.xlu1 %6849, %v4040_v48   ;;  %4273 = vperm.xlu0 %6848, %v4039_v17   ;;  %v8844_v38 = vpop.f32.mrf.mxu0  ;;  %v4044_v48 = vld [vmem:[%s10901_s8 + $0x178] sm:$0xff]  ;;  %v8864_v58 = vpop.permute.xlu1 %2432 }
 0x15a   :  { %11004 = vst [vmem:[#allocation90_spill] sm:$0xff] %v8844_v38  ;;  %v1415_v14 = vpop.f32.mrf.mxu1  ;;  %11008 = vst [vmem:[#allocation94_spill] sm:$0xff] %v8864_v58  ;;  %v8876_v54 = vpop.permute.xlu0 %2437 }
 0x15b   :  { %v8852_v47 = vpop.f32.mrf.mxu0  ;;  %11011 = vst [vmem:[#allocation97_spill] sm:$0xff] %v8876_v54 }
 0x15c   :  { %11005 = vst [vmem:[#allocation91_spill] sm:$0xff] %v8852_v47  ;;  %v1417_v12 = vpop.f32.mrf.mxu1 }
 0x15d   :  { %4288 = vperm.xlu1 %6849, %v4042_v53   ;;  %4283 = vperm.xlu0 %6848, %v4041_v13   ;;  %v8856_v62 = vpop.f32.mrf.mxu0  ;;  %v8880_v38 = vpop.permute.xlu1 %2442 }
 0x15e   :  { %11007 = vst [vmem:[#allocation93_spill] sm:$0xff] %v8856_v62  ;;  %v1420_v17 = vpop.f32.mrf.mxu1  ;;  %11013 = vst [vmem:[#allocation99_spill] sm:$0xff] %v8880_v38  ;;  %v4047_v62 = vld [vmem:[%s10901_s8 + $0x190] sm:$0xff] }
 0x15f   :  { %v8866_v37 = vpop.f32.mrf.mxu0 }
 0x160   :  { %11009 = vst [vmem:[#allocation95_spill] sm:$0xff] %v8866_v37  ;;  %v1422_v12 = vpop.f32.mrf.mxu1 }
 0x161   :  { %4298 = vperm.xlu1 %6849, %v4044_v48   ;;  %4293 = vperm.xlu0 %6848, %v4043_v22   ;;  %v8868_v53 = vpop.f32.mrf.mxu0  ;;  %v4048_v12 = vld [vmem:[%s10901_s8 + $0x198] sm:$0xff] }
 0x162   :  { %11010 = vst [vmem:[#allocation96_spill] sm:$0xff] %v8868_v53  ;;  %v1423_v13 = vpop.f32.mrf.mxu1 }
 0x163   :  { %v8878_v19 = vpop.f32.mrf.mxu0 }
 0x164   :  { %11012 = vst [vmem:[#allocation98_spill] sm:$0xff] %v8878_v19  ;;  %v1425_v58 = vpop.f32.mrf.mxu1  ;;  %v8893_v19 = vpop.permute.xlu0 %2447 }
 0x165   :  { %4308 = vperm.xlu1 %6849, %v4046_v27   ;;  %4303 = vperm.xlu0 %6848, %v4045_v63   ;;  %v8882_v22 = vpop.f32.mrf.mxu0  ;;  %11016 = vst [vmem:[#allocation102_spill] sm:$0xff] %v8893_v19  ;;  %v1424_v27 = vadd.f32 %v1423_v13, %v8782_v61  ;;  %v1421_v61 = vadd.f32 %v1420_v17, %v8770_v5 }
 0x166   :  { %11014 = vst [vmem:[#allocation100_spill] sm:$0xff] %v8882_v22  ;;  %v1428_v48 = vpop.f32.mrf.mxu1  ;;  %v4050_v22 = vld [vmem:[%s10901_s8 + $0x1a8] sm:$0xff]  ;;  %v1413_v5 = vadd.f32 %v8735_v15, %v8830_v18 }
 0x167   :  { %v1429_v54 = vadd.f32 %v8766_v8, %v1428_v48  ;;  %v8891_v53 = vpop.f32.mrf.mxu0  ;;  %v4049_v8 = vld [vmem:[%s10901_s8 + $0x1a0] sm:$0xff]  ;;  %v6992_v48 = vld [vmem:[%s10898_s5 + $0xc] ss:$16 sps:$4 sm:$0xff]   ;;  %v1928_v37 = vadd.f32 %v8067_v43, %v1424_v27 }
 0x168   :  { %11015 = vst [vmem:[#allocation101_spill] sm:$0xff] %v8891_v53  ;;  %v1430_v58 = vpop.f32.mrf.mxu1  ;;  %3516 = vmatprep.mubr.bf16.mxu1 %v6992_v48  ;;  %v6995_v43 = vld [vmem:[%s10898_s5 + $0x4] ss:$16 sps:$4 sm:$0xff]  }
 0x169   :  { %4318 = vperm.xlu1 %6849, %v4048_v12   ;;  %4313 = vperm.xlu0 %6848, %v4047_v62   ;;  %v8896_v63 = vpop.f32.mrf.mxu0  ;;  %v8907_v58 = vpop.permute.xlu1 %2467  ;;  %v1929_v62 = vadd.f32 %v8015_v24, %v1429_v54  ;;  %v1927_v54 = vadd.f32 %v8069_v44, %v1421_v61  ;;  %v1992_v48 = vmax.f32 %v1928_v37, 0.0 }
 0x16a   :  { %11017 = vst [vmem:[#allocation103_spill] sm:$0xff] %v8896_v63  ;;  %v1431_v38 = vpop.f32.mrf.mxu1  ;;  %11018 = vst [vmem:[#allocation104_spill] sm:$0xff] %v8907_v58  ;;  %v1416_v63 = vadd.f32 %v8750_v51, %v1415_v14  ;;  %3227 = vmatprep.mubr.bf16.mxu0 %v6995_v43 }
 0x16b   :  { %v1432_v13 = vadd.f32 %v8780_v20, %v1431_v38  ;;  %v1244_v12 = vpop.f32.mrf.mxu0  ;;  %v4052_v20 = vld [vmem:[%s10901_s8 + $0x1b8] sm:$0xff]  ;;  %v1993_v51 = vmax.f32 %v1929_v62, 0.0  ;;  %v1991_v37 = vmax.f32 %v1927_v54, 0.0  ;;  %v11019_v62 = vmov 0  }
 0x16c   :  { %v1245_v19 = vadd.f32 %v1244_v12, %v8465_v4  ;;  %v1433_v53 = vpop.f32.mrf.mxu1  ;;  %v4051_v4 = vld [vmem:[%s10901_s8 + $0x1b0] sm:$0xff] }
 0x16d   :  { %v1930_v47 = vadd.f32 %v8034_v31, %v1432_v13  ;;  %4328 = vperm.xlu1 %6849, %v4050_v22   ;;  %4323 = vperm.xlu0 %6848, %v4049_v8   ;;  %v1246_v58 = vpop.f32.mrf.mxu0  ;;  %v8927_v31 = vpop.permute.xlu0 %2472  ;;  %v1408_v22 = vadd.f32 %v8816_v49, %v8756_v50  ;;  %v1926_v8 = vadd.f32 %v8100_v55, %v1416_v63  ;;  %v4053_v50 = vld [vmem:[%s10901_s8 + $0x1c0] sm:$0xff] }
 0x16e   :  { %v1436_v24 = vpop.f32.mrf.mxu1  ;;  %v1883_v14 = vadd.f32 %v8254_v60, %v1245_v19  ;;  %v8935_v27 = vpop.permute.xlu1 %2457  ;;  %v4054_v19 = vld [vmem:[%s10901_s8 + $0x1c8] sm:$0xff]  ;;  %v1925_v55 = vadd.f32 %v8102_v56, %v1413_v5  ;;  %v2161_v56 = vpack.c.bf16 %v1992_v48, %v1991_v37 }
 0x16f   :  { %v1994_v38 = vmax.f32 %v1930_v47, 0.0  ;;  %v1437_v15 = vadd.f32 %v1436_v24, %v8798_v36  ;;  %v1247_v18 = vpop.f32.mrf.mxu0  ;;  %v1405_v36 = vadd.f32 %v8800_v1, %v8738_v25  ;;  %v1924_v13 = vadd.f32 %v8133_v3, %v1408_v22  ;;  %v4055_v3 = vld [vmem:[%s10901_s8 + $0x1d0] sm:$0xff] }
 0x170   :  { %v1248_v17 = vadd.f32 %v1247_v18, %v8479_v9  ;;  %v1438_v53 = vpop.f32.mrf.mxu1  ;;  %v1947_v25 = vmax.f32 %v1883_v14, 0.0  ;;  %v1990_v12 = vmax.f32 %v1926_v8, 0.0  ;;  %v1989_v43 = vmax.f32 %v1925_v55, 0.0 }
 0x171   :  { %v2162_v44 = vpack.c.bf16 %v1994_v38, %v1993_v51  ;;  %4338 = vperm.xlu1 %6849, %v4052_v20   ;;  %4333 = vperm.xlu0 %6848, %v4051_v4   ;;  %v1249_v47 = vpop.f32.mrf.mxu0  ;;  %v1931_v49 = vadd.f32 %v8519_v26, %v1437_v15  ;;  %v8953_v24 = vpop.permute.xlu0 %2462  ;;  %v1988_v53 = vmax.f32 %v1924_v13, 0.0 }
 0x172   :  { %v1884_v60 = vadd.f32 %v8252_v59, %v1248_v17  ;;  %v1439_v9 = vpop.f32.mrf.mxu1  ;;  %v8965_v54 = vpop.permute.xlu1 %2452  ;;  %v1392_v17 = vadd.f32 %v8758_v35, %v8724_v11  ;;  %v2160_v22 = vpack.c.bf16 %v1990_v12, %v1989_v43 }
 0x173   :  { %v1440_v63 = vadd.f32 %v1439_v9, %v8814_v0  ;;  %3485 = vmatpush1.bf16.msra.mxu1 %v2162_v44  ;;  %v1252_v1 = vpop.f32.mrf.mxu0  ;;  %v1923_v0 = vadd.f32 %v8135_v7, %v1405_v36 }
 0x174   :  { %v1948_v59 = vmax.f32 %v1884_v60, 0.0  ;;  %v1253_v58 = vadd.f32 %v8459_v21, %v1252_v1  ;;  %v1441_v61 = vpop.f32.mrf.mxu1  ;;  %3486 = vmatprep.subr.bf16.mxu1 %v11019_v62  ;;  %v4056_v21 = vld [vmem:[%s10901_s8 + $0x1d8] sm:$0xff] }
 0x175   :  { %v1932_v5 = vadd.f32 %v8517_v57, %v1440_v63  ;;  %4348 = vperm.xlu1 %6849, %v4054_v19   ;;  %4343 = vperm.xlu0 %6848, %v4053_v50   ;;  %v1254_v26 = vpop.f32.mrf.mxu0  ;;  %v1995_v57 = vmax.f32 %v1931_v49, 0.0  ;;  %v1987_v47 = vmax.f32 %v1923_v0, 0.0  ;;  %v8982_v35 = vpop.permute.xlu0 %2477  ;;  %v1920_v50 = vadd.f32 %v8200_v33, %v1392_v17  ;;  %v4060_v1 = vld [vmem:[%s10901_s8 + $0x1f8] sm:$0xff] }
 0x176   :  { %v8957_v20 = vpack.c.bf16 %v1948_v59, %v1947_v25  ;;  %v1444_v4 = vpop.f32.mrf.mxu1  ;;  %v1885_v15 = vadd.f32 %v8220_v42, %v1253_v58  ;;  %v4057_v42 = vld [vmem:[%s10901_s8 + $0x1e0] sm:$0xff]  ;;  %v8990_v37 = vpop.permute.xlu1 %2482  ;;  %v4059_v25 = vld [vmem:[%s10901_s8 + $0x1f0] sm:$0xff]  ;;  %v1919_v33 = vadd.f32 %v8202_v34, %v8748_v28  ;;  %v5664_v28 = vld [vmem:[%s10902_s9 + $0x8] sm:$0xff] }
 0x177   :  { %v1996_v51 = vmax.f32 %v1932_v5, 0.0  ;;  %v1445_v38 = vadd.f32 %v8793_v46, %v1444_v4  ;;  %3487 = vmatpush1.bf16.msra.mxu1 %v2161_v56  ;;  %v1255_v7 = vpop.f32.mrf.mxu0  ;;  %v2159_v55 = vpack.c.bf16 %v1988_v53, %v1987_v47  ;;  %v1984_v12 = vmax.f32 %v1920_v50, 0.0 }
 0x178   :  { %v1256_v18 = vadd.f32 %v8473_v6, %v1255_v7  ;;  %v1446_v14 = vpop.f32.mrf.mxu1  ;;  %3488 = vmatprep.subr.bf16.mxu1 %v11019_v62  ;;  %v4058_v6 = vld [vmem:[%s10901_s8 + $0x1e8] sm:$0xff]  ;;  %v1983_v0 = vmax.f32 %v1919_v33, 0.0  ;;  %v5665_v7 = vld [vmem:[%s10902_s9 + $0x10] sm:$0xff] }
 0x179   :  { %v8973_v8 = vpack.c.bf16 %v1996_v51, %v1995_v57  ;;  %4358 = vperm.xlu1 %6849, %v4056_v21   ;;  %4353 = vperm.xlu0 %6848, %v4055_v3   ;;  %v1257_v48 = vpop.f32.mrf.mxu0  ;;  %v1933_v11 = vadd.f32 %v8491_v10, %v1445_v38  ;;  %v9009_v56 = vpop.permute.xlu0 %2487  ;;  %v5666_v38 = vld [vmem:[%s10902_s9 + $0x18] sm:$0xff] }
 0x17a   :  { %v1886_v46 = vadd.f32 %v8218_v41, %v1256_v18  ;;  %v1447_v44 = vpop.f32.mrf.mxu1  ;;  %v1949_v41 = vmax.f32 %v1885_v15, 0.0  ;;  %v9021_v4 = vpop.permute.xlu1 %2547  ;;  %v2157_v43 = vpack.c.bf16 %v1984_v12, %v1983_v0  ;;  %v5668_v48 = vld [vmem:[%s10902_s9 + $0x28] sm:$0xff]  ;;  %v5674_v12 = vld [vmem:[%s10902_s9 + $0x58] sm:$0xff] }
 0x17b   :  { %v1448_v36 = vadd.f32 %v8808_v16, %v1447_v44  ;;  %3489 = vmatpush1.bf16.msra.mxu1 %v2160_v22  ;;  %v8986_v60 = vpop.f32.mrf.mxu0  ;;  %v1997_v59 = vmax.f32 %v1933_v11, 0.0 }
 0x17c   :  { %v1950_v9 = vmax.f32 %v1886_v46, 0.0  ;;  %v1449_v19 = vpop.f32.mrf.mxu1  ;;  %3490 = vmatprep.subr.bf16.mxu1 %v11019_v62 }
 0x17d   :  { %v1934_v49 = vadd.f32 %v8489_v23, %v1448_v36  ;;  %4368 = vperm.xlu1 %6849, %v4058_v6   ;;  %4363 = vperm.xlu0 %6848, %v4057_v42   ;;  %v1262_v10 = vpop.f32.mrf.mxu0  ;;  %v9033_v15 = vpop.permute.xlu0 %2552 }
 0x17e   :  { %v8993_v63 = vpack.c.bf16 %v1950_v9, %v1949_v41  ;;  %v1452_v16 = vpop.f32.mrf.mxu1  ;;  %11020 = vst [vmem:[#allocation105_spill] sm:$0xff] %v9033_v15  ;;  %v9039_v17 = vpop.permute.xlu1 %2537  ;;  %v11044_v15 = vld [vmem:[#allocation19_spill] sm:$0xff] }
 0x17f   :  { %v1998_v58 = vmax.f32 %v1934_v49, 0.0  ;;  %v9004_v23 = vadd.f32 %v1452_v16, %v8828_v29  ;;  %3491 = vmatpush1.bf16.msra.mxu1 %v2159_v55  ;;  %v9006_v61 = vpop.f32.mrf.mxu0  ;;  %v5663_v29 = vld [vmem:[%s10902_s9] sm:$0xff]  ;;  %v5672_v16 = vld [vmem:[%s10902_s9 + $0x48] sm:$0xff] }
 0x180   :  { %v1454_v13 = vpop.f32.mrf.mxu1  ;;  %3492 = vmatprep.subr.bf16.mxu1 %v11019_v62 }
 0x181   :  { %v9011_v5 = vpack.c.bf16 %v1998_v58, %v1997_v59  ;;  %4378 = vperm.xlu1 %6849, %v4060_v1   ;;  %4373 = vperm.xlu0 %6848, %v4059_v25   ;;  %v1265_v26 = vpop.f32.mrf.mxu0  ;;  %v9053_v47 = vpop.permute.xlu0 %2542 }
 0x182   :  { %v9013_v34 = vpop.f32.mrf.mxu1  ;;  %v5673_v26 = vld [vmem:[%s10902_s9 + $0x50] sm:$0xff] }
 0x183   :  { %3493 = vmatpush1.bf16.msra.mxu1 %v8812_v40  ;;  %v9024_v21 = vpop.f32.mrf.mxu0 }
 0x184   :  { %v1457_v3 = vpop.f32.mrf.mxu1  ;;  %3494 = vmatprep.subr.bf16.mxu1 %v11019_v62 }
 0x185   :  { %5734 = vperm.xlu1 %6849, %v5664_v28   ;;  %5729 = vperm.xlu0 %6848, %v5663_v29   ;;  %v1270_v57 = vpop.f32.mrf.mxu0  ;;  %v9080_v1 = vpop.permute.xlu0 %2532  ;;  %v11023_v28 = vld [vmem:[#allocation91_spill] sm:$0xff] }
 0x186   :  { %v1460_v51 = vpop.f32.mrf.mxu1  ;;  %11022 = vst [vmem:[#allocation107_spill] sm:$0xff] %v9080_v1 }
 0x187   :  { %v1461_v40 = vadd.f32 %v8826_v52, %v1460_v51  ;;  %3495 = vmatpush1.bf16.msra.mxu1 %v2157_v43  ;;  %v9036_v18 = vpop.f32.mrf.mxu0  ;;  %v5667_v52 = vld [vmem:[%s10902_s9 + $0x20] sm:$0xff] }
 0x188   :  { %v1462_v14 = vpop.f32.mrf.mxu1  ;;  %3496 = vmatprep.subr.bf16.mxu1 %v11019_v62 }
 0x189   :  { %5744 = vperm.xlu1 %6849, %v5666_v38   ;;  %5739 = vperm.xlu0 %6848, %v5665_v7   ;;  %v1273_v53 = vpop.f32.mrf.mxu0  ;;  %v1937_v46 = vadd.f32 %v8437_v45, %v1461_v40  ;;  %v5670_v45 = vld [vmem:[%s10902_s9 + $0x38] sm:$0xff]  ;;  %v9093_v43 = vpop.permute.xlu0 %2522  ;;  %v5676_v38 = vld [vmem:[%s10902_s9 + $0x68] sm:$0xff]  ;;  %v5675_v7 = vld [vmem:[%s10902_s9 + $0x60] sm:$0xff] }
 0x18a   :  { %v1463_v22 = vpop.f32.mrf.mxu1  ;;  %v11024_v14 = vld [vmem:[#allocation24_spill] sm:$0xff] }
 0x18b   :  { %v1464_v44 = vadd.f32 %v8840_v2, %v1463_v22  ;;  %3497 = vmatpush1.bf16.msra.mxu1 %v8754_v39  ;;  %v9050_v6 = vpop.f32.mrf.mxu0  ;;  %v5669_v39 = vld [vmem:[%s10902_s9 + $0x30] sm:$0xff]  ;;  %v9064_v2 = vpop.permute.xlu1 %2527  ;;  %v2001_v9 = vmax.f32 %v1937_v46, 0.0 }
 0x18c   :  { %v1465_v42 = vpop.f32.mrf.mxu1  ;;  %3498 = vmatprep.subr.bf16.mxu1 %v11019_v62  ;;  %11021 = vst [vmem:[#allocation106_spill] sm:$0xff] %v9064_v2  ;;  %v11025_v22 = vld [vmem:[#allocation95_spill] sm:$0xff]  ;;  %v11036_v2 = vld [vmem:[#allocation8_spill] sm:$0xff] }
 0x18d   :  { %v1938_v11 = vadd.f32 %v8435_v30, %v1464_v44  ;;  %5754 = vperm.xlu1 %6849, %v5668_v48   ;;  %5749 = vperm.xlu0 %6848, %v5667_v52   ;;  %v1278_v36 = vpop.f32.mrf.mxu0  ;;  %v11026_v44 = vld [vmem:[#allocation23_spill] sm:$0xff] }
 0x18e   :  { %v9056_v41 = vpop.f32.mrf.mxu1 }
 0x18f   :  { %v2002_v19 = vmax.f32 %v1938_v11, 0.0  ;;  %3499 = vmatpush1.bf16.msra.mxu1 %v8720_v32  ;;  %v9067_v30 = vpop.f32.mrf.mxu0  ;;  %v5671_v32 = vld [vmem:[%s10902_s9 + $0x40] sm:$0xff]  ;;  %v9084_v59 = vpop.permute.xlu1 %2517 }
 0x190   :  { %v1470_v50 = vpop.f32.mrf.mxu1  ;;  %3500 = vmatprep.subr.bf16.mxu1 %v11019_v62 }
 0x191   :  { %v9070_v55 = vpack.c.bf16 %v2002_v19, %v2001_v9  ;;  %5764 = vperm.xlu1 %6849, %v5670_v45   ;;  %5759 = vperm.xlu0 %6848, %v5669_v39   ;;  %v1281_v49 = vpop.f32.mrf.mxu0  ;;  %v5678_v45 = vld [vmem:[%s10902_s9 + $0x78] sm:$0xff]  ;;  %v5677_v39 = vld [vmem:[%s10902_s9 + $0x70] sm:$0xff]  ;;  %v9112_v9 = vpop.permute.xlu0 %2512 }
 0x192   :  { %v9072_v10 = vpop.f32.mrf.mxu1 }
 0x193   :  { %v9082_v25 = vpop.f32.mrf.mxu0  ;;  %v9101_v40 = vpop.permute.xlu1 %2507 }
 0x194   :  { %v1473_v33 = vpop.f32.mrf.mxu1 }
 0x195   :  { %5774 = vperm.xlu1 %6849, %v5672_v16   ;;  %5769 = vperm.xlu0 %6848, %v5671_v32   ;;  %v1286_v58 = vpop.f32.mrf.mxu0 }
 0x196   :  { %v1476_v13 = vpop.f32.mrf.mxu1 }
 0x197   :  { %v1477_v29 = vadd.f32 %v11023_v28, %v1476_v13  ;;  %v1287_v0 = vpop.f32.mrf.mxu0  ;;  %v9114_v32 = vpop.permute.xlu1 %2497 }
 0x198   :  { %v1478_v3 = vpop.f32.mrf.mxu1 }
 0x199   :  { %5784 = vperm.xlu1 %6849, %v5674_v12   ;;  %5779 = vperm.xlu0 %6848, %v5673_v26   ;;  %v1289_v57 = vpop.f32.mrf.mxu0  ;;  %v1941_v53 = vadd.f32 %v11024_v14, %v1477_v29  ;;  %v5680_v12 = vld [vmem:[%s10902_s9 + $0x88] sm:$0xff]  ;;  %v5679_v26 = vld [vmem:[%s10902_s9 + $0x80] sm:$0xff] }
 0x19a   :  { %v1479_v51 = vpop.f32.mrf.mxu1  ;;  %v11027_v29 = vld [vmem:[#allocation41_spill] sm:$0xff] }
 0x19b   :  { %v1480_v48 = vadd.f32 %v11025_v22, %v1479_v51  ;;  %v1292_v52 = vpop.f32.mrf.mxu0  ;;  %v2005_v19 = vmax.f32 %v1941_v53, 0.0  ;;  %v9125_v51 = vpop.permute.xlu0 %2502  ;;  %v5682_v22 = vld [vmem:[%s10902_s9 + $0x98] sm:$0xff] }
 0x19c   :  { %v1481_v46 = vpop.f32.mrf.mxu1 }
 0x19d   :  { %v1942_v42 = vadd.f32 %v11026_v44, %v1480_v48  ;;  %5794 = vperm.xlu1 %6849, %v5676_v38   ;;  %5789 = vperm.xlu0 %6848, %v5675_v7   ;;  %v1294_v11 = vpop.f32.mrf.mxu0  ;;  %v11028_v7 = vld [vmem:[#allocation48_spill] sm:$0xff]  ;;  %v9134_v46 = vpop.permute.xlu1 %2492  ;;  %v11029_v44 = vld [vmem:[#allocation98_spill] sm:$0xff] }
 0x19e   :  { %v1484_v36 = vpop.f32.mrf.mxu1  ;;  %v5681_v48 = vld [vmem:[%s10902_s9 + $0x90] sm:$0xff] }
 0x19f   :  { %v2006_v50 = vmax.f32 %v1942_v42, 0.0  ;;  %v1295_v49 = vpop.f32.mrf.mxu0 }
 0x1a0   :  { %v1486_v16 = vpop.f32.mrf.mxu1  ;;  %v1296_v14 = vadd.f32 %v1295_v49, %v11028_v7 }
 0x1a1   :  { %v9116_v33 = vpack.c.bf16 %v2006_v50, %v2005_v19  ;;  %5804 = vperm.xlu1 %6849, %v5678_v45   ;;  %5799 = vperm.xlu0 %6848, %v5677_v39   ;;  %v1297_v58 = vpop.f32.mrf.mxu0  ;;  %v11030_v45 = vld [vmem:[#allocation44_spill] sm:$0xff]  ;;  %v11031_v19 = vld [vmem:[#allocation7_spill] sm:$0xff]  ;;  %v11032_v16 = vld [vmem:[#allocation45_spill] sm:$0xff] }
 0x1a2   :  { %v1487_v13 = vpop.f32.mrf.mxu1  ;;  %v1293_v39 = vadd.f32 %v1292_v52, %v11030_v45  ;;  %v5684_v52 = vld [vmem:[%s10902_s9 + $0xa8] sm:$0xff] }
 0x1a3   :  { %v1300_v28 = vpop.f32.mrf.mxu0 }
 0x1a4   :  { %v1301_v3 = vadd.f32 %v11027_v29, %v1300_v28  ;;  %v1489_v57 = vpop.f32.mrf.mxu1  ;;  %v11034_v29 = vld [vmem:[#allocation37_spill] sm:$0xff] }
 0x1a5   :  { %5814 = vperm.xlu1 %6849, %v5680_v12   ;;  %5809 = vperm.xlu0 %6848, %v5679_v26   ;;  %v1302_v38 = vpop.f32.mrf.mxu0  ;;  %v11033_v12 = vld [vmem:[#allocation103_spill] sm:$0xff]  ;;  %v1288_v57 = vadd.f32 %v11034_v29, %v1287_v0  ;;  %v11040_v0 = vld [vmem:[#allocation101_spill] sm:$0xff]  ;;  %v9160_v29 = vpop.permute.xlu1 %4068 }
 0x1a6   :  { %v1492_v53 = vpop.f32.mrf.mxu1  ;;  %v1897_v50 = vadd.f32 %v11031_v19, %v1301_v3  ;;  %v1488_v26 = vadd.f32 %v1487_v13, %v11033_v12  ;;  %v11035_v38 = vld [vmem:[#allocation9_spill] sm:$0xff]  ;;  %v11038_v13 = vld [vmem:[#allocation100_spill] sm:$0xff] }
 0x1a7   :  { %v1493_v42 = vadd.f32 %v11029_v44, %v1492_v53  ;;  %v1303_v11 = vpop.f32.mrf.mxu0  ;;  %v1896_v7 = vadd.f32 %v11035_v38, %v1296_v14  ;;  %v5683_v3 = vld [vmem:[%s10902_s9 + $0xa0] sm:$0xff]  ;;  %v9150_v44 = vpop.permute.xlu0 %4063 }
 0x1a8   :  { %v1304_v49 = vadd.f32 %v11032_v16, %v1303_v11  ;;  %v1494_v58 = vpop.f32.mrf.mxu1  ;;  %11037 = vst [vmem:[#allocation91_spill] sm:$0xff] %v9150_v44  ;;  %v11042_v16 = vld [vmem:[#allocation10_spill] sm:$0xff]  ;;  %v11043_v38 = vld [vmem:[#allocation21_spill] sm:$0xff] }
 0x1a9   :  { %5824 = vperm.xlu1 %6849, %v5682_v22   ;;  %5819 = vperm.xlu0 %6848, %v5681_v48   ;;  %v1305_v28 = vpop.f32.mrf.mxu0  ;;  %v1485_v22 = vadd.f32 %v1484_v36, %v11038_v13  ;;  %v11039_v48 = vld [vmem:[#allocation20_spill] sm:$0xff]  ;;  %v1961_v58 = vmax.f32 %v1897_v50, 0.0  ;;  %v1944_v44 = vadd.f32 %v11043_v38, %v1488_v26  ;;  %v11047_v50 = vld [vmem:[#allocation22_spill] sm:$0xff] }
 0x1aa   :  { %v1898_v1 = vadd.f32 %v11036_v2, %v1304_v49  ;;  %v1495_v53 = vpop.f32.mrf.mxu1  ;;  %v1945_v11 = vadd.f32 %v11039_v48, %v1493_v42  ;;  %v11041_v2 = vld [vmem:[#allocation35_spill] sm:$0xff]  ;;  %v1895_v49 = vadd.f32 %v11042_v16, %v1293_v39 }
 0x1ab   :  { %v1496_v45 = vadd.f32 %v11040_v0, %v1495_v53  ;;  %v9155_v14 = vpop.f32.mrf.mxu0  ;;  %v1285_v19 = vadd.f32 %v11041_v2, %v9082_v25  ;;  %v11045_v53 = vld [vmem:[#allocation40_spill] sm:$0xff]  ;;  %v11046_v48 = vld [vmem:[#allocation11_spill] sm:$0xff]  ;;  %v1960_v25 = vmax.f32 %v1896_v7, 0.0  ;;  %v2008_v38 = vmax.f32 %v1944_v44, 0.0  ;;  %v9193_v44 = vpop.permute.xlu1 %4078 }
 0x1ac   :  { %v1962_v12 = vmax.f32 %v1898_v1, 0.0  ;;  %v1497_v28 = vpop.f32.mrf.mxu1  ;;  %v1280_v13 = vadd.f32 %v9067_v30, %v11045_v53  ;;  %v1894_v0 = vadd.f32 %v11046_v48, %v1288_v57  ;;  %v5686_v1 = vld [vmem:[%s10902_s9 + $0xb8] sm:$0xff]  ;;  %v5685_v39 = vld [vmem:[%s10902_s9 + $0xb0] sm:$0xff]  ;;  %v2009_v26 = vmax.f32 %v1945_v11, 0.0 }
 0x1ad   :  { %v1946_v36 = vadd.f32 %v11044_v15, %v1496_v45  ;;  %5834 = vperm.xlu1 %6849, %v5684_v52   ;;  %5829 = vperm.xlu0 %6848, %v5683_v3   ;;  %v1310_v42 = vpop.f32.mrf.mxu0  ;;  %v1943_v15 = vadd.f32 %v11047_v50, %v1485_v22  ;;  %v11048_v45 = vld [vmem:[#allocation36_spill] sm:$0xff]  ;;  %v1959_v16 = vmax.f32 %v1895_v49, 0.0  ;;  %v11051_v11 = vld [vmem:[#allocation31_spill] sm:$0xff]  ;;  %v11052_v53 = vld [vmem:[#allocation13_spill] sm:$0xff] }
 0x1ae   :  { %v2146_v2 = vpack.c.bf16 %v1962_v12, %v1961_v58  ;;  %v1277_v30 = vadd.f32 %v9050_v6, %v11048_v45  ;;  %v11049_v57 = vld [vmem:[#allocation12_spill] sm:$0xff]  ;;  %v9179_v58 = vpop.permute.xlu0 %4073  ;;  %v1892_v48 = vadd.f32 %v11052_v53, %v1280_v13  ;;  %v1958_v6 = vmax.f32 %v1894_v0, 0.0  ;;  %v11053_v49 = vld [vmem:[#allocation93_spill] sm:$0xff] }
 0x1af   :  { %v2010_v52 = vmax.f32 %v1946_v36, 0.0  ;;  %v9174_v3 = vpop.f32.mrf.mxu0  ;;  %v1893_v7 = vadd.f32 %v11049_v57, %v1285_v19  ;;  %v11050_v12 = vld [vmem:[#allocation96_spill] sm:$0xff]  ;;  %v1272_v36 = vadd.f32 %v11051_v11, %v9036_v18  ;;  %v2145_v50 = vpack.c.bf16 %v1960_v25, %v1959_v16  ;;  %v5688_v19 = vld [vmem:[%s10902_s9 + $0xc8] sm:$0xff]  ;;  %v11054_v13 = vld [vmem:[#allocation29_spill] sm:$0xff] }
 0x1b0   :  { %3196 = vmatpush1.bf16.msra.mxu0 %v2146_v2  ;;  %v1472_v28 = vadd.f32 %v9072_v10, %v11050_v12  ;;  %v5687_v10 = vld [vmem:[%s10902_s9 + $0xc0] sm:$0xff]  ;;  %v1469_v2 = vadd.f32 %v9056_v41, %v11053_v49  ;;  %v2007_v18 = vmax.f32 %v1943_v15, 0.0  ;;  %v1269_v0 = vadd.f32 %v11054_v13, %v9024_v21  ;;  %v11058_v41 = vld [vmem:[#allocation15_spill] sm:$0xff]  ;;  %v5690_v21 = vld [vmem:[%s10902_s9 + $0xd8] sm:$0xff] }
 0x1b1   :  { %v2170_v42 = vpack.c.bf16 %v2010_v52, %v2009_v26  ;;  %5844 = vperm.xlu1 %6849, %v5686_v1   ;;  %5839 = vperm.xlu0 %6848, %v5685_v39   ;;  %v1313_v22 = vpop.f32.mrf.mxu0  ;;  %v11055_v25 = vld [vmem:[#allocation14_spill] sm:$0xff]  ;;  %v1957_v39 = vmax.f32 %v1893_v7, 0.0  ;;  %v11056_v26 = vld [vmem:[#allocation25_spill] sm:$0xff]  ;;  %v1890_v15 = vadd.f32 %v11058_v41, %v1272_v36  ;;  %v1956_v12 = vmax.f32 %v1892_v48, 0.0  ;;  %v11061_v11 = vld [vmem:[#allocation16_spill] sm:$0xff] }
 0x1b2   :  { %3197 = vmatprep.subr.bf16.mxu0 %v11019_v62  ;;  %v1891_v1 = vadd.f32 %v11055_v25, %v1277_v30  ;;  %v1940_v52 = vadd.f32 %v11056_v26, %v1472_v28  ;;  %v2169_v45 = vpack.c.bf16 %v2008_v38, %v2007_v18  ;;  %v11057_v57 = vld [vmem:[#allocation34_spill] sm:$0xff]  ;;  %v5689_v30 = vld [vmem:[%s10902_s9 + $0xd0] sm:$0xff]  ;;  %v9212_v7 = vpop.permute.xlu0 %4083  ;;  %v1889_v36 = vadd.f32 %v11061_v11, %v1269_v0 }
 0x1b3   :  { %3501 = vmatpush2.bf16.msra.mxu1 %v2170_v42  ;;  %v1264_v16 = vadd.f32 %v9006_v61, %v11057_v57  ;;  %v2144_v42 = vpack.c.bf16 %v1958_v6, %v1957_v39  ;;  %v11059_v28 = vld [vmem:[#allocation26_spill] sm:$0xff]  ;;  %v11066_v39 = vld [vmem:[#allocation27_spill] sm:$0xff] }
 0x1b4   :  { %3198 = vmatpush1.bf16.msra.mxu0 %v2145_v50  ;;  %3502 = vmatprep.subr.bf16.mxu1 %v11019_v62  ;;  %v1939_v38 = vadd.f32 %v11059_v28, %v1469_v2  ;;  %v11060_v61 = vld [vmem:[#allocation30_spill] sm:$0xff]  ;;  %v1955_v53 = vmax.f32 %v1891_v1, 0.0  ;;  %v9221_v50 = vpop.permute.xlu1 %4088  ;;  %v1954_v2 = vmax.f32 %v1890_v15, 0.0  ;;  %v1953_v1 = vmax.f32 %v1889_v36, 0.0  ;;  %v5693_v41 = vld [vmem:[%s10902_s9 + $0xf0] sm:$0xff] }
 0x1b5   :  { %5854 = vperm.xlu1 %6849, %v5688_v19   ;;  %5849 = vperm.xlu0 %6848, %v5687_v10   ;;  %v1261_v22 = vadd.f32 %v8986_v60, %v11060_v61  ;;  %v11062_v48 = vld [vmem:[#allocation90_spill] sm:$0xff]  ;;  %11063 = vst [vmem:[#allocation24_spill] sm:$0xff] %v9221_v50  ;;  %v2004_v19 = vmax.f32 %v1940_v52, 0.0  ;;  %v11064_v10 = vld [vmem:[#allocation17_spill] sm:$0xff]  ;;  %v11068_v15 = vld [vmem:[#allocation28_spill] sm:$0xff] }
 0x1b6   :  { %3199 = vmatprep.subr.bf16.mxu0 %v11019_v62  ;;  %v1456_v6 = vadd.f32 %v9013_v34, %v11062_v48  ;;  %v1888_v49 = vadd.f32 %v11064_v10, %v1264_v16  ;;  %v2143_v18 = vpack.c.bf16 %v1956_v12, %v1955_v53  ;;  %v5692_v60 = vld [vmem:[%s10902_s9 + $0xe8] sm:$0xff]  ;;  %v5691_v13 = vld [vmem:[%s10902_s9 + $0xe0] sm:$0xff]  ;;  %v2003_v34 = vmax.f32 %v1939_v38, 0.0  ;;  %v9235_v52 = vpop.permute.xlu0 %4093  ;;  %v5698_v53 = vld [vmem:[%s10902_s9 + $0x118] sm:$0xff] }
 0x1b7   :  { %3503 = vmatpush2.bf16.msra.mxu1 %v2169_v45  ;;  %v11065_v0 = vld [vmem:[#allocation18_spill] sm:$0xff]  ;;  %11067 = vst [vmem:[#allocation95_spill] sm:$0xff] %v9235_v52  ;;  %v2142_v16 = vpack.c.bf16 %v1954_v2, %v1953_v1  ;;  %v1935_v12 = vadd.f32 %v11068_v15, %v9004_v23  ;;  %v5697_v48 = vld [vmem:[%s10902_s9 + $0x110] sm:$0xff]  ;;  %v11082_v15 = vld [vmem:[#allocation69_spill] sm:$0xff] }
 0x1b8   :  { %3200 = vmatpush1.bf16.msra.mxu0 %v2144_v42  ;;  %3504 = vmatprep.subr.bf16.mxu1 %v11019_v62  ;;  %v1887_v25 = vadd.f32 %v11065_v0, %v1261_v22  ;;  %v1936_v26 = vadd.f32 %v11066_v39, %v1456_v6  ;;  %v2167_v45 = vpack.c.bf16 %v2004_v19, %v2003_v34  ;;  %v1952_v57 = vmax.f32 %v1888_v49, 0.0  ;;  %v9246_v42 = vpop.permute.xlu1 %4098  ;;  %v5696_v38 = vld [vmem:[%s10902_s9 + $0x108] sm:$0xff]  ;;  %v5695_v23 = vld [vmem:[%s10902_s9 + $0x100] sm:$0xff]  ;;  %v5701_v49 = vld [vmem:[%s10902_s9 + $0x130] sm:$0xff] }
 0x1b9   :  { %5864 = vperm.xlu1 %6849, %v5690_v21   ;;  %5859 = vperm.xlu0 %6848, %v5689_v30   ;;  %11069 = vst [vmem:[#allocation23_spill] sm:$0xff] %v9246_v42  ;;  %v1999_v61 = vmax.f32 %v1935_v12, 0.0  ;;  %v5700_v6 = vld [vmem:[%s10902_s9 + $0x128] sm:$0xff]  ;;  %v5699_v19 = vld [vmem:[%s10902_s9 + $0x120] sm:$0xff]  ;;  %v5705_v1 = vld [vmem:[%s10902_s9 + $0x150] sm:$0xff] }
 0x1ba   :  { %3201 = vmatprep.subr.bf16.mxu0 %v11019_v62  ;;  %v1951_v21 = vmax.f32 %v1887_v25, 0.0  ;;  %v2000_v30 = vmax.f32 %v1936_v26, 0.0  ;;  %v9256_v22 = vpop.permute.xlu0 %4103  ;;  %v11077_v34 = vld [vmem:[#allocation74_spill] sm:$0xff]  ;;  %v5706_v25 = vld [vmem:[%s10902_s9 + $0x158] sm:$0xff]  ;;  %v11118_v42 = vld [vmem:[#allocation55_spill] sm:$0xff] }
 0x1bb   :  { %3505 = vmatpush2.bf16.msra.mxu1 %v9116_v33  ;;  %v5694_v33 = vld [vmem:[%s10902_s9 + $0xf8] sm:$0xff]  ;;  %11070 = vst [vmem:[#allocation41_spill] sm:$0xff] %v9256_v22 }
 0x1bc   :  { %3202 = vmatpush1.bf16.msra.mxu0 %v2143_v18  ;;  %3506 = vmatprep.subr.bf16.mxu1 %v11019_v62  ;;  %v2141_v28 = vpack.c.bf16 %v1952_v57, %v1951_v21  ;;  %v2165_v11 = vpack.c.bf16 %v2000_v30, %v1999_v61  ;;  %v9260_v36 = vpop.permute.xlu1 %4108  ;;  %v11075_v18 = vld [vmem:[#allocation75_spill] sm:$0xff]  ;;  %v11080_v57 = vld [vmem:[#allocation68_spill] sm:$0xff]  ;;  %v11084_v21 = vld [vmem:[#allocation54_spill] sm:$0xff] }
 0x1bd   :  { %5874 = vperm.xlu1 %6849, %v5692_v60   ;;  %5869 = vperm.xlu0 %6848, %v5691_v13   ;;  %11071 = vst [vmem:[#allocation48_spill] sm:$0xff] %v9260_v36  ;;  %v5704_v13 = vld [vmem:[%s10902_s9 + $0x148] sm:$0xff]  ;;  %v1312_v30 = vadd.f32 %v9174_v3, %v11084_v21  ;;  %v5715_v21 = vld [vmem:[%s10902_s9 + $0x1a0] sm:$0xff] }
 0x1be   :  { %3203 = vmatprep.subr.bf16.mxu0 %v11019_v62  ;;  %v6998_v39 = vld [vmem:[%s10898_s5 + $0x28] ss:$16 sps:$4 sm:$0xff]   ;;  %v7008_v61 = vld [vmem:[%s10898_s5 + $0x6c] ss:$16 sps:$4 sm:$0xff]  }
 0x1bf   :  { %3507 = vmatpush2.bf16.msra.mxu1 %v2167_v45  ;;  %v7002_v45 = vld [vmem:[%s10898_s5 + $0x4c] ss:$16 sps:$4 sm:$0xff]  }
 0x1c0   :  { %3204 = vmatpush1.bf16.msra.mxu0 %v2142_v16  ;;  %3508 = vmatprep.subr.bf16.mxu1 %v11019_v62  ;;  %v9280_v10 = vpop.permute.xlu1 %4118  ;;  %v5708_v16 = vld [vmem:[%s10902_s9 + $0x168] sm:$0xff] }
 0x1c1   :  { %5884 = vperm.xlu1 %6849, %v5694_v33   ;;  %5879 = vperm.xlu0 %6848, %v5693_v41   ;;  %11073 = vst [vmem:[#allocation44_spill] sm:$0xff] %v9280_v10  ;;  %v5707_v33 = vld [vmem:[%s10902_s9 + $0x160] sm:$0xff] }
 0x1c2   :  { %3205 = vmatprep.subr.bf16.mxu0 %v11019_v62 }
 0x1c3   :  { %3509 = vmatpush2.bf16.msra.mxu1 %v9070_v55  ;;  %v9271_v55 = vpop.permute.xlu0 %4113 }
 0x1c4   :  { %3206 = vmatpush1.bf16.msra.mxu0 %v2141_v28  ;;  %3510 = vmatprep.subr.bf16.mxu1 %v11019_v62  ;;  %11072 = vst [vmem:[#allocation98_spill] sm:$0xff] %v9271_v55  ;;  %v9303_v60 = vpop.permute.xlu1 %4128  ;;  %v5710_v28 = vld [vmem:[%s10902_s9 + $0x178] sm:$0xff] }
 0x1c5   :  { %5894 = vperm.xlu1 %6849, %v5696_v38   ;;  %5889 = vperm.xlu0 %6848, %v5695_v23   ;;  %11076 = vst [vmem:[#allocation45_spill] sm:$0xff] %v9303_v60  ;;  %v5709_v38 = vld [vmem:[%s10902_s9 + $0x170] sm:$0xff]  ;;  %v7004_v23 = vld [vmem:[%s10898_s5 + $0x48] ss:$16 sps:$4 sm:$0xff]  }
 0x1c6   :  { %3207 = vmatprep.subr.bf16.mxu0 %v11019_v62  ;;  %v11117_v55 = vld [vmem:[#allocation60_spill] sm:$0xff] }
 0x1c7   :  { %3511 = vmatpush2.bf16.msra.mxu1 %v2165_v11  ;;  %v9295_v2 = vpop.permute.xlu0 %4123  ;;  %v11085_v11 = vld [vmem:[#allocation51_spill] sm:$0xff] }
 0x1c8   :  { %3208 = vmatpush1.bf16.msra.mxu0 %v8993_v63  ;;  %3512 = vmatprep.subr.bf16.mxu1 %v11019_v62  ;;  %v5702_v63 = vld [vmem:[%s10902_s9 + $0x138] sm:$0xff]  ;;  %11074 = vst [vmem:[#allocation7_spill] sm:$0xff] %v9295_v2  ;;  %v9325_v26 = vpop.permute.xlu1 %4138  ;;  %v1309_v3 = vadd.f32 %v9155_v14, %v11085_v11 }
 0x1c9   :  { %5904 = vperm.xlu1 %6849, %v5698_v53   ;;  %5899 = vperm.xlu0 %6848, %v5697_v48   ;;  %11079 = vst [vmem:[#allocation37_spill] sm:$0xff] %v9325_v26  ;;  %v11086_v53 = vld [vmem:[#allocation62_spill] sm:$0xff] }
 0x1ca   :  { %3209 = vmatprep.subr.bf16.mxu0 %v11019_v62  ;;  %v7016_v11 = vld [vmem:[%s10898_s5 + $0x88] ss:$16 sps:$4 sm:$0xff]  }
 0x1cb   :  { %3513 = vmatpush2.bf16.msra.mxu1 %v9011_v5  ;;  %v6990_v5 = vld [vmem:[%s10898_s5 + $0x8] ss:$16 sps:$4 sm:$0xff]   ;;  %v9313_v0 = vpop.permute.xlu0 %4133 }
 0x1cc   :  { %3210 = vmatpush1.bf16.msra.mxu0 %v8957_v20  ;;  %3514 = vmatprep.subr.bf16.mxu1 %v11019_v62  ;;  %v6996_v20 = vld [vmem:[%s10898_s5 + $0x2c] ss:$16 sps:$4 sm:$0xff]   ;;  %11078 = vst [vmem:[#allocation103_spill] sm:$0xff] %v9313_v0  ;;  %v9341_v12 = vpop.permute.xlu1 %4148 }
 0x1cd   :  { %5914 = vperm.xlu1 %6849, %v5700_v6   ;;  %5909 = vperm.xlu0 %6848, %v5699_v19   ;;  %11083 = vst [vmem:[#allocation8_spill] sm:$0xff] %v9341_v12  ;;  %v11088_v6 = vld [vmem:[#allocation32_spill] sm:$0xff] }
 0x1ce   :  { %3211 = vmatprep.subr.bf16.mxu0 %v11019_v62  ;;  %v1900_v19 = vadd.f32 %v11088_v6, %v1312_v30  ;;  %v6993_v30 = vld [vmem:[%s10898_s5] ss:$16 sps:$4 sm:$0xff]   ;;  %v5720_v6 = vld [vmem:[%s10902_s9 + $0x1c8] sm:$0xff] }
 0x1cf   :  { %3515 = vmatpush2.bf16.msra.mxu1 %v8973_v8  ;;  %v5703_v8 = vld [vmem:[%s10902_s9 + $0x140] sm:$0xff]  ;;  %v9338_v41 = vpop.permute.xlu0 %4143 }
 0x1d0   :  { %3212 = vmatpush2.bf16.msra.mxu0 %v11075_v18  ;;  %5310 = vmatprep.subr.bf16.mxu1 %v11019_v62  ;;  %11081 = vst [vmem:[#allocation9_spill] sm:$0xff] %v9338_v41  ;;  %v9371_v14 = vpop.permute.xlu1 %4158  ;;  %v11091_v18 = vld [vmem:[#allocation63_spill] sm:$0xff]  ;;  %v11115_v41 = vld [vmem:[#allocation58_spill] sm:$0xff] }
 0x1d1   :  { %5924 = vperm.xlu1 %6849, %v5702_v63   ;;  %5919 = vperm.xlu0 %6848, %v5701_v49   ;;  %v5712_v63 = vld [vmem:[%s10902_s9 + $0x188] sm:$0xff]  ;;  %v5711_v49 = vld [vmem:[%s10902_s9 + $0x180] sm:$0xff]  ;;  %11089 = vst [vmem:[#allocation20_spill] sm:$0xff] %v9371_v14 }
 0x1d2   :  { %3213 = vmatprep.subr.bf16.mxu0 %v11019_v62  ;;  %3517 = vmatmul.mubr.bf16.vlgmr.msra.gmra.mxu1 %v6990_v5  ;;  %v11090_v5 = vld [vmem:[#allocation33_spill] sm:$0xff] }
 0x1d3   :  { %3524 = vmatprep.mubr.bf16.mxu1 %v6996_v20  ;;  %v9361_v48 = vpop.permute.xlu0 %4153  ;;  %v1899_v20 = vadd.f32 %v11090_v5, %v1309_v3  ;;  %v7005_v5 = vld [vmem:[%s10898_s5 + $0x44] ss:$16 sps:$4 sm:$0xff]  }
 0x1d4   :  { %3214 = vmatpush2.bf16.msra.mxu0 %v11077_v34  ;;  %11087 = vst [vmem:[#allocation100_spill] sm:$0xff] %v9361_v48  ;;  %v5713_v34 = vld [vmem:[%s10902_s9 + $0x190] sm:$0xff] }
 0x1d5   :  { %5934 = vperm.xlu1 %6849, %v5704_v13   ;;  %5929 = vperm.xlu0 %6848, %v5703_v8   ;;  %v1964_v13 = vmax.f32 %v1900_v19, 0.0  ;;  %v5714_v8 = vld [vmem:[%s10902_s9 + $0x198] sm:$0xff]  ;;  %v5719_v19 = vld [vmem:[%s10902_s9 + $0x1c0] sm:$0xff] }
 0x1d6   :  { %3215 = vmatprep.subr.bf16.mxu0 %v11019_v62 }
 0x1d8   :  { %3216 = vmatpush2.bf16.msra.mxu0 %v11080_v57  ;;  %v11093_v57 = vld [vmem:[#allocation57_spill] sm:$0xff] }
 0x1d9   :  { %5944 = vperm.xlu1 %6849, %v5706_v25   ;;  %5939 = vperm.xlu0 %6848, %v5705_v1   ;;  %v7010_v25 = vld [vmem:[%s10898_s5 + $0x68] ss:$16 sps:$4 sm:$0xff]   ;;  %v9385_v1 = vpop.permute.xlu0 %4163 }
 0x1da   :  { %3217 = vmatprep.subr.bf16.mxu0 %v11019_v62  ;;  %3525 = vmatmul.mubr.bf16.gmra.mxu1 %v6998_v39  ;;  %11092 = vst [vmem:[#allocation101_spill] sm:$0xff] %v9385_v1  ;;  %v7014_v39 = vld [vmem:[%s10898_s5 + $0x8c] ss:$16 sps:$4 sm:$0xff]  }
 0x1db   :  { %3532 = vmatprep.mubr.bf16.mxu1 %v7002_v45  ;;  %v1963_v45 = vmax.f32 %v1899_v20, 0.0 }
 0x1dc   :  { %3218 = vmatpush2.bf16.msra.mxu0 %v11082_v15  ;;  %v5716_v15 = vld [vmem:[%s10902_s9 + $0x1a8] sm:$0xff] }
 0x1dd   :  { %5954 = vperm.xlu1 %6849, %v5708_v16   ;;  %5949 = vperm.xlu0 %6848, %v5707_v33   ;;  %v9391_v16 = vpop.permute.xlu1 %4168  ;;  %v2147_v33 = vpack.c.bf16 %v1964_v13, %v1963_v45  ;;  %v5721_v13 = vld [vmem:[%s10902_s9 + $0x1d0] sm:$0xff]  ;;  %v5723_v45 = vld [vmem:[%s10902_s9 + $0x1e0] sm:$0xff] }
 0x1de   :  { %3219 = vmatprep.subr.bf16.mxu0 %v11019_v62  ;;  %11094 = vst [vmem:[#allocation35_spill] sm:$0xff] %v9391_v16  ;;  %v11107_v16 = vld [vmem:[#allocation42_spill] sm:$0xff] }
 0x1e0   :  { %3220 = vmatpush2.bf16.msra.mxu0 %v11086_v53  ;;  %v7022_v53 = vld [vmem:[%s10898_s5 + $0xac] ss:$16 sps:$4 sm:$0xff]  }
 0x1e1   :  { %5964 = vperm.xlu1 %6849, %v5710_v28   ;;  %5959 = vperm.xlu0 %6848, %v5709_v38   ;;  %v6999_v28 = vld [vmem:[%s10898_s5 + $0x24] ss:$16 sps:$4 sm:$0xff]   ;;  %v9406_v38 = vpop.permute.xlu0 %4173  ;;  %v9418_v3 = vpop.permute.xlu1 %4178 }
 0x1e2   :  { %3221 = vmatprep.subr.bf16.mxu0 %v11019_v62  ;;  %3533 = vmatmul.mubr.bf16.gmra.mxu1 %v7004_v23  ;;  %11095 = vst [vmem:[#allocation10_spill] sm:$0xff] %v9406_v38  ;;  %v5718_v23 = vld [vmem:[%s10902_s9 + $0x1b8] sm:$0xff]  ;;  %11096 = vst [vmem:[#allocation21_spill] sm:$0xff] %v9418_v3 }
 0x1e3   :  { %3540 = vmatprep.mubr.bf16.mxu1 %v7008_v61  ;;  %v5717_v61 = vld [vmem:[%s10902_s9 + $0x1b0] sm:$0xff] }
 0x1e4   :  { %3222 = vmatpush2.bf16.msra.mxu0 %v11091_v18  ;;  %v5722_v18 = vld [vmem:[%s10902_s9 + $0x1d8] sm:$0xff] }
 0x1e5   :  { %5974 = vperm.xlu1 %6849, %v5712_v63   ;;  %5969 = vperm.xlu0 %6848, %v5711_v49   ;;  %v9429_v63 = vpop.permute.xlu0 %4183  ;;  %v7001_v49 = vld [vmem:[%s10898_s5 + $0x20] ss:$16 sps:$4 sm:$0xff]   ;;  %v9437_v20 = vpop.permute.xlu1 %4188 }
 0x1e6   :  { %3223 = vmatprep.subr.bf16.mxu0 %v11019_v62  ;;  %11097 = vst [vmem:[#allocation19_spill] sm:$0xff] %v9429_v63  ;;  %11098 = vst [vmem:[#allocation40_spill] sm:$0xff] %v9437_v20  ;;  %v7148_v63 = vld [vmem:[%s10898_s5 + $0x344] ss:$16 sps:$4 sm:$0xff]  }
 0x1e8   :  { %3224 = vmatpush2.bf16.msra.mxu0 %v11093_v57 }
 0x1e9   :  { %5984 = vperm.xlu1 %6849, %v5714_v8   ;;  %5979 = vperm.xlu0 %6848, %v5713_v34   ;;  %v7020_v8 = vld [vmem:[%s10898_s5 + $0xa8] ss:$16 sps:$4 sm:$0xff]   ;;  %v7028_v34 = vld [vmem:[%s10898_s5 + $0xcc] ss:$16 sps:$4 sm:$0xff]   ;;  %v9459_v57 = vpop.permute.xlu1 %4198 }
 0x1ea   :  { %3225 = vmatprep.subr.bf16.mxu0 %v11019_v62  ;;  %3541 = vmatmul.mubr.bf16.gmra.mxu1 %v7010_v25  ;;  %v9451_v25 = vpop.permute.xlu0 %4193  ;;  %11100 = vst [vmem:[#allocation22_spill] sm:$0xff] %v9459_v57 }
 0x1eb   :  { %3548 = vmatprep.mubr.bf16.mxu1 %v7014_v39  ;;  %11099 = vst [vmem:[#allocation11_spill] sm:$0xff] %v9451_v25  ;;  %v5724_v39 = vld [vmem:[%s10902_s9 + $0x1e8] sm:$0xff]  ;;  %v7140_v25 = vld [vmem:[%s10898_s5 + $0x320] ss:$16 sps:$4 sm:$0xff]  }
 0x1ec   :  { %3226 = vmatpush2.bf16.msra.mxu0 %v2147_v33  ;;  %v7007_v33 = vld [vmem:[%s10898_s5 + $0x40] ss:$16 sps:$4 sm:$0xff]  }
 0x1ed   :  { %5994 = vperm.xlu1 %6849, %v5716_v15   ;;  %5989 = vperm.xlu0 %6848, %v5715_v21   ;;  %v7013_v15 = vld [vmem:[%s10898_s5 + $0x64] ss:$16 sps:$4 sm:$0xff]   ;;  %v5726_v21 = vld [vmem:[%s10902_s9 + $0x1f8] sm:$0xff] }
 0x1ee   :  { %5021 = vmatprep.subr.bf16.mxu0 %v11019_v62 }
 0x1ef   :  { %3228 = vmatmul.mubr.bf16.vlgmr.msra.gmra.mxu0 %v6993_v30  ;;  %v5725_v30 = vld [vmem:[%s10902_s9 + $0x1f0] sm:$0xff] }
 0x1f0   :  { %3235 = vmatprep.mubr.bf16.mxu0 %v6999_v28  ;;  %v7026_v28 = vld [vmem:[%s10898_s5 + $0xc8] ss:$16 sps:$4 sm:$0xff]  }
 0x1f1   :  { %6004 = vperm.xlu1 %6849, %v5718_v23   ;;  %5999 = vperm.xlu0 %6848, %v5717_v61   ;;  %v9476_v23 = vpop.permute.xlu0 %4203  ;;  %v7034_v61 = vld [vmem:[%s10898_s5 + $0xec] ss:$16 sps:$4 sm:$0xff]  }
 0x1f2   :  { %3549 = vmatmul.mubr.bf16.gmra.mxu1 %v7016_v11  ;;  %11101 = vst [vmem:[#allocation36_spill] sm:$0xff] %v9476_v23  ;;  %v9481_v11 = vpop.permute.xlu1 %4208 }
 0x1f3   :  { %3556 = vmatprep.mubr.bf16.mxu1 %v7022_v53  ;;  %11102 = vst [vmem:[#allocation12_spill] sm:$0xff] %v9481_v11  ;;  %v6245_v53 = vld [vmem:[#allocation2] sm:$0x1] }
 0x1f5   :  { %6014 = vperm.xlu1 %6849, %v5720_v6   ;;  %6009 = vperm.xlu0 %6848, %v5719_v19   ;;  %v7011_v6 = vld [vmem:[%s10898_s5 + $0x60] ss:$16 sps:$4 sm:$0xff]   ;;  %v7019_v19 = vld [vmem:[%s10898_s5 + $0x84] ss:$16 sps:$4 sm:$0xff]  }
 0x1f7   :  { %3236 = vmatmul.mubr.bf16.gmra.mxu0 %v7001_v49  ;;  %v9489_v49 = vpop.permute.xlu0 %4213 }
 0x1f8   :  { %3243 = vmatprep.mubr.bf16.mxu0 %v7005_v5  ;;  %11103 = vst [vmem:[#allocation96_spill] sm:$0xff] %v9489_v49  ;;  %v7032_v5 = vld [vmem:[%s10898_s5 + $0xe8] ss:$16 sps:$4 sm:$0xff]  }
 0x1f9   :  { %6024 = vperm.xlu1 %6849, %v5722_v18   ;;  %6019 = vperm.xlu0 %6848, %v5721_v13   ;;  %v7040_v18 = vld [vmem:[%s10898_s5 + $0x10c] ss:$16 sps:$4 sm:$0xff]   ;;  %v7017_v13 = vld [vmem:[%s10898_s5 + $0x80] ss:$16 sps:$4 sm:$0xff]  }
 0x1fa   :  { %3557 = vmatmul.mubr.bf16.gmra.mxu1 %v7020_v8  ;;  %v7025_v8 = vld [vmem:[%s10898_s5 + $0xa4] ss:$16 sps:$4 sm:$0xff]  }
 0x1fb   :  { %3564 = vmatprep.mubr.bf16.mxu1 %v7028_v34  ;;  %v7038_v34 = vld [vmem:[%s10898_s5 + $0x108] ss:$16 sps:$4 sm:$0xff]  }
 0x1fd   :  { %6034 = vperm.xlu1 %6849, %v5724_v39   ;;  %6029 = vperm.xlu0 %6848, %v5723_v45   ;;  %v7046_v39 = vld [vmem:[%s10898_s5 + $0x12c] ss:$16 sps:$4 sm:$0xff]   ;;  %v7023_v45 = vld [vmem:[%s10898_s5 + $0xa0] ss:$16 sps:$4 sm:$0xff]  }
 0x1ff   :  { %3244 = vmatmul.mubr.bf16.gmra.mxu0 %v7007_v33  ;;  %v7031_v33 = vld [vmem:[%s10898_s5 + $0xc4] ss:$16 sps:$4 sm:$0xff]  }
 0x200   :  { %3251 = vmatprep.mubr.bf16.mxu0 %v7013_v15  ;;  %v7044_v15 = vld [vmem:[%s10898_s5 + $0x128] ss:$16 sps:$4 sm:$0xff]  }
 0x201   :  { %6044 = vperm.xlu1 %6849, %v5726_v21   ;;  %6039 = vperm.xlu0 %6848, %v5725_v30   ;;  %v7052_v21 = vld [vmem:[%s10898_s5 + $0x14c] ss:$16 sps:$4 sm:$0xff]   ;;  %v7029_v30 = vld [vmem:[%s10898_s5 + $0xc0] ss:$16 sps:$4 sm:$0xff]  }
 0x202   :  { %3565 = vmatmul.mubr.bf16.gmra.mxu1 %v7026_v28  ;;  %v7037_v28 = vld [vmem:[%s10898_s5 + $0xe4] ss:$16 sps:$4 sm:$0xff]  }
 0x203   :  { %3572 = vmatprep.mubr.bf16.mxu1 %v7034_v61  ;;  %v7050_v61 = vld [vmem:[%s10898_s5 + $0x148] ss:$16 sps:$4 sm:$0xff]  }
 0x205   :  { %6248 = vperm.xlu0 %6848, %v6245_v53   ;;  %v7058_v53 = vld [vmem:[%s10898_s5 + $0x16c] ss:$16 sps:$4 sm:$0xff]  }
 0x207   :  { %3252 = vmatmul.mubr.bf16.gmra.mxu0 %v7011_v6  ;;  %v7035_v6 = vld [vmem:[%s10898_s5 + $0xe0] ss:$16 sps:$4 sm:$0xff]  }
 0x208   :  { %3259 = vmatprep.mubr.bf16.mxu0 %v7019_v19  ;;  %v7043_v19 = vld [vmem:[%s10898_s5 + $0x104] ss:$16 sps:$4 sm:$0xff]  }
 0x20a   :  { %3573 = vmatmul.mubr.bf16.gmra.mxu1 %v7032_v5  ;;  %v7056_v5 = vld [vmem:[%s10898_s5 + $0x168] ss:$16 sps:$4 sm:$0xff]  }
 0x20b   :  { %3580 = vmatprep.mubr.bf16.mxu1 %v7040_v18  ;;  %v7064_v18 = vld [vmem:[%s10898_s5 + $0x18c] ss:$16 sps:$4 sm:$0xff]  }
 0x20f   :  { %3260 = vmatmul.mubr.bf16.gmra.mxu0 %v7017_v13  ;;  %v7041_v13 = vld [vmem:[%s10898_s5 + $0x100] ss:$16 sps:$4 sm:$0xff]  }
 0x210   :  { %3267 = vmatprep.mubr.bf16.mxu0 %v7025_v8  ;;  %v7049_v8 = vld [vmem:[%s10898_s5 + $0x124] ss:$16 sps:$4 sm:$0xff]  }
 0x212   :  { %3581 = vmatmul.mubr.bf16.gmra.mxu1 %v7038_v34  ;;  %v7062_v34 = vld [vmem:[%s10898_s5 + $0x188] ss:$16 sps:$4 sm:$0xff]  }
 0x213   :  { %3588 = vmatprep.mubr.bf16.mxu1 %v7046_v39  ;;  %v7070_v39 = vld [vmem:[%s10898_s5 + $0x1ac] ss:$16 sps:$4 sm:$0xff]  }
 0x217   :  { %3268 = vmatmul.mubr.bf16.gmra.mxu0 %v7023_v45  ;;  %v7047_v45 = vld [vmem:[%s10898_s5 + $0x120] ss:$16 sps:$4 sm:$0xff]  }
 0x218   :  { %3275 = vmatprep.mubr.bf16.mxu0 %v7031_v33  ;;  %v7055_v33 = vld [vmem:[%s10898_s5 + $0x144] ss:$16 sps:$4 sm:$0xff]  }
 0x21a   :  { %3589 = vmatmul.mubr.bf16.gmra.mxu1 %v7044_v15  ;;  %v7068_v15 = vld [vmem:[%s10898_s5 + $0x1a8] ss:$16 sps:$4 sm:$0xff]  }
 0x21b   :  { %3596 = vmatprep.mubr.bf16.mxu1 %v7052_v21  ;;  %v7076_v21 = vld [vmem:[%s10898_s5 + $0x1cc] ss:$16 sps:$4 sm:$0xff]  }
 0x21f   :  { %3276 = vmatmul.mubr.bf16.gmra.mxu0 %v7029_v30  ;;  %v7053_v30 = vld [vmem:[%s10898_s5 + $0x140] ss:$16 sps:$4 sm:$0xff]  }
 0x220   :  { %3283 = vmatprep.mubr.bf16.mxu0 %v7037_v28  ;;  %v7061_v28 = vld [vmem:[%s10898_s5 + $0x164] ss:$16 sps:$4 sm:$0xff]  }
 0x222   :  { %3597 = vmatmul.mubr.bf16.gmra.mxu1 %v7050_v61  ;;  %v7074_v61 = vld [vmem:[%s10898_s5 + $0x1c8] ss:$16 sps:$4 sm:$0xff]  }
 0x223   :  { %3604 = vmatprep.mubr.bf16.mxu1 %v7058_v53  ;;  %v7082_v53 = vld [vmem:[%s10898_s5 + $0x1ec] ss:$16 sps:$4 sm:$0xff]  }
 0x227   :  { %3284 = vmatmul.mubr.bf16.gmra.mxu0 %v7035_v6  ;;  %v7059_v6 = vld [vmem:[%s10898_s5 + $0x160] ss:$16 sps:$4 sm:$0xff]  }
 0x228   :  { %3291 = vmatprep.mubr.bf16.mxu0 %v7043_v19  ;;  %v7067_v19 = vld [vmem:[%s10898_s5 + $0x184] ss:$16 sps:$4 sm:$0xff]  }
 0x22a   :  { %3605 = vmatmul.mubr.bf16.gmra.mxu1 %v7056_v5  ;;  %v7080_v5 = vld [vmem:[%s10898_s5 + $0x1e8] ss:$16 sps:$4 sm:$0xff]  }
 0x22b   :  { %3612 = vmatprep.mubr.bf16.mxu1 %v7064_v18  ;;  %v7088_v18 = vld [vmem:[%s10898_s5 + $0x20c] ss:$16 sps:$4 sm:$0xff]  }
 0x22f   :  { %3292 = vmatmul.mubr.bf16.gmra.mxu0 %v7041_v13  ;;  %v7065_v13 = vld [vmem:[%s10898_s5 + $0x180] ss:$16 sps:$4 sm:$0xff]  }
 0x230   :  { %3299 = vmatprep.mubr.bf16.mxu0 %v7049_v8  ;;  %v7073_v8 = vld [vmem:[%s10898_s5 + $0x1a4] ss:$16 sps:$4 sm:$0xff]  }
 0x232   :  { %3613 = vmatmul.mubr.bf16.gmra.mxu1 %v7062_v34  ;;  %v7086_v34 = vld [vmem:[%s10898_s5 + $0x208] ss:$16 sps:$4 sm:$0xff]  }
 0x233   :  { %3620 = vmatprep.mubr.bf16.mxu1 %v7070_v39  ;;  %v7094_v39 = vld [vmem:[%s10898_s5 + $0x22c] ss:$16 sps:$4 sm:$0xff]  }
 0x237   :  { %3300 = vmatmul.mubr.bf16.gmra.mxu0 %v7047_v45  ;;  %v7071_v45 = vld [vmem:[%s10898_s5 + $0x1a0] ss:$16 sps:$4 sm:$0xff]  }
 0x238   :  { %3307 = vmatprep.mubr.bf16.mxu0 %v7055_v33  ;;  %v7079_v33 = vld [vmem:[%s10898_s5 + $0x1c4] ss:$16 sps:$4 sm:$0xff]  }
 0x23a   :  { %3621 = vmatmul.mubr.bf16.gmra.mxu1 %v7068_v15  ;;  %v7092_v15 = vld [vmem:[%s10898_s5 + $0x228] ss:$16 sps:$4 sm:$0xff]  }
 0x23b   :  { %3628 = vmatprep.mubr.bf16.mxu1 %v7076_v21  ;;  %v7100_v21 = vld [vmem:[%s10898_s5 + $0x24c] ss:$16 sps:$4 sm:$0xff]  }
 0x23f   :  { %3308 = vmatmul.mubr.bf16.gmra.mxu0 %v7053_v30  ;;  %v7077_v30 = vld [vmem:[%s10898_s5 + $0x1c0] ss:$16 sps:$4 sm:$0xff]  }
 0x240   :  { %3315 = vmatprep.mubr.bf16.mxu0 %v7061_v28  ;;  %v7085_v28 = vld [vmem:[%s10898_s5 + $0x1e4] ss:$16 sps:$4 sm:$0xff]  }
 0x242   :  { %3629 = vmatmul.mubr.bf16.gmra.mxu1 %v7074_v61  ;;  %v7098_v61 = vld [vmem:[%s10898_s5 + $0x248] ss:$16 sps:$4 sm:$0xff]  }
 0x243   :  { %3636 = vmatprep.mubr.bf16.mxu1 %v7082_v53  ;;  %v7106_v53 = vld [vmem:[%s10898_s5 + $0x26c] ss:$16 sps:$4 sm:$0xff]  }
 0x247   :  { %3316 = vmatmul.mubr.bf16.gmra.mxu0 %v7059_v6  ;;  %v7083_v6 = vld [vmem:[%s10898_s5 + $0x1e0] ss:$16 sps:$4 sm:$0xff]  }
 0x248   :  { %3323 = vmatprep.mubr.bf16.mxu0 %v7067_v19  ;;  %v7091_v19 = vld [vmem:[%s10898_s5 + $0x204] ss:$16 sps:$4 sm:$0xff]  }
 0x24a   :  { %3637 = vmatmul.mubr.bf16.gmra.mxu1 %v7080_v5  ;;  %v7104_v5 = vld [vmem:[%s10898_s5 + $0x268] ss:$16 sps:$4 sm:$0xff]  }
 0x24b   :  { %3644 = vmatprep.mubr.bf16.mxu1 %v7088_v18  ;;  %v7112_v18 = vld [vmem:[%s10898_s5 + $0x28c] ss:$16 sps:$4 sm:$0xff]  }
 0x24f   :  { %3324 = vmatmul.mubr.bf16.gmra.mxu0 %v7065_v13  ;;  %v7089_v13 = vld [vmem:[%s10898_s5 + $0x200] ss:$16 sps:$4 sm:$0xff]  }
 0x250   :  { %3331 = vmatprep.mubr.bf16.mxu0 %v7073_v8  ;;  %v7097_v8 = vld [vmem:[%s10898_s5 + $0x224] ss:$16 sps:$4 sm:$0xff]  }
 0x252   :  { %3645 = vmatmul.mubr.bf16.gmra.mxu1 %v7086_v34  ;;  %v7110_v34 = vld [vmem:[%s10898_s5 + $0x288] ss:$16 sps:$4 sm:$0xff]  }
 0x253   :  { %3652 = vmatprep.mubr.bf16.mxu1 %v7094_v39  ;;  %v7118_v39 = vld [vmem:[%s10898_s5 + $0x2ac] ss:$16 sps:$4 sm:$0xff]  }
 0x257   :  { %3332 = vmatmul.mubr.bf16.gmra.mxu0 %v7071_v45  ;;  %v7095_v45 = vld [vmem:[%s10898_s5 + $0x220] ss:$16 sps:$4 sm:$0xff]  }
 0x258   :  { %3339 = vmatprep.mubr.bf16.mxu0 %v7079_v33  ;;  %v7103_v33 = vld [vmem:[%s10898_s5 + $0x244] ss:$16 sps:$4 sm:$0xff]  }
 0x25a   :  { %3653 = vmatmul.mubr.bf16.gmra.mxu1 %v7092_v15  ;;  %v7116_v15 = vld [vmem:[%s10898_s5 + $0x2a8] ss:$16 sps:$4 sm:$0xff]  }
 0x25b   :  { %3660 = vmatprep.mubr.bf16.mxu1 %v7100_v21  ;;  %v7124_v21 = vld [vmem:[%s10898_s5 + $0x2cc] ss:$16 sps:$4 sm:$0xff]  }
 0x25f   :  { %3340 = vmatmul.mubr.bf16.gmra.mxu0 %v7077_v30  ;;  %v7101_v30 = vld [vmem:[%s10898_s5 + $0x240] ss:$16 sps:$4 sm:$0xff]  }
 0x260   :  { %3347 = vmatprep.mubr.bf16.mxu0 %v7085_v28  ;;  %v7109_v28 = vld [vmem:[%s10898_s5 + $0x264] ss:$16 sps:$4 sm:$0xff]  }
 0x262   :  { %3661 = vmatmul.mubr.bf16.gmra.mxu1 %v7098_v61  ;;  %v7122_v61 = vld [vmem:[%s10898_s5 + $0x2c8] ss:$16 sps:$4 sm:$0xff]  }
 0x263   :  { %3668 = vmatprep.mubr.bf16.mxu1 %v7106_v53  ;;  %v7130_v53 = vld [vmem:[%s10898_s5 + $0x2ec] ss:$16 sps:$4 sm:$0xff]  }
 0x267   :  { %3348 = vmatmul.mubr.bf16.gmra.mxu0 %v7083_v6  ;;  %v7107_v6 = vld [vmem:[%s10898_s5 + $0x260] ss:$16 sps:$4 sm:$0xff]  }
 0x268   :  { %3355 = vmatprep.mubr.bf16.mxu0 %v7091_v19  ;;  %v7115_v19 = vld [vmem:[%s10898_s5 + $0x284] ss:$16 sps:$4 sm:$0xff]  }
 0x26a   :  { %3669 = vmatmul.mubr.bf16.gmra.mxu1 %v7104_v5  ;;  %v7128_v5 = vld [vmem:[%s10898_s5 + $0x2e8] ss:$16 sps:$4 sm:$0xff]  }
 0x26b   :  { %3676 = vmatprep.mubr.bf16.mxu1 %v7112_v18  ;;  %v7139_v18 = vld [vmem:[%s10898_s5 + $0x30c] ss:$16 sps:$4 sm:$0xff]  }
 0x26f   :  { %3356 = vmatmul.mubr.bf16.gmra.mxu0 %v7089_v13  ;;  %v7113_v13 = vld [vmem:[%s10898_s5 + $0x280] ss:$16 sps:$4 sm:$0xff]  }
 0x270   :  { %3363 = vmatprep.mubr.bf16.mxu0 %v7097_v8  ;;  %v7121_v8 = vld [vmem:[%s10898_s5 + $0x2a4] ss:$16 sps:$4 sm:$0xff]  }
 0x272   :  { %3677 = vmatmul.mubr.bf16.gmra.mxu1 %v7110_v34  ;;  %v7137_v34 = vld [vmem:[%s10898_s5 + $0x308] ss:$16 sps:$4 sm:$0xff]  }
 0x273   :  { %3684 = vmatprep.mubr.bf16.mxu1 %v7118_v39  ;;  %v7145_v39 = vld [vmem:[%s10898_s5 + $0x32c] ss:$16 sps:$4 sm:$0xff]  }
 0x277   :  { %3364 = vmatmul.mubr.bf16.gmra.mxu0 %v7095_v45 }
 0x278   :  { %3371 = vmatprep.mubr.bf16.mxu0 %v7103_v33  ;;  %v7119_v33 = vld [vmem:[%s10898_s5 + $0x2a0] ss:$16 sps:$4 sm:$0xff]  }
 0x27a   :  { %3685 = vmatmul.mubr.bf16.gmra.mxu1 %v7116_v15  ;;  %v7127_v15 = vld [vmem:[%s10898_s5 + $0x2c4] ss:$16 sps:$4 sm:$0xff]  }
 0x27b   :  { %3692 = vmatprep.mubr.bf16.mxu1 %v7124_v21 }
 0x27f   :  { %3372 = vmatmul.mubr.bf16.gmra.mxu0 %v7101_v30 }
 0x280   :  { %3379 = vmatprep.mubr.bf16.mxu0 %v7109_v28  ;;  %v7143_v28 = vld [vmem:[%s10898_s5 + $0x328] ss:$16 sps:$4 sm:$0xff]  }
 0x282   :  { %3693 = vmatmul.mubr.bf16.gmra.mxu1 %v7122_v61  ;;  %v7151_v61 = vld [vmem:[%s10898_s5 + $0x34c] ss:$16 sps:$4 sm:$0xff]  }
 0x283   :  { %3700 = vmatprep.mubr.bf16.mxu1 %v7130_v53 }
 0x287   :  { %3380 = vmatmul.mubr.bf16.gmra.mxu0 %v7107_v6 }
 0x288   :  { %3387 = vmatprep.mubr.bf16.mxu0 %v7115_v19  ;;  %v7125_v19 = vld [vmem:[%s10898_s5 + $0x2c0] ss:$16 sps:$4 sm:$0xff]  }
 0x28a   :  { %3701 = vmatmul.mubr.bf16.gmra.mxu1 %v7128_v5  ;;  %v7133_v5 = vld [vmem:[%s10898_s5 + $0x2e4] ss:$16 sps:$4 sm:$0xff]  }
 0x28b   :  { %3708 = vmatprep.mubr.bf16.mxu1 %v7139_v18 }
 0x28f   :  { %3388 = vmatmul.mubr.bf16.gmra.mxu0 %v7113_v13 }
 0x290   :  { %3395 = vmatprep.mubr.bf16.mxu0 %v7121_v8  ;;  %v7149_v8 = vld [vmem:[%s10898_s5 + $0x348] ss:$16 sps:$4 sm:$0xff]  }
 0x292   :  { %v3518_v45 = vpop.f32.mrf.mxu1  ;;  %3709 = vmatmul.mubr.bf16.gmra.mxu1 %v7137_v34  ;;  %v7157_v34 = vld [vmem:[%s10898_s5 + $0x36c] ss:$16 sps:$4 sm:$0xff]  }
 0x293   :  { %3716 = vmatprep.mubr.bf16.mxu1 %v7145_v39 }
 0x294   :  { %v3520_v21 = vpop.f32.mrf.mxu1 }
 0x295   :  { %v7136_v21 = vld [vmem:[%s10898_s5 + $0x304] ss:$16 sps:$4 sm:$0xff]  }
 0x296   :  { %v3521_v30 = vpop.f32.mrf.mxu1 }
 0x297   :  { %3396 = vmatmul.mubr.bf16.gmra.mxu0 %v7119_v33 }
 0x298   :  { %3403 = vmatprep.mubr.bf16.mxu0 %v7127_v15  ;;  %v3523_v53 = vpop.f32.mrf.mxu1  ;;  %v7131_v15 = vld [vmem:[%s10898_s5 + $0x2e0] ss:$16 sps:$4 sm:$0xff]  }
 0x299   :  { %v7155_v53 = vld [vmem:[%s10898_s5 + $0x368] ss:$16 sps:$4 sm:$0xff]  }
 0x29a   :  { %v3526_v6 = vpop.f32.mrf.mxu1  ;;  %3717 = vmatmul.mubr.bf16.gmra.mxu1 %v7143_v28 }
 0x29b   :  { %3724 = vmatprep.mubr.bf16.mxu1 %v7151_v61 }
 0x29c   :  { %v3528_v18 = vpop.f32.mrf.mxu1 }
 0x29e   :  { %v9719_v13 = vpop.f32.mrf.mxu1 }
 0x29f   :  { %3404 = vmatmul.mubr.bf16.gmra.mxu0 %v7125_v19  ;;  %v7163_v19 = vld [vmem:[%s10898_s5 + $0x38c] ss:$16 sps:$4 sm:$0xff]  }
 0x2a0   :  { %3411 = vmatprep.mubr.bf16.mxu0 %v7133_v5  ;;  %v3531_v39 = vpop.f32.mrf.mxu1 }
 0x2a2   :  { %v9727_v33 = vpop.f32.mrf.mxu1  ;;  %3725 = vmatmul.mubr.bf16.gmra.mxu1 %v7149_v8  ;;  %v7134_v8 = vld [vmem:[%s10898_s5 + $0x300] ss:$16 sps:$4 sm:$0xff]  }
 0x2a3   :  { %3732 = vmatprep.mubr.bf16.mxu1 %v7157_v34  ;;  %v7142_v34 = vld [vmem:[%s10898_s5 + $0x324] ss:$16 sps:$4 sm:$0xff]  }
 0x2a4   :  { %v3536_v28 = vpop.f32.mrf.mxu1 }
 0x2a6   :  { %v9735_v61 = vpop.f32.mrf.mxu1 }
 0x2a7   :  { %3412 = vmatmul.mubr.bf16.gmra.mxu0 %v7131_v15 }
 0x2a8   :  { %3419 = vmatprep.mubr.bf16.mxu0 %v7136_v21  ;;  %v3539_v5 = vpop.f32.mrf.mxu1  ;;  %v7161_v21 = vld [vmem:[%s10898_s5 + $0x388] ss:$16 sps:$4 sm:$0xff]  }
 0x2a9   :  { %v11104_v5 = vld [vmem:[#allocation39_spill] sm:$0xff] }
 0x2aa   :  { %v9743_v18 = vpop.f32.mrf.mxu1  ;;  %3733 = vmatmul.mubr.bf16.gmra.mxu1 %v7155_v53  ;;  %v7169_v53 = vld [vmem:[%s10898_s5 + $0x3ac] ss:$16 sps:$4 sm:$0xff]  }
 0x2ab   :  { %3740 = vmatprep.mubr.bf16.mxu1 %v7163_v19 }
 0x2ac   :  { %v3544_v39 = vpop.f32.mrf.mxu1 }
 0x2ae   :  { %v9751_v15 = vpop.f32.mrf.mxu1 }
 0x2af   :  { %v3229_v28 = vpop.f32.mrf.mxu0  ;;  %3420 = vmatmul.mubr.bf16.gmra.mxu0 %v7134_v8  ;;  %v11105_v8 = vld [vmem:[#allocation38_spill] sm:$0xff] }
 0x2b0   :  { %v3230_v49 = vadd.f32 %v3229_v28, %v11104_v5  ;;  %3427 = vmatprep.mubr.bf16.mxu0 %v7142_v34  ;;  %v3547_v19 = vpop.f32.mrf.mxu1 }
 0x2b1   :  { %v3231_v11 = vpop.f32.mrf.mxu0 }
 0x2b2   :  { %v3519_v23 = vadd.f32 %v3518_v45, %v3230_v49  ;;  %v9760_v57 = vpop.f32.mrf.mxu1  ;;  %3741 = vmatmul.mubr.bf16.gmra.mxu1 %v7161_v21  ;;  %v7167_v49 = vld [vmem:[%s10898_s5 + $0x3a8] ss:$16 sps:$4 sm:$0xff]   ;;  %v7175_v21 = vld [vmem:[%s10898_s5 + $0x3cc] ss:$16 sps:$4 sm:$0xff]  }
 0x2b3   :  { %v3232_v39 = vpop.f32.mrf.mxu0  ;;  %3748 = vmatprep.mubr.bf16.mxu1 %v7169_v53 }
 0x2b4   :  { %v3233_v20 = vadd.f32 %v3232_v39, %v11105_v8  ;;  %v3552_v28 = vpop.f32.mrf.mxu1  ;;  %v3773_v53 = vmax.f32 %v3519_v23, 0.0  ;;  %v11106_v39 = vld [vmem:[#allocation43_spill] sm:$0xff] }
 0x2b5   :  { %v3234_v34 = vpop.f32.mrf.mxu0 }
 0x2b6   :  { %v3522_v5 = vadd.f32 %v3521_v30, %v3233_v20  ;;  %v9769_v11 = vpop.f32.mrf.mxu1 }
 0x2b7   :  { %v3237_v45 = vpop.f32.mrf.mxu0  ;;  %3428 = vmatmul.mubr.bf16.gmra.mxu0 %v7140_v25  ;;  %v7146_v25 = vld [vmem:[%s10898_s5 + $0x340] ss:$16 sps:$4 sm:$0xff]  }
 0x2b8   :  { %v3774_v19 = vmax.f32 %v3522_v5, 0.0  ;;  %v3238_v8 = vadd.f32 %v3237_v45, %v11106_v39  ;;  %3435 = vmatprep.mubr.bf16.mxu0 %v7148_v63  ;;  %v3555_v28 = vpop.f32.mrf.mxu1  ;;  %v7154_v63 = vld [vmem:[%s10898_s5 + $0x364] ss:$16 sps:$4 sm:$0xff]   ;;  %v11108_v39 = vld [vmem:[#allocation47_spill] sm:$0xff] }
 0x2b9   :  { %v3239_v34 = vpop.f32.mrf.mxu0 }
 0x2ba   :  { %v9778_v20 = vpack.c.bf16 %v3774_v19, %v3773_v53  ;;  %v3527_v30 = vadd.f32 %v3526_v6, %v3238_v8  ;;  %v9780_v3 = vpop.f32.mrf.mxu1  ;;  %3749 = vmatmul.mubr.bf16.gmra.mxu1 %v7167_v49  ;;  %v7173_v49 = vld [vmem:[%s10898_s5 + $0x3c8] ss:$16 sps:$4 sm:$0xff]  }
 0x2bb   :  { %v3240_v38 = vpop.f32.mrf.mxu0  ;;  %3756 = vmatprep.mubr.bf16.mxu1 %v7175_v21 }
 0x2bc   :  { %v3241_v23 = vadd.f32 %v3240_v38, %v11107_v16  ;;  %v3560_v5 = vpop.f32.mrf.mxu1  ;;  %v7181_v16 = vld [vmem:[%s10898_s5 + $0x3ec] ss:$16 sps:$4 sm:$0xff]   ;;  %v3775_v38 = vmax.f32 %v3527_v30, 0.0  ;;  %v11109_v30 = vld [vmem:[#allocation46_spill] sm:$0xff] }
 0x2bd   :  { %v3242_v45 = vpop.f32.mrf.mxu0 }
 0x2be   :  { %v3530_v53 = vadd.f32 %v9719_v13, %v3241_v23  ;;  %v9790_v6 = vpop.f32.mrf.mxu1 }
 0x2bf   :  { %v3245_v19 = vpop.f32.mrf.mxu0  ;;  %3436 = vmatmul.mubr.bf16.gmra.mxu0 %v7146_v25  ;;  %v7152_v25 = vld [vmem:[%s10898_s5 + $0x360] ss:$16 sps:$4 sm:$0xff]  }
 0x2c0   :  { %v3776_v21 = vmax.f32 %v3530_v53, 0.0  ;;  %v3246_v8 = vadd.f32 %v3245_v19, %v11108_v39  ;;  %3443 = vmatprep.mubr.bf16.mxu0 %v7154_v63  ;;  %v3563_v28 = vpop.f32.mrf.mxu1  ;;  %v7160_v63 = vld [vmem:[%s10898_s5 + $0x384] ss:$16 sps:$4 sm:$0xff]  }
 0x2c1   :  { %v3247_v34 = vpop.f32.mrf.mxu0  ;;  %v11110_v28 = vld [vmem:[#allocation50_spill] sm:$0xff] }
 0x2c2   :  { %v9799_v13 = vpack.c.bf16 %v3776_v21, %v3775_v38  ;;  %v3535_v23 = vadd.f32 %v9727_v33, %v3246_v8  ;;  %v9802_v5 = vpop.f32.mrf.mxu1  ;;  %3757 = vmatmul.mubr.bf16.gmra.mxu1 %v7173_v49  ;;  %v7179_v49 = vld [vmem:[%s10898_s5 + $0x3e8] ss:$16 sps:$4 sm:$0xff]  }
 0x2c3   :  { %v3248_v45 = vpop.f32.mrf.mxu0  ;;  %3764 = vmatprep.mubr.bf16.mxu1 %v7181_v16 }
 0x2c4   :  { %v3249_v53 = vadd.f32 %v3248_v45, %v11109_v30  ;;  %v3568_v19 = vpop.f32.mrf.mxu1  ;;  %v3777_v8 = vmax.f32 %v3535_v23, 0.0 }
 0x2c5   :  { %v3250_v38 = vpop.f32.mrf.mxu0 }
 0x2c6   :  { %v3538_v21 = vadd.f32 %v9735_v61, %v3249_v53  ;;  %v9812_v33 = vpop.f32.mrf.mxu1  ;;  %v7158_v53 = vld [vmem:[%s10898_s5 + $0x380] ss:$16 sps:$4 sm:$0xff]  }
 0x2c7   :  { %v3253_v39 = vpop.f32.mrf.mxu0  ;;  %3444 = vmatmul.mubr.bf16.gmra.mxu0 %v7152_v25  ;;  %v11111_v25 = vld [vmem:[#allocation49_spill] sm:$0xff] }
 0x2c8   :  { %v3778_v16 = vmax.f32 %v3538_v21, 0.0  ;;  %v3254_v34 = vadd.f32 %v3253_v39, %v11110_v28  ;;  %3451 = vmatprep.mubr.bf16.mxu0 %v7160_v63  ;;  %v3571_v45 = vpop.f32.mrf.mxu1  ;;  %v7166_v63 = vld [vmem:[%s10898_s5 + $0x3a4] ss:$16 sps:$4 sm:$0xff]  }
 0x2c9   :  { %v3255_v30 = vpop.f32.mrf.mxu0 }
 0x2ca   :  { %v9818_v1 = vpack.c.bf16 %v3778_v16, %v3777_v8  ;;  %v9820_v19 = vpop.f32.mrf.mxu1  ;;  %3765 = vmatmul.mubr.bf16.gmra.mxu1 %v7179_v49  ;;  %v3543_v38 = vadd.f32 %v9743_v18, %v3254_v34  ;;  %v11112_v30 = vld [vmem:[#allocation53_spill] sm:$0xff] }
 0x2cb   :  { %v3256_v61 = vpop.f32.mrf.mxu0 }
 0x2cc   :  { %v3257_v23 = vadd.f32 %v3256_v61, %v11111_v25  ;;  %v3576_v21 = vpop.f32.mrf.mxu1  ;;  %v3779_v28 = vmax.f32 %v3543_v38, 0.0  ;;  %v7172_v38 = vld [vmem:[%s10898_s5 + $0x3c4] ss:$16 sps:$4 sm:$0xff]  }
 0x2cd   :  { %v3258_v39 = vpop.f32.mrf.mxu0  ;;  %v11113_v21 = vld [vmem:[#allocation52_spill] sm:$0xff] }
 0x2ce   :  { %v3546_v8 = vadd.f32 %v9751_v15, %v3257_v23  ;;  %v9831_v16 = vpop.f32.mrf.mxu1  ;;  %v7164_v15 = vld [vmem:[%s10898_s5 + $0x3a0] ss:$16 sps:$4 sm:$0xff]  }
 0x2cf   :  { %v3261_v49 = vpop.f32.mrf.mxu0  ;;  %3452 = vmatmul.mubr.bf16.gmra.mxu0 %v7158_v53 }
 0x2d0   :  { %v3780_v45 = vmax.f32 %v3546_v8, 0.0  ;;  %v3262_v14 = vadd.f32 %v3261_v49, %v11112_v30  ;;  %3459 = vmatprep.mubr.bf16.mxu0 %v7166_v63  ;;  %v3579_v18 = vpop.f32.mrf.mxu1 }
 0x2d1   :  { %v3263_v34 = vpop.f32.mrf.mxu0 }
 0x2d2   :  { %v9834_v61 = vpack.c.bf16 %v3780_v45, %v3779_v28  ;;  %v9836_v25 = vpop.f32.mrf.mxu1  ;;  %v3551_v23 = vadd.f32 %v9760_v57, %v3262_v14 }
 0x2d3   :  { %v3264_v48 = vpop.f32.mrf.mxu0 }
 0x2d4   :  { %v3265_v53 = vadd.f32 %v3264_v48, %v11113_v21  ;;  %v3584_v63 = vpop.f32.mrf.mxu1  ;;  %v3781_v45 = vmax.f32 %v3551_v23, 0.0  ;;  %v7170_v21 = vld [vmem:[%s10898_s5 + $0x3c0] ss:$16 sps:$4 sm:$0xff]  }
 0x2d5   :  { %v3266_v39 = vpop.f32.mrf.mxu0 }
 0x2d6   :  { %v3554_v8 = vadd.f32 %v9769_v11, %v3265_v53  ;;  %v9847_v49 = vpop.f32.mrf.mxu1  ;;  %v7178_v11 = vld [vmem:[%s10898_s5 + $0x3e4] ss:$16 sps:$4 sm:$0xff]  }
 0x2d7   :  { %v3269_v28 = vpop.f32.mrf.mxu0  ;;  %3460 = vmatmul.mubr.bf16.gmra.mxu0 %v7164_v15 }
 0x2d8   :  { %v3782_v30 = vmax.f32 %v3554_v8, 0.0  ;;  %3467 = vmatprep.mubr.bf16.mxu0 %v7172_v38  ;;  %v3587_v18 = vpop.f32.mrf.mxu1 }
 0x2d9   :  { %v3271_v34 = vpop.f32.mrf.mxu0 }
 0x2da   :  { %v9849_v14 = vpack.c.bf16 %v3782_v30, %v3781_v45  ;;  %v9851_v48 = vpop.f32.mrf.mxu1  ;;  %v7176_v30 = vld [vmem:[%s10898_s5 + $0x3e0] ss:$16 sps:$4 sm:$0xff]   ;;  %v7184_v34 = vld [vmem:[%s10900_s7 + $0x4] ss:$16 sps:$4 sm:$0xff]  }
 0x2db   :  { %v3272_v57 = vpop.f32.mrf.mxu0 }
 0x2dc   :  { %v3592_v53 = vpop.f32.mrf.mxu1 }
 0x2dd   :  { %v3274_v15 = vpop.f32.mrf.mxu0 }
 0x2de   :  { %v9859_v23 = vpop.f32.mrf.mxu1 }
 0x2df   :  { %v3277_v38 = vpop.f32.mrf.mxu0  ;;  %3468 = vmatmul.mubr.bf16.gmra.mxu0 %v7170_v21  ;;  %v11114_v21 = vld [vmem:[#allocation61_spill] sm:$0xff] }
 0x2e0   :  { %3475 = vmatprep.mubr.bf16.mxu0 %v7178_v11  ;;  %v3595_v63 = vpop.f32.mrf.mxu1 }
 0x2e1   :  { %v3279_v39 = vpop.f32.mrf.mxu0 }
 0x2e2   :  { %v9861_v8 = vpop.f32.mrf.mxu1 }
 0x2e3   :  { %v3280_v45 = vpop.f32.mrf.mxu0 }
 0x2e4   :  { %v3600_v18 = vpop.f32.mrf.mxu1  ;;  %v3281_v26 = vadd.f32 %v3280_v45, %v11115_v41  ;;  %v11119_v41 = vld [vmem:[#allocation56_spill] sm:$0xff] }
 0x2e5   :  { %v3282_v53 = vpop.f32.mrf.mxu0  ;;  %v11116_v18 = vld [vmem:[#allocation59_spill] sm:$0xff]  ;;  %v3270_v45 = vadd.f32 %v3269_v28, %v11119_v41 }
 0x2e6   :  { %v9869_v15 = vpop.f32.mrf.mxu1  ;;  %v3278_v2 = vadd.f32 %v3277_v38, %v11116_v18 }
 0x2e7   :  { %v3285_v12 = vpop.f32.mrf.mxu0  ;;  %3476 = vmatmul.mubr.bf16.gmra.mxu0 %v7176_v30  ;;  %v3273_v30 = vadd.f32 %v3272_v57, %v11118_v42  ;;  %v3559_v28 = vadd.f32 %v9780_v3, %v3270_v45 }
 0x2e8   :  { %v3286_v11 = vadd.f32 %v3285_v12, %v11114_v21  ;;  %v3603_v63 = vpop.f32.mrf.mxu1  ;;  %5053 = vmatprep.mubr.bf16.mxu0 %v7184_v34  ;;  %v3570_v12 = vadd.f32 %v9812_v33, %v3281_v26 }
 0x2e9   :  { %v3287_v39 = vpop.f32.mrf.mxu0 }
 0x2ea   :  { %v9873_v0 = vpop.f32.mrf.mxu1  ;;  %v3575_v10 = vadd.f32 %v9820_v19, %v3286_v11  ;;  %v3567_v39 = vadd.f32 %v9802_v5, %v3278_v2  ;;  %v11120_v19 = vld [vmem:[#allocation65_spill] sm:$0xff]  ;;  %v3786_v42 = vmax.f32 %v3570_v12, 0.0  ;;  %v3783_v12 = vmax.f32 %v3559_v28, 0.0 }
 0x2eb   :  { %v3288_v60 = vpop.f32.mrf.mxu0 }
 0x2ec   :  { %v3289_v53 = vadd.f32 %v3288_v60, %v11117_v55  ;;  %v3608_v36 = vpop.f32.mrf.mxu1  ;;  %v3787_v38 = vmax.f32 %v3575_v10, 0.0  ;;  %v3785_v57 = vmax.f32 %v3567_v39, 0.0 }
 0x2ed   :  { %v3290_v22 = vpop.f32.mrf.mxu0 }
 0x2ee   :  { %v3578_v34 = vadd.f32 %v9831_v16, %v3289_v53  ;;  %v9881_v21 = vpop.f32.mrf.mxu1  ;;  %v3562_v22 = vadd.f32 %v9790_v6, %v3273_v30  ;;  %v11121_v53 = vld [vmem:[#allocation64_spill] sm:$0xff]  ;;  %v3971_v41 = vpack.c.bf16 %v3786_v42, %v3785_v57 }
 0x2ef   :  { %v3293_v63 = vpop.f32.mrf.mxu0 }
 0x2f0   :  { %v3788_v18 = vmax.f32 %v3578_v34, 0.0  ;;  %v3294_v11 = vadd.f32 %v3293_v63, %v11120_v19  ;;  %v3611_v55 = vpop.f32.mrf.mxu1  ;;  %v3784_v34 = vmax.f32 %v3562_v22, 0.0  ;;  %v11123_v22 = vld [vmem:[#allocation66_spill] sm:$0xff] }
 0x2f1   :  { %v3295_v36 = vpop.f32.mrf.mxu0 }
 0x2f2   :  { %v3972_v60 = vpack.c.bf16 %v3788_v18, %v3787_v38  ;;  %v3583_v26 = vadd.f32 %v9836_v25, %v3294_v11  ;;  %v9888_v33 = vpop.f32.mrf.mxu1  ;;  %v11122_v18 = vld [vmem:[#allocation67_spill] sm:$0xff]  ;;  %v3970_v19 = vpack.c.bf16 %v3784_v34, %v3783_v12  ;;  %v11125_v12 = vld [vmem:[#allocation70_spill] sm:$0xff] }
 0x2f3   :  { %v3296_v16 = vpop.f32.mrf.mxu0 }
 0x2f4   :  { %v3297_v2 = vadd.f32 %v3296_v16, %v11121_v53  ;;  %5022 = vmatpush1.bf16.msra.mxu0 %v3972_v60  ;;  %v3616_v10 = vpop.f32.mrf.mxu1  ;;  %v3789_v63 = vmax.f32 %v3583_v26, 0.0 }
 0x2f5   :  { %v3298_v5 = vpop.f32.mrf.mxu0  ;;  %5023 = vmatprep.subr.bf16.mxu0 %v11019_v62  ;;  %v11124_v10 = vld [vmem:[#allocation71_spill] sm:$0xff] }
 0x2f6   :  { %v3586_v6 = vadd.f32 %v9847_v49, %v3297_v2  ;;  %v9894_v30 = vpop.f32.mrf.mxu1 }
 0x2f7   :  { %v3301_v25 = vpop.f32.mrf.mxu0 }
 0x2f8   :  { %v3790_v38 = vmax.f32 %v3586_v6, 0.0  ;;  %v3302_v3 = vadd.f32 %v3301_v25, %v11122_v18  ;;  %5024 = vmatpush1.bf16.msra.mxu0 %v3971_v41  ;;  %v3619_v45 = vpop.f32.mrf.mxu1 }
 0x2f9   :  { %v3303_v39 = vpop.f32.mrf.mxu0  ;;  %5025 = vmatprep.subr.bf16.mxu0 %v11019_v62 }
 0x2fa   :  { %v9898_v11 = vpack.c.bf16 %v3790_v38, %v3789_v63  ;;  %v3591_v55 = vadd.f32 %v9851_v48, %v3302_v3  ;;  %v9901_v36 = vpop.f32.mrf.mxu1 }
 0x2fb   :  { %v3304_v49 = vpop.f32.mrf.mxu0 }
 0x2fc   :  { %v3305_v42 = vadd.f32 %v3304_v49, %v11123_v22  ;;  %5026 = vmatpush1.bf16.msra.mxu0 %v3970_v19  ;;  %v3624_v60 = vpop.f32.mrf.mxu1  ;;  %v3791_v53 = vmax.f32 %v3591_v55, 0.0  ;;  %v11126_v55 = vld [vmem:[#allocation72_spill] sm:$0xff] }
 0x2fd   :  { %v3306_v26 = vpop.f32.mrf.mxu0  ;;  %5027 = vmatprep.subr.bf16.mxu0 %v11019_v62 }
 0x2fe   :  { %v3594_v16 = vadd.f32 %v9859_v23, %v3305_v42  ;;  %v9906_v28 = vpop.f32.mrf.mxu1 }
 0x2ff   :  { %v3309_v57 = vpop.f32.mrf.mxu0 }
 0x300   :  { %v3792_v2 = vmax.f32 %v3594_v16, 0.0  ;;  %v3310_v5 = vadd.f32 %v3309_v57, %v11124_v10  ;;  %5028 = vmatpush1.bf16.msra.mxu0 %v9849_v14  ;;  %v3627_v48 = vpop.f32.mrf.mxu1 }
 0x301   :  { %v3311_v34 = vpop.f32.mrf.mxu0  ;;  %5029 = vmatprep.subr.bf16.mxu0 %v11019_v62 }
 0x302   :  { %v9911_v41 = vpack.c.bf16 %v3792_v2, %v3791_v53  ;;  %v3599_v6 = vadd.f32 %v9861_v8, %v3310_v5  ;;  %v9914_v25 = vpop.f32.mrf.mxu1  ;;  %v11128_v34 = vld [vmem:[#allocation76_spill] sm:$0xff] }
 0x303   :  { %v3312_v23 = vpop.f32.mrf.mxu0 }
 0x304   :  { %v3313_v63 = vadd.f32 %v3312_v23, %v11125_v12  ;;  %5030 = vmatpush1.bf16.msra.mxu0 %v9834_v61  ;;  %v3632_v38 = vpop.f32.mrf.mxu1  ;;  %v3793_v39 = vmax.f32 %v3599_v6, 0.0 }
 0x305   :  { %v3314_v18 = vpop.f32.mrf.mxu0  ;;  %5031 = vmatprep.subr.bf16.mxu0 %v11019_v62 }
 0x306   :  { %v3602_v14 = vadd.f32 %v9869_v15, %v3313_v63  ;;  %v9920_v3 = vpop.f32.mrf.mxu1  ;;  %v11127_v15 = vld [vmem:[#allocation73_spill] sm:$0xff] }
 0x307   :  { %v3317_v45 = vpop.f32.mrf.mxu0  ;;  %v11129_v18 = vld [vmem:[#allocation77_spill] sm:$0xff] }
 0x308   :  { %v3794_v19 = vmax.f32 %v3602_v14, 0.0  ;;  %v3318_v8 = vadd.f32 %v3317_v45, %v11126_v55  ;;  %5032 = vmatpush1.bf16.msra.mxu0 %v9818_v1  ;;  %v3635_v49 = vpop.f32.mrf.mxu1 }
 0x309   :  { %v3319_v22 = vpop.f32.mrf.mxu0  ;;  %5033 = vmatprep.subr.bf16.mxu0 %v11019_v62 }
 0x30a   :  { %v9925_v61 = vpack.c.bf16 %v3794_v19, %v3793_v39  ;;  %v3638_v42 = vpop.f32.mrf.mxu1  ;;  %v3607_v26 = vadd.f32 %v9873_v0, %v3318_v8 }
 0x30b   :  { %v3320_v60 = vpop.f32.mrf.mxu0 }
 0x30c   :  { %v3321_v16 = vadd.f32 %v3320_v60, %v11127_v15  ;;  %5034 = vmatpush1.bf16.msra.mxu0 %v9799_v13  ;;  %v3640_v57 = vpop.f32.mrf.mxu1  ;;  %v3795_v5 = vmax.f32 %v3607_v26, 0.0 }
 0x30d   :  { %v3322_v53 = vpop.f32.mrf.mxu0  ;;  %5035 = vmatprep.subr.bf16.mxu0 %v11019_v62 }
 0x30e   :  { %v3610_v1 = vadd.f32 %v9881_v21, %v3321_v16  ;;  %v3641_v2 = vpop.f32.mrf.mxu1 }
 0x30f   :  { %v3325_v10 = vpop.f32.mrf.mxu0 }
 0x310   :  { %v3796_v48 = vmax.f32 %v3610_v1, 0.0  ;;  %v3326_v6 = vadd.f32 %v3325_v10, %v11128_v34  ;;  %5036 = vmatpush1.bf16.msra.mxu0 %v9778_v20  ;;  %v3643_v23 = vpop.f32.mrf.mxu1 }
 0x311   :  { %v3327_v0 = vpop.f32.mrf.mxu0  ;;  %5037 = vmatprep.subr.bf16.mxu0 %v11019_v62 }
 0x312   :  { %v9935_v12 = vpack.c.bf16 %v3796_v48, %v3795_v5  ;;  %v3646_v13 = vpop.f32.mrf.mxu1  ;;  %v3615_v38 = vadd.f32 %v9888_v33, %v3326_v6  ;;  %v11130_v0 = vld [vmem:[#allocation82_spill] sm:$0xff] }
 0x313   :  { %v3328_v63 = vpop.f32.mrf.mxu0 }
 0x314   :  { %v3329_v21 = vadd.f32 %v3328_v63, %v11129_v18  ;;  %v3648_v14 = vpop.f32.mrf.mxu1  ;;  %v3797_v8 = vmax.f32 %v3615_v38, 0.0 }
 0x315   :  { %v3330_v45 = vpop.f32.mrf.mxu0 }
 0x316   :  { %v3618_v39 = vadd.f32 %v9894_v30, %v3329_v21  ;;  %v3649_v19 = vpop.f32.mrf.mxu1  ;;  %v11131_v21 = vld [vmem:[#allocation81_spill] sm:$0xff] }
 0x317   :  { %v3333_v55 = vpop.f32.mrf.mxu0 }
 0x318   :  { %v3798_v20 = vmax.f32 %v3618_v39, 0.0  ;;  %v3651_v49 = vpop.f32.mrf.mxu1 }
 0x319   :  { %v3335_v22 = vpop.f32.mrf.mxu0 }
 0x31a   :  { %v9940_v60 = vpack.c.bf16 %v3798_v20, %v3797_v8  ;;  %v9942_v26 = vpop.f32.mrf.mxu1  ;;  %v11132_v8 = vld [vmem:[#allocation80_spill] sm:$0xff]  ;;  %v11133_v22 = vld [vmem:[#allocation83_spill] sm:$0xff] }
 0x31b   :  { %v3336_v15 = vpop.f32.mrf.mxu0 }
 0x31c   :  { %v3656_v16 = vpop.f32.mrf.mxu1 }
 0x31d   :  { %v3338_v57 = vpop.f32.mrf.mxu0 }
 0x31e   :  { %v9944_v33 = vpop.f32.mrf.mxu1 }
 0x31f   :  { %v3341_v53 = vpop.f32.mrf.mxu0 }
 0x320   :  { %v3659_v1 = vpop.f32.mrf.mxu1  ;;  %v3342_v20 = vadd.f32 %v3341_v53, %v11132_v8  ;;  %v11136_v53 = vld [vmem:[#allocation84_spill] sm:$0xff] }
 0x321   :  { %v3343_v10 = vpop.f32.mrf.mxu0 }
 0x322   :  { %v9946_v5 = vpop.f32.mrf.mxu1  ;;  %v11134_v10 = vld [vmem:[#allocation79_spill] sm:$0xff] }
 0x323   :  { %v3344_v30 = vpop.f32.mrf.mxu0 }
 0x324   :  { %v3664_v48 = vpop.f32.mrf.mxu1  ;;  %v3345_v14 = vadd.f32 %v3344_v30, %v11131_v21 }
 0x325   :  { %v3346_v34 = vpop.f32.mrf.mxu0  ;;  %v3337_v48 = vadd.f32 %v3336_v15, %v11134_v10 }
 0x326   :  { %v9948_v6 = vpop.f32.mrf.mxu1  ;;  %v3634_v34 = vadd.f32 %v9920_v3, %v3345_v14 }
 0x327   :  { %v3349_v23 = vpop.f32.mrf.mxu0  ;;  %v3626_v8 = vadd.f32 %v9906_v28, %v3337_v48 }
 0x328   :  { %v3350_v63 = vadd.f32 %v3349_v23, %v11130_v0  ;;  %v3667_v38 = vpop.f32.mrf.mxu1  ;;  %v11135_v0 = vld [vmem:[#allocation78_spill] sm:$0xff] }
 0x329   :  { %v3351_v18 = vpop.f32.mrf.mxu0  ;;  %v3334_v38 = vadd.f32 %v3333_v55, %v11135_v0  ;;  %v11138_v0 = vld [vmem:[#allocation86_spill] sm:$0xff] }
 0x32a   :  { %v9952_v45 = vpop.f32.mrf.mxu1  ;;  %v3639_v49 = vadd.f32 %v3638_v42, %v3350_v63  ;;  %v3631_v18 = vadd.f32 %v9914_v25, %v3342_v20  ;;  %v3800_v20 = vmax.f32 %v3626_v8, 0.0 }
 0x32b   :  { %v3352_v39 = vpop.f32.mrf.mxu0  ;;  %v3623_v14 = vadd.f32 %v9901_v36, %v3334_v38 }
 0x32c   :  { %v3353_v16 = vadd.f32 %v3352_v39, %v11133_v22  ;;  %v3672_v57 = vpop.f32.mrf.mxu1  ;;  %v3803_v21 = vmax.f32 %v3639_v49, 0.0  ;;  %v3802_v22 = vmax.f32 %v3634_v34, 0.0  ;;  %v3801_v55 = vmax.f32 %v3631_v18, 0.0 }
 0x32d   :  { %v3354_v1 = vpop.f32.mrf.mxu0 }
 0x32e   :  { %v3642_v52 = vadd.f32 %v3641_v2, %v3353_v16  ;;  %v9958_v23 = vpop.f32.mrf.mxu1  ;;  %v11137_v16 = vld [vmem:[#allocation85_spill] sm:$0xff]  ;;  %v3979_v49 = vpack.c.bf16 %v3802_v22, %v3801_v55 }
 0x32f   :  { %v3357_v30 = vpop.f32.mrf.mxu0 }
 0x330   :  { %v3804_v50 = vmax.f32 %v3642_v52, 0.0  ;;  %v3358_v42 = vadd.f32 %v3357_v30, %v11136_v53  ;;  %v3675_v63 = vpop.f32.mrf.mxu1 }
 0x331   :  { %v3359_v39 = vpop.f32.mrf.mxu0  ;;  %v11139_v63 = vld [vmem:[#allocation87_spill] sm:$0xff] }
 0x332   :  { %v3980_v15 = vpack.c.bf16 %v3804_v50, %v3803_v21  ;;  %v3647_v57 = vadd.f32 %v3646_v13, %v3358_v42  ;;  %v9964_v3 = vpop.f32.mrf.mxu1  ;;  %v3799_v13 = vmax.f32 %v3623_v14, 0.0 }
 0x333   :  { %v3360_v2 = vpop.f32.mrf.mxu0 }
 0x334   :  { %v3361_v1 = vadd.f32 %v3360_v2, %v11137_v16  ;;  %5038 = vmatpush2.bf16.msra.mxu0 %v3980_v15  ;;  %v3680_v25 = vpop.f32.mrf.mxu1  ;;  %v3805_v48 = vmax.f32 %v3647_v57, 0.0  ;;  %v3978_v18 = vpack.c.bf16 %v3800_v20, %v3799_v13  ;;  %v11140_v16 = vld [vmem:[#allocation88_spill] sm:$0xff] }
 0x335   :  { %v3362_v52 = vpop.f32.mrf.mxu0  ;;  %5039 = vmatprep.subr.bf16.mxu0 %v11019_v62 }
 0x336   :  { %v3650_v10 = vadd.f32 %v3649_v19, %v3361_v1  ;;  %v9969_v28 = vpop.f32.mrf.mxu1 }
 0x337   :  { %v3365_v50 = vpop.f32.mrf.mxu0 }
 0x338   :  { %v3806_v34 = vmax.f32 %v3650_v10, 0.0  ;;  %v3366_v30 = vadd.f32 %v3365_v50, %v11138_v0  ;;  %5040 = vmatpush2.bf16.msra.mxu0 %v3979_v49  ;;  %v3683_v36 = vpop.f32.mrf.mxu1  ;;  %v11141_v10 = vld [vmem:[#allocation89_spill] sm:$0xff] }
 0x339   :  { %v3367_v38 = vpop.f32.mrf.mxu0  ;;  %5041 = vmatprep.subr.bf16.mxu0 %v11019_v62 }
 0x33a   :  { %v9973_v21 = vpack.c.bf16 %v3806_v34, %v3805_v48  ;;  %v3655_v53 = vadd.f32 %v9942_v26, %v3366_v30  ;;  %v9976_v42 = vpop.f32.mrf.mxu1  ;;  %v11142_v38 = vld [vmem:[#allocation92_spill] sm:$0xff] }
 0x33b   :  { %v3368_v19 = vpop.f32.mrf.mxu0 }
 0x33c   :  { %v3369_v39 = vadd.f32 %v3368_v19, %v11139_v63  ;;  %5042 = vmatpush2.bf16.msra.mxu0 %v3978_v18  ;;  %v3688_v8 = vpop.f32.mrf.mxu1  ;;  %v3807_v14 = vmax.f32 %v3655_v53, 0.0 }
 0x33d   :  { %v3370_v22 = vpop.f32.mrf.mxu0  ;;  %5043 = vmatprep.subr.bf16.mxu0 %v11019_v62 }
 0x33e   :  { %v3658_v15 = vadd.f32 %v9944_v33, %v3369_v39  ;;  %v9981_v57 = vpop.f32.mrf.mxu1  ;;  %v11143_v39 = vld [vmem:[#allocation94_spill] sm:$0xff] }
 0x33f   :  { %v3373_v2 = vpop.f32.mrf.mxu0 }
 0x340   :  { %v3808_v55 = vmax.f32 %v3658_v15, 0.0  ;;  %v3374_v1 = vadd.f32 %v3373_v2, %v11140_v16  ;;  %5044 = vmatpush2.bf16.msra.mxu0 %v9940_v60  ;;  %v3691_v26 = vpop.f32.mrf.mxu1 }
 0x341   :  { %v3375_v25 = vpop.f32.mrf.mxu0  ;;  %5045 = vmatprep.subr.bf16.mxu0 %v11019_v62 }
 0x342   :  { %v9986_v52 = vpack.c.bf16 %v3808_v55, %v3807_v14  ;;  %v3663_v20 = vadd.f32 %v9946_v5, %v3374_v1  ;;  %v9989_v49 = vpop.f32.mrf.mxu1  ;;  %v7182_v55 = vld [vmem:[%s10900_s7] ss:$16 sps:$4 sm:$0xff]  }
 0x343   :  { %v3376_v33 = vpop.f32.mrf.mxu0 }
 0x344   :  { %v3377_v50 = vadd.f32 %v3376_v33, %v11141_v10  ;;  %5046 = vmatpush2.bf16.msra.mxu0 %v9935_v12  ;;  %v3696_v13 = vpop.f32.mrf.mxu1  ;;  %v3809_v30 = vmax.f32 %v3663_v20, 0.0 }
 0x345   :  { %v3378_v48 = vpop.f32.mrf.mxu0  ;;  %5047 = vmatprep.subr.bf16.mxu0 %v11019_v62 }
 0x346   :  { %v3666_v60 = vadd.f32 %v9948_v6, %v3377_v50  ;;  %v9995_v34 = vpop.f32.mrf.mxu1 }
 0x347   :  { %v3381_v0 = vpop.f32.mrf.mxu0 }
 0x348   :  { %v3810_v36 = vmax.f32 %v3666_v60, 0.0  ;;  %v3382_v5 = vadd.f32 %v3381_v0, %v11142_v38  ;;  %5048 = vmatpush2.bf16.msra.mxu0 %v9925_v61  ;;  %v3699_v18 = vpop.f32.mrf.mxu1 }
 0x349   :  { %v3383_v53 = vpop.f32.mrf.mxu0  ;;  %5049 = vmatprep.subr.bf16.mxu0 %v11019_v62 }
 0x34a   :  { %v10000_v12 = vpack.c.bf16 %v3810_v36, %v3809_v30  ;;  %v10002_v19 = vpop.f32.mrf.mxu1  ;;  %v3671_v6 = vadd.f32 %v9952_v45, %v3382_v5  ;;  %v11144_v45 = vld [vmem:[#allocation97_spill] sm:$0xff] }
 0x34b   :  { %v3384_v63 = vpop.f32.mrf.mxu0  ;;  %v7185_v5 = vld [vmem:[%s10900_s7 + $0x20] ss:$16 sps:$4 sm:$0xff]  }
 0x34c   :  { %v3385_v8 = vadd.f32 %v3384_v63, %v11143_v39  ;;  %5050 = vmatpush2.bf16.msra.mxu0 %v9911_v41  ;;  %v3704_v22 = vpop.f32.mrf.mxu1  ;;  %v3811_v16 = vmax.f32 %v3671_v6, 0.0  ;;  %v7187_v41 = vld [vmem:[%s10900_s7 + $0x24] ss:$16 sps:$4 sm:$0xff]  }
 0x34d   :  { %v3386_v15 = vpop.f32.mrf.mxu0  ;;  %5051 = vmatprep.subr.bf16.mxu0 %v11019_v62 }
 0x34e   :  { %v3674_v61 = vadd.f32 %v9958_v23, %v3385_v8  ;;  %v10009_v2 = vpop.f32.mrf.mxu1  ;;  %v7235_v23 = vld [vmem:[%s10900_s7 + $0xc] ss:$16 sps:$4 sm:$0xff]  }
 0x34f   :  { %v3389_v14 = vpop.f32.mrf.mxu0  ;;  %5342 = vmatprep.mubr.bf16.mxu1 %v7235_v23 }
 0x350   :  { %v3812_v1 = vmax.f32 %v3674_v61, 0.0  ;;  %v3390_v26 = vadd.f32 %v3389_v14, %v11144_v45  ;;  %5052 = vmatpush2.bf16.msra.mxu0 %v9898_v11  ;;  %v3707_v25 = vpop.f32.mrf.mxu1  ;;  %v11145_v11 = vld [vmem:[#allocation99_spill] sm:$0xff] }
 0x351   :  { %v3391_v20 = vpop.f32.mrf.mxu0 }
 0x352   :  { %v10022_v33 = vpack.c.bf16 %v3812_v1, %v3811_v16  ;;  %v10024_v10 = vpop.f32.mrf.mxu1  ;;  %v3679_v13 = vadd.f32 %v9964_v3, %v3390_v26  ;;  %v7190_v3 = vld [vmem:[%s10900_s7 + $0x44] ss:$16 sps:$4 sm:$0xff]  }
 0x353   :  { %v3392_v50 = vpop.f32.mrf.mxu0  ;;  %5054 = vmatmul.mubr.bf16.vlgmr.msra.gmra.mxu0 %v7182_v55  ;;  %v7188_v55 = vld [vmem:[%s10900_s7 + $0x40] ss:$16 sps:$4 sm:$0xff]   ;;  %v7193_v16 = vld [vmem:[%s10900_s7 + $0x64] ss:$16 sps:$4 sm:$0xff]  }
 0x354   :  { %v3393_v48 = vadd.f32 %v3392_v50, %v11145_v11  ;;  %5061 = vmatprep.mubr.bf16.mxu0 %v7187_v41  ;;  %v3712_v60 = vpop.f32.mrf.mxu1  ;;  %v3813_v18 = vmax.f32 %v3679_v13, 0.0  ;;  %v7191_v13 = vld [vmem:[%s10900_s7 + $0x60] ss:$16 sps:$4 sm:$0xff]  }
 0x355   :  { %v3394_v0 = vpop.f32.mrf.mxu0  ;;  %v11146_v11 = vld [vmem:[#allocation104_spill] sm:$0xff] }
 0x356   :  { %v3682_v30 = vadd.f32 %v9969_v28, %v3393_v48  ;;  %v10029_v36 = vpop.f32.mrf.mxu1  ;;  %v7196_v60 = vld [vmem:[%s10900_s7 + $0x84] ss:$16 sps:$4 sm:$0xff]  }
 0x357   :  { %v3397_v38 = vpop.f32.mrf.mxu0 }
 0x358   :  { %v3814_v53 = vmax.f32 %v3682_v30, 0.0  ;;  %v3715_v63 = vpop.f32.mrf.mxu1 }
 0x359   :  { %v3399_v6 = vpop.f32.mrf.mxu0 }
 0x35a   :  { %v10037_v39 = vpack.c.bf16 %v3814_v53, %v3813_v18  ;;  %v10039_v8 = vpop.f32.mrf.mxu1 }
 0x35b   :  { %v3400_v28 = vpop.f32.mrf.mxu0  ;;  %5062 = vmatmul.mubr.bf16.gmra.mxu0 %v7185_v5 }
 0x35c   :  { %5069 = vmatprep.mubr.bf16.mxu0 %v7190_v3  ;;  %v3720_v22 = vpop.f32.mrf.mxu1 }
 0x35d   :  { %v3402_v15 = vpop.f32.mrf.mxu0 }
 0x35e   :  { %v10041_v61 = vpop.f32.mrf.mxu1 }
 0x35f   :  { %v3405_v14 = vpop.f32.mrf.mxu0 }
 0x360   :  { %v3723_v1 = vpop.f32.mrf.mxu1  ;;  %v3406_v3 = vadd.f32 %v3405_v14, %v8935_v27  ;;  %v7194_v27 = vld [vmem:[%s10900_s7 + $0x80] ss:$16 sps:$4 sm:$0xff]  }
 0x361   :  { %v3407_v45 = vpop.f32.mrf.mxu0 }
 0x362   :  { %v10049_v26 = vpop.f32.mrf.mxu1  ;;  %v11147_v45 = vld [vmem:[#allocation102_spill] sm:$0xff] }
 0x363   :  { %v3408_v41 = vpop.f32.mrf.mxu0  ;;  %5070 = vmatmul.mubr.bf16.gmra.mxu0 %v7188_v55  ;;  %v3401_v55 = vadd.f32 %v3400_v28, %v8965_v54  ;;  %v7199_v54 = vld [vmem:[%s10900_s7 + $0xa4] ss:$16 sps:$4 sm:$0xff]  }
 0x364   :  { %5077 = vmatprep.mubr.bf16.mxu0 %v7193_v16  ;;  %v3728_v25 = vpop.f32.mrf.mxu1  ;;  %v3409_v5 = vadd.f32 %v3408_v41, %v8953_v24  ;;  %v3398_v41 = vadd.f32 %v3397_v38, %v11147_v45 }
 0x365   :  { %v3410_v20 = vpop.f32.mrf.mxu0  ;;  %v3690_v28 = vadd.f32 %v9981_v57, %v3401_v55 }
 0x366   :  { %v10051_v23 = vpop.f32.mrf.mxu1  ;;  %v3698_v16 = vadd.f32 %v9995_v34, %v3409_v5 }
 0x367   :  { %v3413_v50 = vpop.f32.mrf.mxu0  ;;  %v3816_v57 = vmax.f32 %v3690_v28, 0.0 }
 0x368   :  { %v3414_v48 = vadd.f32 %v3413_v50, %v11146_v11  ;;  %v3731_v0 = vpop.f32.mrf.mxu1  ;;  %v3818_v38 = vmax.f32 %v3698_v16, 0.0 }
 0x369   :  { %v3415_v30 = vpop.f32.mrf.mxu0 }
 0x36a   :  { %v10061_v18 = vpop.f32.mrf.mxu1  ;;  %v3703_v63 = vadd.f32 %v10002_v19, %v3414_v48 }
 0x36b   :  { %v3416_v53 = vpop.f32.mrf.mxu0  ;;  %5078 = vmatmul.mubr.bf16.gmra.mxu0 %v7191_v13 }
 0x36c   :  { %v3417_v6 = vadd.f32 %v3416_v53, %v8927_v31  ;;  %5085 = vmatprep.mubr.bf16.mxu0 %v7196_v60  ;;  %v3736_v22 = vpop.f32.mrf.mxu1  ;;  %v3695_v31 = vadd.f32 %v9989_v49, %v3406_v3  ;;  %v3819_v19 = vmax.f32 %v3703_v63, 0.0  ;;  %v3687_v49 = vadd.f32 %v9976_v42, %v3398_v41  ;;  %v7197_v42 = vld [vmem:[%s10900_s7 + $0xa0] ss:$16 sps:$4 sm:$0xff]  }
 0x36d   :  { %v3418_v15 = vpop.f32.mrf.mxu0 }
 0x36e   :  { %v3706_v1 = vadd.f32 %v10009_v2, %v3417_v6  ;;  %v10069_v24 = vpop.f32.mrf.mxu1  ;;  %v3817_v60 = vmax.f32 %v3695_v31, 0.0  ;;  %v3815_v63 = vmax.f32 %v3687_v49, 0.0  ;;  %v7202_v15 = vld [vmem:[%s10900_s7 + $0xc4] ss:$16 sps:$4 sm:$0xff]  }
 0x36f   :  { %v3421_v25 = vpop.f32.mrf.mxu0 }
 0x370   :  { %v3820_v14 = vmax.f32 %v3706_v1, 0.0  ;;  %v3422_v20 = vadd.f32 %v3421_v25, %v8982_v35  ;;  %v3739_v34 = vpop.f32.mrf.mxu1  ;;  %v3987_v5 = vpack.c.bf16 %v3818_v38, %v3817_v60 }
 0x371   :  { %v3423_v2 = vpop.f32.mrf.mxu0 }
 0x372   :  { %v3988_v50 = vpack.c.bf16 %v3820_v14, %v3819_v19  ;;  %v3711_v13 = vadd.f32 %v10024_v10, %v3422_v20  ;;  %v10082_v11 = vpop.f32.mrf.mxu1 }
 0x373   :  { %v3424_v48 = vpop.f32.mrf.mxu0  ;;  %5086 = vmatmul.mubr.bf16.gmra.mxu0 %v7194_v27 }
 0x374   :  { %v3425_v35 = vadd.f32 %v3424_v48, %v8990_v37  ;;  %5311 = vmatpush1.bf16.msra.mxu1 %v3988_v50  ;;  %5093 = vmatprep.mubr.bf16.mxu0 %v7199_v54  ;;  %v3744_v0 = vpop.f32.mrf.mxu1  ;;  %v3821_v6 = vmax.f32 %v3711_v13, 0.0 }
 0x375   :  { %v3426_v30 = vpop.f32.mrf.mxu0  ;;  %5312 = vmatprep.subr.bf16.mxu1 %v11019_v62 }
 0x376   :  { %v3714_v53 = vadd.f32 %v10029_v36, %v3425_v35  ;;  %v10088_v10 = vpop.f32.mrf.mxu1  ;;  %v3986_v36 = vpack.c.bf16 %v3816_v57, %v3815_v63 }
 0x377   :  { %v3429_v3 = vpop.f32.mrf.mxu0 }
 0x378   :  { %v3822_v37 = vmax.f32 %v3714_v53, 0.0  ;;  %v3430_v22 = vadd.f32 %v3429_v3, %v9009_v56  ;;  %5313 = vmatpush1.bf16.msra.mxu1 %v3987_v5  ;;  %v3747_v55 = vpop.f32.mrf.mxu1 }
 0x379   :  { %v3431_v16 = vpop.f32.mrf.mxu0  ;;  %5314 = vmatprep.subr.bf16.mxu1 %v11019_v62  ;;  %v7206_v55 = vld [vmem:[%s10900_s7 + $0x100] ss:$16 sps:$4 sm:$0xff]  }
 0x37a   :  { %v10098_v1 = vpack.c.bf16 %v3822_v37, %v3821_v6  ;;  %v3719_v45 = vadd.f32 %v10039_v8, %v3430_v22  ;;  %v10101_v41 = vpop.f32.mrf.mxu1  ;;  %v7200_v8 = vld [vmem:[%s10900_s7 + $0xc0] ss:$16 sps:$4 sm:$0xff]  }
 0x37b   :  { %v3432_v25 = vpop.f32.mrf.mxu0  ;;  %5094 = vmatmul.mubr.bf16.gmra.mxu0 %v7197_v42 }
 0x37c   :  { %v3433_v56 = vadd.f32 %v3432_v25, %v9134_v46  ;;  %5315 = vmatpush1.bf16.msra.mxu1 %v3986_v36  ;;  %5101 = vmatprep.mubr.bf16.mxu0 %v7202_v15  ;;  %v3752_v27 = vpop.f32.mrf.mxu1  ;;  %v3823_v54 = vmax.f32 %v3719_v45, 0.0  ;;  %v7205_v46 = vld [vmem:[%s10900_s7 + $0xe4] ss:$16 sps:$4 sm:$0xff]  }
 0x37d   :  { %v3434_v31 = vpop.f32.mrf.mxu0  ;;  %5316 = vmatprep.subr.bf16.mxu1 %v11019_v62 }
 0x37e   :  { %v3722_v19 = vadd.f32 %v10041_v61, %v3433_v56  ;;  %v10106_v14 = vpop.f32.mrf.mxu1 }
 0x37f   :  { %v3437_v20 = vpop.f32.mrf.mxu0 }
 0x380   :  { %v3824_v34 = vmax.f32 %v3722_v19, 0.0  ;;  %v3438_v2 = vadd.f32 %v3437_v20, %v9114_v32  ;;  %5317 = vmatpush1.bf16.msra.mxu1 %v10037_v39  ;;  %v3755_v28 = vpop.f32.mrf.mxu1  ;;  %v7209_v19 = vld [vmem:[%s10900_s7 + $0x120] ss:$16 sps:$4 sm:$0xff]  }
 0x381   :  { %v3439_v38 = vpop.f32.mrf.mxu0  ;;  %5318 = vmatprep.subr.bf16.mxu1 %v11019_v62  ;;  %v7217_v28 = vld [vmem:[%s10900_s7 + $0x164] ss:$16 sps:$4 sm:$0xff]  }
 0x382   :  { %v10117_v61 = vpack.c.bf16 %v3824_v34, %v3823_v54  ;;  %v3727_v50 = vadd.f32 %v10049_v26, %v3438_v2  ;;  %v10120_v13 = vpop.f32.mrf.mxu1  ;;  %v7203_v26 = vld [vmem:[%s10900_s7 + $0xe0] ss:$16 sps:$4 sm:$0xff]   ;;  %v7214_v54 = vld [vmem:[%s10900_s7 + $0x144] ss:$16 sps:$4 sm:$0xff]  }
 0x383   :  { %v3440_v48 = vpop.f32.mrf.mxu0  ;;  %5102 = vmatmul.mubr.bf16.gmra.mxu0 %v7200_v8 }
 0x384   :  { %v3441_v32 = vadd.f32 %v3440_v48, %v9125_v51  ;;  %5319 = vmatpush1.bf16.msra.mxu1 %v10022_v33  ;;  %5109 = vmatprep.mubr.bf16.mxu0 %v7205_v46  ;;  %v3760_v39 = vpop.f32.mrf.mxu1  ;;  %v3825_v30 = vmax.f32 %v3727_v50, 0.0  ;;  %v7208_v33 = vld [vmem:[%s10900_s7 + $0x104] ss:$16 sps:$4 sm:$0xff]  }
 0x385   :  { %v3442_v49 = vpop.f32.mrf.mxu0  ;;  %5320 = vmatprep.subr.bf16.mxu1 %v11019_v62  ;;  %v7215_v39 = vld [vmem:[%s10900_s7 + $0x160] ss:$16 sps:$4 sm:$0xff]  }
 0x386   :  { %v3730_v60 = vadd.f32 %v10051_v23, %v3441_v32  ;;  %v10126_v35 = vpop.f32.mrf.mxu1 }
 0x387   :  { %v3445_v0 = vpop.f32.mrf.mxu0 }
 0x388   :  { %v3826_v57 = vmax.f32 %v3730_v60, 0.0  ;;  %v3446_v51 = vadd.f32 %v3445_v0, %v9101_v40  ;;  %5321 = vmatpush1.bf16.msra.mxu1 %v10000_v12  ;;  %v3763_v5 = vpop.f32.mrf.mxu1  ;;  %v7220_v60 = vld [vmem:[%s10900_s7 + $0x184] ss:$16 sps:$4 sm:$0xff]  }
 0x389   :  { %v3447_v53 = vpop.f32.mrf.mxu0  ;;  %5322 = vmatprep.subr.bf16.mxu1 %v11019_v62 }
 0x38a   :  { %v10137_v23 = vpack.c.bf16 %v3826_v57, %v3825_v30  ;;  %v3766_v3 = vpop.f32.mrf.mxu1  ;;  %v3735_v63 = vadd.f32 %v10061_v18, %v3446_v51 }
 0x38b   :  { %v3448_v42 = vpop.f32.mrf.mxu0  ;;  %5110 = vmatmul.mubr.bf16.gmra.mxu0 %v7203_v26 }
 0x38c   :  { %v3449_v6 = vadd.f32 %v3448_v42, %v9112_v9  ;;  %5323 = vmatpush1.bf16.msra.mxu1 %v9986_v52  ;;  %5117 = vmatprep.mubr.bf16.mxu0 %v7208_v33  ;;  %v3768_v40 = vpop.f32.mrf.mxu1  ;;  %v3827_v16 = vmax.f32 %v3735_v63, 0.0  ;;  %v7211_v9 = vld [vmem:[%s10900_s7 + $0x124] ss:$16 sps:$4 sm:$0xff]   ;;  %v11148_v33 = vld [vmem:[#allocation105_spill] sm:$0xff]  ;;  %v11149_v42 = vld [vmem:[#allocation107_spill] sm:$0xff] }
 0x38d   :  { %v3450_v12 = vpop.f32.mrf.mxu0  ;;  %5324 = vmatprep.subr.bf16.mxu1 %v11019_v62  ;;  %v7218_v40 = vld [vmem:[%s10900_s7 + $0x180] ss:$16 sps:$4 sm:$0xff]  }
 0x38e   :  { %v3738_v37 = vadd.f32 %v10069_v24, %v3449_v6  ;;  %v3769_v22 = vpop.f32.mrf.mxu1  ;;  %v11150_v12 = vld [vmem:[#allocation106_spill] sm:$0xff] }
 0x38f   :  { %v3453_v15 = vpop.f32.mrf.mxu0 }
 0x390   :  { %v3828_v36 = vmax.f32 %v3738_v37, 0.0  ;;  %v3454_v18 = vadd.f32 %v3453_v15, %v9084_v59  ;;  %5325 = vmatpush1.bf16.msra.mxu1 %v9973_v21  ;;  %v3771_v52 = vpop.f32.mrf.mxu1 }
 0x391   :  { %v3455_v45 = vpop.f32.mrf.mxu0  ;;  %5326 = vmatprep.subr.bf16.mxu1 %v11019_v62 }
 0x392   :  { %v10153_v24 = vpack.c.bf16 %v3828_v36, %v3827_v16  ;;  %v3743_v56 = vadd.f32 %v10082_v11, %v3454_v18  ;;  %v7224_v45 = vld [vmem:[%s10900_s7 + $0x1c0] ss:$16 sps:$4 sm:$0xff]  }
 0x393   :  { %v3456_v25 = vpop.f32.mrf.mxu0  ;;  %5118 = vmatmul.mubr.bf16.gmra.mxu0 %v7206_v55 }
 0x394   :  { %v3457_v27 = vadd.f32 %v3456_v25, %v9093_v43  ;;  %5125 = vmatprep.mubr.bf16.mxu0 %v7211_v9  ;;  %v3829_v20 = vmax.f32 %v3743_v56, 0.0  ;;  %v7221_v9 = vld [vmem:[%s10900_s7 + $0x1a0] ss:$16 sps:$4 sm:$0xff]   ;;  %v7229_v25 = vld [vmem:[%s10900_s7 + $0x1e4] ss:$16 sps:$4 sm:$0xff]  }
 0x395   :  { %v3458_v59 = vpop.f32.mrf.mxu0  ;;  %v7227_v56 = vld [vmem:[%s10900_s7 + $0x1e0] ss:$16 sps:$4 sm:$0xff]  }
 0x396   :  { %v3746_v21 = vadd.f32 %v10088_v10, %v3457_v27  ;;  %v7212_v10 = vld [vmem:[%s10900_s7 + $0x140] ss:$16 sps:$4 sm:$0xff]   ;;  %v7232_v27 = vld [vmem:[%s10900_s7 + $0x204] ss:$16 sps:$4 sm:$0xff]  }
 0x397   :  { %v3461_v31 = vpop.f32.mrf.mxu0  ;;  %v7238_v59 = vld [vmem:[%s10900_s7 + $0x224] ss:$16 sps:$4 sm:$0xff]  }
 0x398   :  { %v3830_v8 = vmax.f32 %v3746_v21, 0.0  ;;  %v7244_v21 = vld [vmem:[%s10900_s7 + $0x244] ss:$16 sps:$4 sm:$0xff]  }
 0x399   :  { %v3463_v34 = vpop.f32.mrf.mxu0 }
 0x39a   :  { %v3993_v2 = vpack.c.bf16 %v3830_v8, %v3829_v20  ;;  %v7245_v20 = vld [vmem:[%s10900_s7 + $0x48] ss:$16 sps:$4 sm:$0xff]   ;;  %v7250_v8 = vld [vmem:[%s10900_s7 + $0x264] ss:$16 sps:$4 sm:$0xff]   ;;  %v7248_v34 = vld [vmem:[%s10900_s7 + $0x260] ss:$16 sps:$4 sm:$0xff]  }
 0x39b   :  { %v3464_v11 = vpop.f32.mrf.mxu0  ;;  %5126 = vmatmul.mubr.bf16.gmra.mxu0 %v7209_v19  ;;  %v7242_v19 = vld [vmem:[%s10900_s7 + $0x240] ss:$16 sps:$4 sm:$0xff]  }
 0x39c   :  { %5133 = vmatprep.mubr.bf16.mxu0 %v7214_v54  ;;  %v3465_v63 = vadd.f32 %v3464_v11, %v11149_v42  ;;  %v7253_v54 = vld [vmem:[%s10900_s7 + $0x6c] ss:$16 sps:$4 sm:$0xff]   ;;  %v7256_v11 = vld [vmem:[%s10900_s7 + $0x284] ss:$16 sps:$4 sm:$0xff]  }
 0x39d   :  { %v3466_v43 = vpop.f32.mrf.mxu0  ;;  %v7286_v42 = vld [vmem:[%s10900_s7 + $0x324] ss:$16 sps:$4 sm:$0xff]  }
 0x39e   :  { %v3754_v55 = vadd.f32 %v10106_v14, %v3465_v63  ;;  %v7226_v14 = vld [vmem:[%s10900_s7 + $0x1c4] ss:$16 sps:$4 sm:$0xff]   ;;  %v7259_v43 = vld [vmem:[%s10900_s7 + $0x8c] ss:$16 sps:$4 sm:$0xff]  }
 0x39f   :  { %v3469_v46 = vpop.f32.mrf.mxu0  ;;  %v7289_v63 = vld [vmem:[%s10900_s7 + $0x12c] ss:$16 sps:$4 sm:$0xff]  }
 0x3a0   :  { %v3470_v57 = vadd.f32 %v3469_v46, %v9039_v17  ;;  %v3832_v18 = vmax.f32 %v3754_v55, 0.0  ;;  %v7254_v46 = vld [vmem:[%s10900_s7 + $0x280] ss:$16 sps:$4 sm:$0xff]  }
 0x3a1   :  { %v3471_v38 = vpop.f32.mrf.mxu0 }
 0x3a2   :  { %v3759_v37 = vadd.f32 %v10120_v13, %v3470_v57  ;;  %v7265_v38 = vld [vmem:[%s10900_s7 + $0xac] ss:$16 sps:$4 sm:$0xff]   ;;  %v7275_v57 = vld [vmem:[%s10900_s7 + $0xe8] ss:$16 sps:$4 sm:$0xff]  }
 0x3a3   :  { %v3472_v50 = vpop.f32.mrf.mxu0  ;;  %5134 = vmatmul.mubr.bf16.gmra.mxu0 %v7212_v10  ;;  %v7257_v10 = vld [vmem:[%s10900_s7 + $0x88] ss:$16 sps:$4 sm:$0xff]  }
 0x3a4   :  { %5141 = vmatprep.mubr.bf16.mxu0 %v7217_v28  ;;  %v3473_v26 = vadd.f32 %v3472_v50, %v9053_v47  ;;  %v3462_v47 = vadd.f32 %v3461_v31, %v11150_v12  ;;  %v7247_v31 = vld [vmem:[%s10900_s7 + $0x4c] ss:$16 sps:$4 sm:$0xff]   ;;  %v7262_v28 = vld [vmem:[%s10900_s7 + $0x2a4] ss:$16 sps:$4 sm:$0xff]   ;;  %v7260_v50 = vld [vmem:[%s10900_s7 + $0x2a0] ss:$16 sps:$4 sm:$0xff]  }
 0x3a5   :  { %v3474_v48 = vpop.f32.mrf.mxu0  ;;  %v7284_v12 = vld [vmem:[%s10900_s7 + $0x320] ss:$16 sps:$4 sm:$0xff]  }
 0x3a6   :  { %v7263_v48 = vld [vmem:[%s10900_s7 + $0xa8] ss:$16 sps:$4 sm:$0xff]  }
 0x3a7   :  { %v3477_v32 = vpop.f32.mrf.mxu0 }
 0x3a8   :  { %v3478_v49 = vadd.f32 %v3477_v32, %v9021_v4  ;;  %v3762_v4 = vadd.f32 %v10126_v35, %v3473_v26  ;;  %v3751_v35 = vadd.f32 %v10101_v41, %v3462_v47  ;;  %v7268_v32 = vld [vmem:[%s10900_s7 + $0x2c4] ss:$16 sps:$4 sm:$0xff]   ;;  %v7277_v26 = vld [vmem:[%s10900_s7 + $0xec] ss:$16 sps:$4 sm:$0xff]   ;;  %v7287_v47 = vld [vmem:[%s10900_s7 + $0x128] ss:$16 sps:$4 sm:$0xff]  }
 0x3a9   :  { %v3479_v0 = vpop.f32.mrf.mxu0 }
 0x3aa   :  { %v3767_v51 = vadd.f32 %v3766_v3, %v3478_v49  ;;  %v7223_v3 = vld [vmem:[%s10900_s7 + $0x1a4] ss:$16 sps:$4 sm:$0xff]   ;;  %v3834_v16 = vmax.f32 %v3762_v4, 0.0  ;;  %v3831_v52 = vmax.f32 %v3751_v35, 0.0  ;;  %v7266_v49 = vld [vmem:[%s10900_s7 + $0x2c0] ss:$16 sps:$4 sm:$0xff]  }
 0x3ab   :  { %v3480_v30 = vpop.f32.mrf.mxu0  ;;  %5142 = vmatmul.mubr.bf16.gmra.mxu0 %v7215_v39  ;;  %v7271_v39 = vld [vmem:[%s10900_s7 + $0xcc] ss:$16 sps:$4 sm:$0xff]   ;;  %v7274_v0 = vld [vmem:[%s10900_s7 + $0x2e4] ss:$16 sps:$4 sm:$0xff]   ;;  %v7293_v35 = vld [vmem:[%s10900_s7 + $0x148] ss:$16 sps:$4 sm:$0xff]  }
 0x3ac   :  { %v3481_v5 = vadd.f32 %v3480_v30, %v11148_v33  ;;  %5149 = vmatprep.mubr.bf16.mxu0 %v7220_v60  ;;  %v3835_v15 = vmax.f32 %v3767_v51, 0.0  ;;  %v3994_v41 = vpack.c.bf16 %v3832_v18, %v3831_v52  ;;  %v7269_v60 = vld [vmem:[%s10900_s7 + $0xc8] ss:$16 sps:$4 sm:$0xff]   ;;  %v7272_v30 = vld [vmem:[%s10900_s7 + $0x2e0] ss:$16 sps:$4 sm:$0xff]  }
 0x3ad   :  { %v3482_v53 = vpop.f32.mrf.mxu0  ;;  %v7280_v51 = vld [vmem:[%s10900_s7 + $0x304] ss:$16 sps:$4 sm:$0xff]   ;;  %v7283_v33 = vld [vmem:[%s10900_s7 + $0x10c] ss:$16 sps:$4 sm:$0xff]  }
 0x3ae   :  { %v3770_v6 = vadd.f32 %v3769_v22, %v3481_v5  ;;  %v3833_v22 = vmax.f32 %v3759_v37, 0.0  ;;  %v7278_v5 = vld [vmem:[%s10900_s7 + $0x300] ss:$16 sps:$4 sm:$0xff]   ;;  %v7281_v53 = vld [vmem:[%s10900_s7 + $0x108] ss:$16 sps:$4 sm:$0xff]  }
 0x3af   :  { %v7292_v37 = vld [vmem:[%s10900_s7 + $0x344] ss:$16 sps:$4 sm:$0xff]   ;;  %v7301_v18 = vld [vmem:[%s10900_s7 + $0x16c] ss:$16 sps:$4 sm:$0xff]  }
 0x3b0   :  { %v3836_v17 = vmax.f32 %v3770_v6, 0.0  ;;  %v3995_v13 = vpack.c.bf16 %v3834_v16, %v3833_v22  ;;  %v7298_v22 = vld [vmem:[%s10900_s7 + $0x364] ss:$16 sps:$4 sm:$0xff]  }
 0x3b2   :  { %v3996_v36 = vpack.c.bf16 %v3836_v17, %v3835_v15  ;;  %v7295_v15 = vld [vmem:[%s10900_s7 + $0x14c] ss:$16 sps:$4 sm:$0xff]  }
 0x3b3   :  { %5150 = vmatmul.mubr.bf16.gmra.mxu0 %v7218_v40 }
 0x3b4   :  { %5327 = vmatpush2.bf16.msra.mxu1 %v3996_v36  ;;  %5157 = vmatprep.mubr.bf16.mxu0 %v7223_v3  ;;  %v7290_v36 = vld [vmem:[%s10900_s7 + $0x340] ss:$16 sps:$4 sm:$0xff]  }
 0x3b5   :  { %5328 = vmatprep.subr.bf16.mxu1 %v11019_v62 }
 0x3b8   :  { %5329 = vmatpush2.bf16.msra.mxu1 %v3995_v13 }
 0x3b9   :  { %5330 = vmatprep.subr.bf16.mxu1 %v11019_v62 }
 0x3bb   :  { %5158 = vmatmul.mubr.bf16.gmra.mxu0 %v7221_v9 }
 0x3bc   :  { %5331 = vmatpush2.bf16.msra.mxu1 %v3994_v41  ;;  %5165 = vmatprep.mubr.bf16.mxu0 %v7226_v14  ;;  %v7296_v41 = vld [vmem:[%s10900_s7 + $0x360] ss:$16 sps:$4 sm:$0xff]  }
 0x3bd   :  { %5332 = vmatprep.subr.bf16.mxu1 %v11019_v62 }
 0x3c0   :  { %5333 = vmatpush2.bf16.msra.mxu1 %v3993_v2  ;;  %v7251_v2 = vld [vmem:[%s10900_s7 + $0x68] ss:$16 sps:$4 sm:$0xff]  }
 0x3c1   :  { %5334 = vmatprep.subr.bf16.mxu1 %v11019_v62 }
 0x3c3   :  { %5166 = vmatmul.mubr.bf16.gmra.mxu0 %v7224_v45  ;;  %v7299_v45 = vld [vmem:[%s10900_s7 + $0x168] ss:$16 sps:$4 sm:$0xff]  }
 0x3c4   :  { %5335 = vmatpush2.bf16.msra.mxu1 %v10153_v24  ;;  %5173 = vmatprep.mubr.bf16.mxu0 %v7229_v25  ;;  %v7230_v24 = vld [vmem:[%s10900_s7 + $0x200] ss:$16 sps:$4 sm:$0xff]   ;;  %v7304_v25 = vld [vmem:[%s10900_s7 + $0x384] ss:$16 sps:$4 sm:$0xff]  }
 0x3c5   :  { %5336 = vmatprep.subr.bf16.mxu1 %v11019_v62 }
 0x3c8   :  { %5337 = vmatpush2.bf16.msra.mxu1 %v10137_v23  ;;  %v7233_v23 = vld [vmem:[%s10900_s7 + $0x8] ss:$16 sps:$4 sm:$0xff]  }
 0x3c9   :  { %5338 = vmatprep.subr.bf16.mxu1 %v11019_v62 }
 0x3cb   :  { %5174 = vmatmul.mubr.bf16.gmra.mxu0 %v7227_v56  ;;  %v7307_v56 = vld [vmem:[%s10900_s7 + $0x18c] ss:$16 sps:$4 sm:$0xff]  }
 0x3cc   :  { %5339 = vmatpush2.bf16.msra.mxu1 %v10117_v61  ;;  %5181 = vmatprep.mubr.bf16.mxu0 %v7232_v27  ;;  %v7241_v61 = vld [vmem:[%s10900_s7 + $0x2c] ss:$16 sps:$4 sm:$0xff]  }
 0x3cd   :  { %5340 = vmatprep.subr.bf16.mxu1 %v11019_v62  ;;  %v7236_v62 = vld [vmem:[%s10900_s7 + $0x220] ss:$16 sps:$4 sm:$0xff]  }
 0x3d0   :  { %5341 = vmatpush2.bf16.msra.mxu1 %v10098_v1  ;;  %v7239_v1 = vld [vmem:[%s10900_s7 + $0x28] ss:$16 sps:$4 sm:$0xff]  }
 0x3d3   :  { %5182 = vmatmul.mubr.bf16.gmra.mxu0 %v7230_v24  ;;  %5343 = vmatmul.mubr.bf16.vlgmr.msra.gmra.mxu1 %v7233_v23 }
 0x3d4   :  { %5189 = vmatprep.mubr.bf16.mxu0 %v7238_v59  ;;  %5350 = vmatprep.mubr.bf16.mxu1 %v7241_v61  ;;  %v7302_v61 = vld [vmem:[%s10900_s7 + $0x380] ss:$16 sps:$4 sm:$0xff]  }
 0x3db   :  { %5190 = vmatmul.mubr.bf16.gmra.mxu0 %v7236_v62  ;;  %5351 = vmatmul.mubr.bf16.gmra.mxu1 %v7239_v1  ;;  %v7305_v62 = vld [vmem:[%s10900_s7 + $0x188] ss:$16 sps:$4 sm:$0xff]   ;;  %v7310_v1 = vld [vmem:[%s10900_s7 + $0x3a4] ss:$16 sps:$4 sm:$0xff]  }
 0x3dc   :  { %5197 = vmatprep.mubr.bf16.mxu0 %v7244_v21  ;;  %5358 = vmatprep.mubr.bf16.mxu1 %v7247_v31  ;;  %v7313_v21 = vld [vmem:[%s10900_s7 + $0x1ac] ss:$16 sps:$4 sm:$0xff]  }
 0x3e3   :  { %5198 = vmatmul.mubr.bf16.gmra.mxu0 %v7242_v19  ;;  %5359 = vmatmul.mubr.bf16.gmra.mxu1 %v7245_v20  ;;  %v10395_v20 = vpop.permute.xlu1 %4218 }
 0x3e4   :  { %5205 = vmatprep.mubr.bf16.mxu0 %v7250_v8  ;;  %5366 = vmatprep.mubr.bf16.mxu1 %v7253_v54 }
 0x3eb   :  { %5206 = vmatmul.mubr.bf16.gmra.mxu0 %v7248_v34  ;;  %5367 = vmatmul.mubr.bf16.gmra.mxu1 %v7251_v2  ;;  %v7308_v34 = vld [vmem:[%s10900_s7 + $0x3a0] ss:$16 sps:$4 sm:$0xff]   ;;  %v7311_v2 = vld [vmem:[%s10900_s7 + $0x1a8] ss:$16 sps:$4 sm:$0xff]  }
 0x3ec   :  { %5213 = vmatprep.mubr.bf16.mxu0 %v7256_v11  ;;  %5374 = vmatprep.mubr.bf16.mxu1 %v7259_v43  ;;  %v10405_v11 = vpop.permute.xlu0 %4223  ;;  %v7316_v43 = vld [vmem:[%s10900_s7 + $0x3c4] ss:$16 sps:$4 sm:$0xff]  }
 0x3f3   :  { %5214 = vmatmul.mubr.bf16.gmra.mxu0 %v7254_v46  ;;  %5375 = vmatmul.mubr.bf16.gmra.mxu1 %v7257_v10  ;;  %v7319_v46 = vld [vmem:[%s10900_s7 + $0x1cc] ss:$16 sps:$4 sm:$0xff]  }
 0x3f4   :  { %5221 = vmatprep.mubr.bf16.mxu0 %v7262_v28  ;;  %5382 = vmatprep.mubr.bf16.mxu1 %v7265_v38  ;;  %v10413_v28 = vpop.permute.xlu1 %4228 }
 0x3fb   :  { %5222 = vmatmul.mubr.bf16.gmra.mxu0 %v7260_v50  ;;  %5383 = vmatmul.mubr.bf16.gmra.mxu1 %v7263_v48  ;;  %v10417_v48 = vpop.permute.xlu0 %4233 }
 0x3fc   :  { %5229 = vmatprep.mubr.bf16.mxu0 %v7268_v32  ;;  %5390 = vmatprep.mubr.bf16.mxu1 %v7271_v39  ;;  %v7314_v39 = vld [vmem:[%s10900_s7 + $0x3c0] ss:$16 sps:$4 sm:$0xff]  }
 0x403   :  { %5230 = vmatmul.mubr.bf16.gmra.mxu0 %v7266_v49  ;;  %5391 = vmatmul.mubr.bf16.gmra.mxu1 %v7269_v60  ;;  %v7317_v49 = vld [vmem:[%s10900_s7 + $0x1c8] ss:$16 sps:$4 sm:$0xff]   ;;  %v10427_v60 = vpop.permute.xlu1 %4238 }
 0x404   :  { %5237 = vmatprep.mubr.bf16.mxu0 %v7274_v0  ;;  %5398 = vmatprep.mubr.bf16.mxu1 %v7277_v26  ;;  %v7322_v0 = vld [vmem:[%s10900_s7 + $0x3e4] ss:$16 sps:$4 sm:$0xff]   ;;  %v7325_v26 = vld [vmem:[%s10900_s7 + $0x1ec] ss:$16 sps:$4 sm:$0xff]  }
 0x40b   :  { %5238 = vmatmul.mubr.bf16.gmra.mxu0 %v7272_v30  ;;  %5399 = vmatmul.mubr.bf16.gmra.mxu1 %v7275_v57 }
 0x40c   :  { %5245 = vmatprep.mubr.bf16.mxu0 %v7280_v51  ;;  %5406 = vmatprep.mubr.bf16.mxu1 %v7283_v33  ;;  %v10437_v51 = vpop.permute.xlu0 %4243 }
 0x413   :  { %v10329_v4 = vpop.f32.mrf.mxu0  ;;  %5246 = vmatmul.mubr.bf16.gmra.mxu0 %v7278_v5  ;;  %5407 = vmatmul.mubr.bf16.gmra.mxu1 %v7281_v53  ;;  %v10439_v5 = vpop.permute.xlu1 %4248 }
 0x414   :  { %5253 = vmatprep.mubr.bf16.mxu0 %v7286_v42  ;;  %5414 = vmatprep.mubr.bf16.mxu1 %v7289_v63  ;;  %v7320_v42 = vld [vmem:[%s10900_s7 + $0x3e0] ss:$16 sps:$4 sm:$0xff]   ;;  %v7323_v63 = vld [vmem:[%s10900_s7 + $0x1e8] ss:$16 sps:$4 sm:$0xff]  }
 0x415   :  { %v5057_v6 = vpop.f32.mrf.mxu0 }
 0x416   :  { %v7328_v6 = vld [vmem:[%s10900_s7 + $0x20c] ss:$16 sps:$4 sm:$0xff]  }
 0x417   :  { %v10331_v40 = vpop.f32.mrf.mxu0 }
 0x419   :  { %v5060_v17 = vpop.f32.mrf.mxu0 }
 0x41b   :  { %v10345_v3 = vpop.f32.mrf.mxu0  ;;  %5254 = vmatmul.mubr.bf16.gmra.mxu0 %v7284_v12  ;;  %5415 = vmatmul.mubr.bf16.gmra.mxu1 %v7287_v47  ;;  %v10452_v47 = vpop.permute.xlu0 %4253 }
 0x41c   :  { %5261 = vmatprep.mubr.bf16.mxu0 %v7292_v37  ;;  %5422 = vmatprep.mubr.bf16.mxu1 %v7295_v15  ;;  %v10456_v15 = vpop.permute.xlu1 %4258 }
 0x41d   :  { %v5065_v55 = vpop.f32.mrf.mxu0 }
 0x41f   :  { %v10347_v16 = vpop.f32.mrf.mxu0 }
 0x421   :  { %v5068_v13 = vpop.f32.mrf.mxu0 }
 0x422   :  { %v10468_v13 = vpop.permute.xlu1 %4268 }
 0x423   :  { %v10361_v9 = vpop.f32.mrf.mxu0  ;;  %5262 = vmatmul.mubr.bf16.gmra.mxu0 %v7290_v36  ;;  %5423 = vmatmul.mubr.bf16.gmra.mxu1 %v7293_v35  ;;  %v7326_v36 = vld [vmem:[%s10900_s7 + $0x208] ss:$16 sps:$4 sm:$0xff]   ;;  %v10463_v35 = vpop.permute.xlu0 %4263 }
 0x424   :  { %5269 = vmatprep.mubr.bf16.mxu0 %v7298_v22  ;;  %5430 = vmatprep.mubr.bf16.mxu1 %v7301_v18  ;;  %v7331_v22 = vld [vmem:[%s10900_s7 + $0x22c] ss:$16 sps:$4 sm:$0xff]  }
 0x425   :  { %v5073_v52 = vpop.f32.mrf.mxu0 }
 0x427   :  { %v10363_v14 = vpop.f32.mrf.mxu0 }
 0x429   :  { %v5076_v27 = vpop.f32.mrf.mxu0 }
 0x42a   :  { %v10479_v27 = vpop.permute.xlu1 %4278 }
 0x42b   :  { %v10377_v24 = vpop.f32.mrf.mxu0  ;;  %5270 = vmatmul.mubr.bf16.gmra.mxu0 %v7296_v41  ;;  %5431 = vmatmul.mubr.bf16.gmra.mxu1 %v7299_v45  ;;  %v10472_v45 = vpop.permute.xlu0 %4273  ;;  %11152 = vst [vmem:[#allocation13_spill] sm:$0xff] %v10479_v27 }
 0x42c   :  { %5277 = vmatprep.mubr.bf16.mxu0 %v7304_v25  ;;  %5438 = vmatprep.mubr.bf16.mxu1 %v7307_v56  ;;  %11151 = vst [vmem:[#allocation31_spill] sm:$0xff] %v10472_v45  ;;  %v7329_v56 = vld [vmem:[%s10900_s7 + $0x228] ss:$16 sps:$4 sm:$0xff]  }
 0x42d   :  { %v5081_v23 = vpop.f32.mrf.mxu0 }
 0x42e   :  { %v7334_v23 = vld [vmem:[%s10900_s7 + $0x24c] ss:$16 sps:$4 sm:$0xff]  }
 0x42f   :  { %v10379_v59 = vpop.f32.mrf.mxu0 }
 0x431   :  { %v5084_v31 = vpop.f32.mrf.mxu0 }
 0x432   :  { %v10488_v31 = vpop.permute.xlu1 %4288 }
 0x433   :  { %v10393_v19 = vpop.f32.mrf.mxu0  ;;  %5278 = vmatmul.mubr.bf16.gmra.mxu0 %v7302_v61  ;;  %5439 = vmatmul.mubr.bf16.gmra.mxu1 %v7305_v62  ;;  %11154 = vst [vmem:[#allocation29_spill] sm:$0xff] %v10488_v31 }
 0x434   :  { %5285 = vmatprep.mubr.bf16.mxu0 %v7310_v1  ;;  %5446 = vmatprep.mubr.bf16.mxu1 %v7313_v21  ;;  %v10486_v1 = vpop.permute.xlu0 %4283 }
 0x435   :  { %v5089_v8 = vpop.f32.mrf.mxu0  ;;  %11153 = vst [vmem:[#allocation93_spill] sm:$0xff] %v10486_v1 }
 0x437   :  { %v10397_v54 = vpop.f32.mrf.mxu0 }
 0x439   :  { %v5092_v10 = vpop.f32.mrf.mxu0 }
 0x43b   :  { %v10415_v38 = vpop.f32.mrf.mxu0  ;;  %5286 = vmatmul.mubr.bf16.gmra.mxu0 %v7308_v34  ;;  %5447 = vmatmul.mubr.bf16.gmra.mxu1 %v7311_v2  ;;  %v7332_v34 = vld [vmem:[%s10900_s7 + $0x248] ss:$16 sps:$4 sm:$0xff]   ;;  %v7337_v2 = vld [vmem:[%s10900_s7 + $0x26c] ss:$16 sps:$4 sm:$0xff]  }
 0x43c   :  { %5293 = vmatprep.mubr.bf16.mxu0 %v7316_v43  ;;  %5454 = vmatprep.mubr.bf16.mxu1 %v7319_v46  ;;  %v10498_v46 = vpop.permute.xlu0 %4293 }
 0x43d   :  { %v5097_v50 = vpop.f32.mrf.mxu0  ;;  %11155 = vst [vmem:[#allocation14_spill] sm:$0xff] %v10498_v46  ;;  %v5059_v46 = vadd.f32 %v10331_v40, %v9160_v29  ;;  %v5064_v29 = vadd.f32 %v10345_v3, %v9179_v58 }
 0x43e   :  { %v10502_v50 = vpop.permute.xlu1 %4298 }
 0x43f   :  { %v10419_v32 = vpop.f32.mrf.mxu0  ;;  %11156 = vst [vmem:[#allocation25_spill] sm:$0xff] %v10502_v50 }
 0x441   :  { %v5100_v30 = vpop.f32.mrf.mxu0 }
 0x442   :  { %v7340_v30 = vld [vmem:[%s10900_s7 + $0x28c] ss:$16 sps:$4 sm:$0xff]  }
 0x443   :  { %v10435_v57 = vpop.f32.mrf.mxu0  ;;  %5294 = vmatmul.mubr.bf16.gmra.mxu0 %v7314_v39  ;;  %5455 = vmatmul.mubr.bf16.gmra.mxu1 %v7317_v49 }
 0x444   :  { %5301 = vmatprep.mubr.bf16.mxu0 %v7322_v0  ;;  %5462 = vmatprep.mubr.bf16.mxu1 %v7325_v26  ;;  %v7335_v0 = vld [vmem:[%s10900_s7 + $0x268] ss:$16 sps:$4 sm:$0xff]   ;;  %v10509_v26 = vpop.permute.xlu0 %4303 }
 0x445   :  { %v5105_v33 = vpop.f32.mrf.mxu0  ;;  %11157 = vst [vmem:[#allocation34_spill] sm:$0xff] %v10509_v26 }
 0x447   :  { %v10441_v53 = vpop.f32.mrf.mxu0 }
 0x449   :  { %v5108_v12 = vpop.f32.mrf.mxu0 }
 0x44a   :  { %v10518_v12 = vpop.permute.xlu0 %4313 }
 0x44b   :  { %v10454_v37 = vpop.f32.mrf.mxu0  ;;  %5302 = vmatmul.mubr.bf16.gmra.mxu0 %v7320_v42  ;;  %5463 = vmatmul.mubr.bf16.gmra.mxu1 %v7323_v63  ;;  %v10514_v42 = vpop.permute.xlu1 %4308  ;;  %11159 = vst [vmem:[#allocation26_spill] sm:$0xff] %v10518_v12 }
 0x44c   :  { %5470 = vmatprep.mubr.bf16.mxu1 %v7328_v6  ;;  %11158 = vst [vmem:[#allocation15_spill] sm:$0xff] %v10514_v42 }
 0x44d   :  { %v5113_v17 = vpop.f32.mrf.mxu0 }
 0x44f   :  { %v10458_v55 = vpop.f32.mrf.mxu0 }
 0x451   :  { %v5116_v18 = vpop.f32.mrf.mxu0 }
 0x452   :  { %v7343_v18 = vld [vmem:[%s10900_s7 + $0x2ac] ss:$16 sps:$4 sm:$0xff]  }
 0x453   :  { %v10470_v52 = vpop.f32.mrf.mxu0  ;;  %5471 = vmatmul.mubr.bf16.gmra.mxu1 %v7326_v36  ;;  %v7338_v36 = vld [vmem:[%s10900_s7 + $0x288] ss:$16 sps:$4 sm:$0xff]  }
 0x454   :  { %5478 = vmatprep.mubr.bf16.mxu1 %v7331_v22  ;;  %v10525_v22 = vpop.permute.xlu1 %4318 }
 0x455   :  { %v5121_v41 = vpop.f32.mrf.mxu0  ;;  %11160 = vst [vmem:[#allocation30_spill] sm:$0xff] %v10525_v22  ;;  %v7355_v22 = vld [vmem:[%s10900_s7 + $0x32c] ss:$16 sps:$4 sm:$0xff]  }
 0x457   :  { %v10474_v25 = vpop.f32.mrf.mxu0 }
 0x459   :  { %v5124_v61 = vpop.f32.mrf.mxu0 }
 0x45b   :  { %v10484_v62 = vpop.f32.mrf.mxu0  ;;  %5479 = vmatmul.mubr.bf16.gmra.mxu1 %v7329_v56 }
 0x45c   :  { %5486 = vmatprep.mubr.bf16.mxu1 %v7334_v23  ;;  %v10532_v23 = vpop.permute.xlu0 %4323 }
 0x45d   :  { %v5129_v21 = vpop.f32.mrf.mxu0  ;;  %11161 = vst [vmem:[#allocation16_spill] sm:$0xff] %v10532_v23 }
 0x45e   :  { %v10534_v21 = vpop.permute.xlu1 %4328 }
 0x45f   :  { %v10490_v8 = vpop.f32.mrf.mxu0  ;;  %11162 = vst [vmem:[#allocation90_spill] sm:$0xff] %v10534_v21 }
 0x461   :  { %v5132_v43 = vpop.f32.mrf.mxu0 }
 0x462   :  { %v7346_v43 = vld [vmem:[%s10900_s7 + $0x2cc] ss:$16 sps:$4 sm:$0xff]  }
 0x463   :  { %v10500_v10 = vpop.f32.mrf.mxu0  ;;  %5487 = vmatmul.mubr.bf16.gmra.mxu1 %v7332_v34 }
 0x464   :  { %5494 = vmatprep.mubr.bf16.mxu1 %v7337_v2  ;;  %v7341_v2 = vld [vmem:[%s10900_s7 + $0x2a8] ss:$16 sps:$4 sm:$0xff]  }
 0x465   :  { %v5137_v39 = vpop.f32.mrf.mxu0 }
 0x467   :  { %v10504_v49 = vpop.f32.mrf.mxu0 }
 0x469   :  { %v5140_v33 = vpop.f32.mrf.mxu0 }
 0x46a   :  { %v10548_v33 = vpop.permute.xlu1 %4338 }
 0x46b   :  { %v10516_v63 = vpop.f32.mrf.mxu0  ;;  %5495 = vmatmul.mubr.bf16.gmra.mxu1 %v7335_v0  ;;  %v10544_v0 = vpop.permute.xlu0 %4333  ;;  %11164 = vst [vmem:[#allocation18_spill] sm:$0xff] %v10548_v33 }
 0x46c   :  { %5502 = vmatprep.mubr.bf16.mxu1 %v7340_v30  ;;  %11163 = vst [vmem:[#allocation17_spill] sm:$0xff] %v10544_v0 }
 0x46d   :  { %v5145_v6 = vpop.f32.mrf.mxu0 }
 0x46e   :  { %v10560_v0 = vpop.permute.xlu1 %4348 }
 0x46f   :  { %v10520_v17 = vpop.f32.mrf.mxu0  ;;  %11166 = vst [vmem:[#allocation28_spill] sm:$0xff] %v10560_v0 }
 0x471   :  { %v5148_v41 = vpop.f32.mrf.mxu0 }
 0x472   :  { %v10555_v41 = vpop.permute.xlu0 %4343  ;;  %v10571_v21 = vpop.permute.xlu1 %4358 }
 0x473   :  { %v10530_v56 = vpop.f32.mrf.mxu0  ;;  %5503 = vmatmul.mubr.bf16.gmra.mxu1 %v7338_v36  ;;  %11165 = vst [vmem:[#allocation27_spill] sm:$0xff] %v10555_v41  ;;  %v7347_v41 = vld [vmem:[%s10900_s7 + $0x2e8] ss:$16 sps:$4 sm:$0xff]   ;;  %11168 = vst [vmem:[#allocation74_spill] sm:$0xff] %v10571_v21 }
 0x474   :  { %5510 = vmatprep.mubr.bf16.mxu1 %v7343_v18  ;;  %v7344_v18 = vld [vmem:[%s10900_s7 + $0x2c8] ss:$16 sps:$4 sm:$0xff]  }
 0x475   :  { %v5153_v61 = vpop.f32.mrf.mxu0  ;;  %v7350_v21 = vld [vmem:[%s10900_s7 + $0x308] ss:$16 sps:$4 sm:$0xff]  }
 0x476   :  { %v7349_v61 = vld [vmem:[%s10900_s7 + $0x2ec] ss:$16 sps:$4 sm:$0xff]  }
 0x477   :  { %v10536_v34 = vpop.f32.mrf.mxu0 }
 0x479   :  { %v5156_v39 = vpop.f32.mrf.mxu0 }
 0x47b   :  { %v10546_v30 = vpop.f32.mrf.mxu0  ;;  %5511 = vmatmul.mubr.bf16.gmra.mxu1 %v7341_v2 }
 0x47c   :  { %5518 = vmatprep.mubr.bf16.mxu1 %v7346_v43 }
 0x47d   :  { %v5161_v6 = vpop.f32.mrf.mxu0 }
 0x47e   :  { %v10564_v6 = vpop.permute.xlu0 %4353 }
 0x47f   :  { %v10550_v36 = vpop.f32.mrf.mxu0  ;;  %11167 = vst [vmem:[#allocation75_spill] sm:$0xff] %v10564_v6 }
 0x481   :  { %v5164_v39 = vpop.f32.mrf.mxu0 }
 0x482   :  { %v7352_v39 = vld [vmem:[%s10900_s7 + $0x30c] ss:$16 sps:$4 sm:$0xff]  }
 0x483   :  { %v10562_v2 = vpop.f32.mrf.mxu0  ;;  %5519 = vmatmul.mubr.bf16.gmra.mxu1 %v7344_v18  ;;  %v10578_v18 = vpop.permute.xlu0 %4363 }
 0x484   :  { %5526 = vmatprep.mubr.bf16.mxu1 %v7349_v61  ;;  %11169 = vst [vmem:[#allocation68_spill] sm:$0xff] %v10578_v18 }
 0x485   :  { %v5169_v43 = vpop.f32.mrf.mxu0 }
 0x486   :  { %v10580_v43 = vpop.permute.xlu1 %4368 }
 0x487   :  { %v10566_v33 = vpop.f32.mrf.mxu0  ;;  %11170 = vst [vmem:[#allocation69_spill] sm:$0xff] %v10580_v43  ;;  %v10590_v12 = vpop.permute.xlu0 %4373 }
 0x488   :  { %11171 = vst [vmem:[#allocation54_spill] sm:$0xff] %v10590_v12 }
 0x489   :  { %v5172_v0 = vpop.f32.mrf.mxu0 }
 0x48a   :  { %v10596_v43 = vpop.permute.xlu1 %4378 }
 0x48b   :  { %v10576_v23 = vpop.f32.mrf.mxu0  ;;  %5527 = vmatmul.mubr.bf16.gmra.mxu1 %v7347_v41  ;;  %v11172_v41 = vld [vmem:[#allocation91_spill] sm:$0xff]  ;;  %11173 = vst [vmem:[#allocation51_spill] sm:$0xff] %v10596_v43 }
 0x48c   :  { %5534 = vmatprep.mubr.bf16.mxu1 %v7352_v39  ;;  %v5056_v18 = vadd.f32 %v10329_v4, %v11172_v41  ;;  %v7353_v4 = vld [vmem:[%s10900_s7 + $0x328] ss:$16 sps:$4 sm:$0xff]   ;;  %v5730_v41 = vpop.permute.xlu0 %5729 }
 0x48d   :  { %v5177_v61 = vpop.f32.mrf.mxu0 }
 0x48f   :  { %v10582_v6 = vpop.f32.mrf.mxu0 }
 0x490   :  { %v5740_v45 = vpop.permute.xlu0 %5739 }
 0x491   :  { %v5180_v0 = vpop.f32.mrf.mxu0 }
 0x493   :  { %v10594_v39 = vpop.f32.mrf.mxu0  ;;  %v5344_v61 = vpop.f32.mrf.mxu1  ;;  %5535 = vmatmul.mubr.bf16.gmra.mxu1 %v7350_v21  ;;  %v7358_v21 = vld [vmem:[%s10900_s7 + $0x34c] ss:$16 sps:$4 sm:$0xff]  }
 0x494   :  { %v5345_v42 = vadd.f32 %v5344_v61, %v5056_v18  ;;  %5542 = vmatprep.mubr.bf16.mxu1 %v7355_v22 }
 0x495   :  { %v5185_v26 = vpop.f32.mrf.mxu0  ;;  %v5346_v50 = vpop.f32.mrf.mxu1 }
 0x496   :  { %v5599_v31 = vmax.f32 %v5345_v42, 0.0  ;;  %v5735_v50 = vpop.permute.xlu1 %5734 }
 0x497   :  { %v10600_v0 = vpop.f32.mrf.mxu0  ;;  %v5347_v12 = vpop.f32.mrf.mxu1 }
 0x498   :  { %v5348_v1 = vadd.f32 %v5347_v12, %v5059_v46  ;;  %v6047_v40 = vmul.f32 %v5730_v41, %v5599_v31 }
 0x499   :  { %v5188_v22 = vpop.f32.mrf.mxu0  ;;  %v5349_v26 = vpop.f32.mrf.mxu1 }
 0x49a   :  { %v5600_v42 = vmax.f32 %v5348_v1, 0.0  ;;  %v5067_v22 = vadd.f32 %v10347_v16, %v9193_v44  ;;  %v6112_v26 = vsel %vm6111_vm9, %v6047_v40, 0.0  ;;  %v5745_v40 = vpop.permute.xlu1 %5744 }
 0x49b   :  { %v10610_v18 = vpop.f32.mrf.mxu0  ;;  %v5352_v61 = vpop.f32.mrf.mxu1  ;;  %5543 = vmatmul.mubr.bf16.gmra.mxu1 %v7353_v4  ;;  %v7356_v4 = vld [vmem:[%s10900_s7 + $0x348] ss:$16 sps:$4 sm:$0xff]  }
 0x49c   :  { %v6048_v43 = vmul.f32 %v5735_v50, %v5600_v42  ;;  %v5353_v27 = vadd.f32 %v5352_v61, %v5064_v29  ;;  %5550 = vmatprep.mubr.bf16.mxu1 %v7358_v21  ;;  %v7361_v29 = vld [vmem:[%s10900_s7 + $0x36c] ss:$16 sps:$4 sm:$0xff]  }
 0x49d   :  { %v5193_v46 = vpop.f32.mrf.mxu0  ;;  %v5354_v12 = vpop.f32.mrf.mxu1 }
 0x49e   :  { %v6113_v58 = vsel %vm6111_vm9, %v6048_v43, 0.0  ;;  %v5601_v3 = vmax.f32 %v5353_v27, 0.0  ;;  %v5072_v27 = vadd.f32 %v10361_v9, %v9212_v7 }
 0x49f   :  { %v6114_v1 = vadd.f32 %v6113_v58, %v6112_v26  ;;  %v10616_v31 = vpop.f32.mrf.mxu0  ;;  %v5355_v41 = vpop.f32.mrf.mxu1 }
 0x4a0   :  { %v6049_v21 = vmul.f32 %v5740_v45, %v5601_v3  ;;  %v5356_v50 = vadd.f32 %v5355_v41, %v5067_v22  ;;  %v5750_v3 = vpop.permute.xlu0 %5749  ;;  %v11174_v41 = vld [vmem:[#allocation24_spill] sm:$0xff] }
 0x4a1   :  { %v5196_v44 = vpop.f32.mrf.mxu0  ;;  %v5357_v16 = vpop.f32.mrf.mxu1 }
 0x4a2   :  { %v6115_v43 = vsel %vm6111_vm9, %v6049_v21, 0.0  ;;  %v5602_v42 = vmax.f32 %v5356_v50, 0.0  ;;  %v5075_v44 = vadd.f32 %v10363_v14, %v11174_v41  ;;  %v5755_v14 = vpop.permute.xlu1 %5754 }
 0x4a3   :  { %v6116_v61 = vadd.f32 %v6115_v43, %v6114_v1  ;;  %v10627_v46 = vpop.f32.mrf.mxu0  ;;  %v5360_v12 = vpop.f32.mrf.mxu1  ;;  %5551 = vmatmul.mubr.bf16.gmra.mxu1 %v7356_v4  ;;  %v7359_v4 = vld [vmem:[%s10900_s7 + $0x368] ss:$16 sps:$4 sm:$0xff]  }
 0x4a4   :  { %v6050_v45 = vmul.f32 %v5745_v40, %v5602_v42  ;;  %v5361_v22 = vadd.f32 %v5360_v12, %v5072_v27  ;;  %5558 = vmatprep.mubr.bf16.mxu1 %v7361_v29  ;;  %v7364_v29 = vld [vmem:[%s10900_s7 + $0x38c] ss:$16 sps:$4 sm:$0xff]  }
 0x4a5   :  { %v5201_v26 = vpop.f32.mrf.mxu0  ;;  %v5362_v58 = vpop.f32.mrf.mxu1  ;;  %v11175_v42 = vld [vmem:[#allocation95_spill] sm:$0xff] }
 0x4a6   :  { %v6117_v16 = vsel %vm6111_vm9, %v6050_v45, 0.0  ;;  %v5603_v7 = vmax.f32 %v5361_v22, 0.0  ;;  %v5080_v12 = vadd.f32 %v10377_v24, %v11175_v42 }
 0x4a7   :  { %v6118_v9 = vadd.f32 %v6117_v16, %v6116_v61  ;;  %v10632_v21 = vpop.f32.mrf.mxu0  ;;  %v5363_v1 = vpop.f32.mrf.mxu1 }
 0x4a8   :  { %v6051_v50 = vmul.f32 %v5750_v3, %v5603_v7  ;;  %v5364_v40 = vadd.f32 %v5363_v1, %v5075_v44  ;;  %v5760_v7 = vpop.permute.xlu0 %5759  ;;  %v11176_v1 = vld [vmem:[#allocation23_spill] sm:$0xff] }
 0x4a9   :  { %v5204_v27 = vpop.f32.mrf.mxu0  ;;  %v5365_v43 = vpop.f32.mrf.mxu1 }
 0x4aa   :  { %v6119_v61 = vsel %vm6111_vm9, %v6051_v50, 0.0  ;;  %v5604_v45 = vmax.f32 %v5364_v40, 0.0  ;;  %v5083_v27 = vadd.f32 %v10379_v59, %v11176_v1  ;;  %v5765_v59 = vpop.permute.xlu1 %5764 }
 0x4ab   :  { %v6120_v22 = vadd.f32 %v6119_v61, %v6118_v9  ;;  %v10643_v26 = vpop.f32.mrf.mxu0  ;;  %v5368_v58 = vpop.f32.mrf.mxu1  ;;  %5559 = vmatmul.mubr.bf16.gmra.mxu1 %v7359_v4  ;;  %v7362_v4 = vld [vmem:[%s10900_s7 + $0x388] ss:$16 sps:$4 sm:$0xff]  }
 0x4ac   :  { %v6052_v3 = vmul.f32 %v5755_v14, %v5604_v45  ;;  %v5369_v41 = vadd.f32 %v5368_v58, %v5080_v12  ;;  %5566 = vmatprep.mubr.bf16.mxu1 %v7364_v29  ;;  %v7367_v29 = vld [vmem:[%s10900_s7 + $0x3ac] ss:$16 sps:$4 sm:$0xff]  }
 0x4ad   :  { %v5209_v44 = vpop.f32.mrf.mxu0  ;;  %v5370_v16 = vpop.f32.mrf.mxu1  ;;  %v11177_v45 = vld [vmem:[#allocation41_spill] sm:$0xff] }
 0x4ae   :  { %v6121_v43 = vsel %vm6111_vm9, %v6052_v3, 0.0  ;;  %v5605_v24 = vmax.f32 %v5369_v41, 0.0  ;;  %v5088_v58 = vadd.f32 %v10393_v19, %v11177_v45 }
 0x4af   :  { %v6122_v42 = vadd.f32 %v6121_v43, %v6120_v22  ;;  %v10648_v50 = vpop.f32.mrf.mxu0  ;;  %v5371_v9 = vpop.f32.mrf.mxu1 }
 0x4b0   :  { %v6053_v40 = vmul.f32 %v5760_v7, %v5605_v24  ;;  %v5372_v14 = vadd.f32 %v5371_v9, %v5083_v27  ;;  %v5770_v24 = vpop.permute.xlu0 %5769  ;;  %v11178_v9 = vld [vmem:[#allocation48_spill] sm:$0xff] }
 0x4b1   :  { %v5212_v12 = vpop.f32.mrf.mxu0  ;;  %v5373_v61 = vpop.f32.mrf.mxu1 }
 0x4b2   :  { %v6123_v22 = vsel %vm6111_vm9, %v6053_v40, 0.0  ;;  %v5606_v3 = vmax.f32 %v5372_v14, 0.0  ;;  %v5091_v12 = vadd.f32 %v10397_v54, %v11178_v9  ;;  %v5775_v54 = vpop.permute.xlu1 %5774 }
 0x4b3   :  { %v6124_v41 = vadd.f32 %v6123_v22, %v6122_v42  ;;  %v10659_v44 = vpop.f32.mrf.mxu0  ;;  %v5376_v16 = vpop.f32.mrf.mxu1  ;;  %5567 = vmatmul.mubr.bf16.gmra.mxu1 %v7362_v4  ;;  %v7365_v4 = vld [vmem:[%s10900_s7 + $0x3a8] ss:$16 sps:$4 sm:$0xff]  }
 0x4b4   :  { %v6054_v7 = vmul.f32 %v5765_v59, %v5606_v3  ;;  %v5377_v1 = vadd.f32 %v5376_v16, %v5088_v58  ;;  %5574 = vmatprep.mubr.bf16.mxu1 %v7367_v29  ;;  %v7370_v29 = vld [vmem:[%s10900_s7 + $0x3cc] ss:$16 sps:$4 sm:$0xff]   ;;  %v11179_v3 = vld [vmem:[#allocation98_spill] sm:$0xff] }
 0x4b5   :  { %v5217_v27 = vpop.f32.mrf.mxu0  ;;  %v5378_v43 = vpop.f32.mrf.mxu1  ;;  %v5096_v16 = vadd.f32 %v10415_v38, %v11179_v3 }
 0x4b6   :  { %v6125_v61 = vsel %vm6111_vm9, %v6054_v7, 0.0  ;;  %v5607_v19 = vmax.f32 %v5377_v1, 0.0 }
 0x4b7   :  { %v6126_v45 = vadd.f32 %v6125_v61, %v6124_v41  ;;  %v10664_v40 = vpop.f32.mrf.mxu0  ;;  %v5379_v42 = vpop.f32.mrf.mxu1 }
 0x4b8   :  { %v6055_v14 = vmul.f32 %v5770_v24, %v5607_v19  ;;  %v5380_v59 = vadd.f32 %v5379_v42, %v5091_v12  ;;  %v5780_v19 = vpop.permute.xlu0 %5779  ;;  %v11180_v42 = vld [vmem:[#allocation44_spill] sm:$0xff] }
 0x4b9   :  { %v5220_v58 = vpop.f32.mrf.mxu0  ;;  %v5381_v22 = vpop.f32.mrf.mxu1 }
 0x4ba   :  { %v6127_v41 = vsel %vm6111_vm9, %v6055_v14, 0.0  ;;  %v5608_v7 = vmax.f32 %v5380_v59, 0.0  ;;  %v5099_v58 = vadd.f32 %v10419_v32, %v11180_v42  ;;  %v5785_v32 = vpop.permute.xlu1 %5784 }
 0x4bb   :  { %v6128_v1 = vadd.f32 %v6127_v41, %v6126_v45  ;;  %v10675_v27 = vpop.f32.mrf.mxu0  ;;  %v5384_v43 = vpop.f32.mrf.mxu1  ;;  %5575 = vmatmul.mubr.bf16.gmra.mxu1 %v7365_v4  ;;  %v7368_v4 = vld [vmem:[%s10900_s7 + $0x3c8] ss:$16 sps:$4 sm:$0xff]  }
 0x4bc   :  { %v6056_v24 = vmul.f32 %v5775_v54, %v5608_v7  ;;  %v5385_v9 = vadd.f32 %v5384_v43, %v5096_v16  ;;  %5582 = vmatprep.mubr.bf16.mxu1 %v7370_v29  ;;  %v7373_v29 = vld [vmem:[%s10900_s7 + $0x3ec] ss:$16 sps:$4 sm:$0xff]  }
 0x4bd   :  { %v5225_v12 = vpop.f32.mrf.mxu0  ;;  %v5386_v61 = vpop.f32.mrf.mxu1  ;;  %v11181_v7 = vld [vmem:[#allocation7_spill] sm:$0xff] }
 0x4be   :  { %v6129_v22 = vsel %vm6111_vm9, %v6056_v24, 0.0  ;;  %v5609_v38 = vmax.f32 %v5385_v9, 0.0  ;;  %v5104_v43 = vadd.f32 %v10435_v57, %v11181_v7 }
 0x4bf   :  { %v6130_v3 = vadd.f32 %v6129_v22, %v6128_v1  ;;  %v10680_v14 = vpop.f32.mrf.mxu0  ;;  %v5387_v45 = vpop.f32.mrf.mxu1 }
 0x4c0   :  { %v6057_v59 = vmul.f32 %v5780_v19, %v5609_v38  ;;  %v5388_v54 = vadd.f32 %v5387_v45, %v5099_v58  ;;  %v5790_v38 = vpop.permute.xlu0 %5789  ;;  %v11182_v45 = vld [vmem:[#allocation45_spill] sm:$0xff] }
 0x4c1   :  { %v5228_v16 = vpop.f32.mrf.mxu0  ;;  %v5389_v41 = vpop.f32.mrf.mxu1 }
 0x4c2   :  { %v6131_v1 = vsel %vm6111_vm9, %v6057_v59, 0.0  ;;  %v5610_v24 = vmax.f32 %v5388_v54, 0.0  ;;  %v5107_v16 = vadd.f32 %v10441_v53, %v11182_v45 }
 0x4c3   :  { %v6132_v9 = vadd.f32 %v6131_v1, %v6130_v3  ;;  %v10691_v12 = vpop.f32.mrf.mxu0  ;;  %v5392_v61 = vpop.f32.mrf.mxu1  ;;  %5583 = vmatmul.mubr.bf16.gmra.mxu1 %v7368_v4  ;;  %v7371_v4 = vld [vmem:[%s10900_s7 + $0x3e8] ss:$16 sps:$4 sm:$0xff]   ;;  %s7398_s7 = smov [#allocation3]  }
 0x4c4   :  { %v6058_v19 = vmul.f32 %v5785_v32, %v5610_v24  ;;  %v5393_v42 = vadd.f32 %v5392_v61, %v5104_v43  ;;  %5590 = vmatprep.mubr.bf16.mxu1 %v7373_v29  ;;  %v5795_v1 = vpop.permute.xlu1 %5794  ;;  %v11184_v24 = vld [vmem:[#allocation103_spill] sm:$0xff]  ;;  %s6264_s28 = sshll.u32 %s7398_s7, 4  ;;  %s6265_s28 = int_to_ptr.vmem [resolvable:$true] %s6264_s28 }
 0x4c5   :  { %v5233_v58 = vpop.f32.mrf.mxu0  ;;  %v5394_v22 = vpop.f32.mrf.mxu1  ;;  %v5112_v61 = vadd.f32 %v10454_v37, %v11184_v24  ;;  %s7374_s29 = scalar_lea.vmem %s6265_s28, 16  ;;  %s7378_s30 = scalar_lea.vmem %s6265_s28, 32 }
 0x4c6   :  { %v6133_v41 = vsel %vm6111_vm9, %v6058_v19, 0.0  ;;  %v5611_v57 = vmax.f32 %v5393_v42, 0.0  ;;  %p7375_p0 = scmp.ne.s32.totalorder %s6265_s28, %s7374_s29  ;;  %p7379_p1 = scmp.lt.s32.totalorder %s6265_s28, %s6265_s28 }
 0x4c7   :  { %v6134_v7 = vadd.f32 %v6133_v41, %v6132_v9  ;;  %v10696_v59 = vpop.f32.mrf.mxu0  ;;  %v5395_v3 = vpop.f32.mrf.mxu1  ;;  %p7380_p2 = scmp.lt.s32.totalorder %s7378_s30, %s7374_s29 }
 0x4c8   :  { %11183 = vst [vmem:[#allocation62_spill] sm:$0xff] %v10696_v59  ;;  %v6059_v54 = vmul.f32 %v5790_v38, %v5611_v57  ;;  %v5396_v32 = vadd.f32 %v5395_v3, %v5107_v16  ;;  %v5800_v38 = vpop.permute.xlu0 %5799  ;;  %v11185_v16 = vld [vmem:[#allocation37_spill] sm:$0xff] }
 0x4c9   :  { %v5236_v29 = vpop.f32.mrf.mxu0  ;;  %v5397_v43 = vpop.f32.mrf.mxu1  ;;  %v5115_v57 = vadd.f32 %v10458_v55, %v11185_v16  ;;  %p7381_p3 = por %p7380_p2, %p7379_p1 }
 0x4ca   :  { %v6135_v53 = vsel %vm6111_vm9, %v6059_v54, 0.0  ;;  %v5612_v19 = vmax.f32 %v5396_v32, 0.0 }
 0x4cb   :  { %v6136_v42 = vadd.f32 %v6135_v53, %v6134_v7  ;;  %v10704_v9 = vpop.f32.mrf.mxu0  ;;  %v5400_v58 = vpop.f32.mrf.mxu1  ;;  %5591 = vmatmul.mubr.bf16.gmra.mxu1 %v7371_v4  ;;  %p7382_p4 = pnand %p7381_p3, %p7375_p0 }
 0x4cc   :  { %v6060_v22 = vmul.f32 %v5795_v1, %v5612_v19  ;;  %v5401_v45 = vadd.f32 %v5400_v58, %v5112_v61  ;;  %v5805_v4 = vpop.permute.xlu1 %5804  ;;  %v11186_v1 = vld [vmem:[#allocation9_spill] sm:$0xff] }
 0x4cd   :  { %v5241_v41 = vpop.f32.mrf.mxu0  ;;  %v5402_v59 = vpop.f32.mrf.mxu1  ;;  %v5120_v61 = vadd.f32 %v10470_v52, %v11186_v1 }
 0x4ce   :  { %v6137_v3 = vsel %vm6111_vm9, %v6060_v22, 0.0  ;;  %v5613_v29 = vmax.f32 %v5401_v45, 0.0 }
 0x4cf   :  { %v6138_v37 = vadd.f32 %v6137_v3, %v6136_v42  ;;  %v10709_v43 = vpop.f32.mrf.mxu0  ;;  %v5403_v54 = vpop.f32.mrf.mxu1 }
 0x4d0   :  { %v6061_v7 = vmul.f32 %v5800_v38, %v5613_v29  ;;  %v5404_v32 = vadd.f32 %v5403_v54, %v5115_v57  ;;  %v5810_v3 = vpop.permute.xlu0 %5809  ;;  %v11187_v38 = vld [vmem:[#allocation8_spill] sm:$0xff] }
 0x4d1   :  { %v5244_v24 = vpop.f32.mrf.mxu0  ;;  %v5405_v53 = vpop.f32.mrf.mxu1  ;;  %v5123_v57 = vadd.f32 %v10474_v25, %v11187_v38 }
 0x4d2   :  { %v6139_v59 = vsel %vm6111_vm9, %v6061_v7, 0.0  ;;  %v5614_v19 = vmax.f32 %v5404_v32, 0.0 }
 0x4d3   :  { %v6140_v58 = vadd.f32 %v6139_v59, %v6138_v37  ;;  %v10714_v55 = vpop.f32.mrf.mxu0  ;;  %v5408_v22 = vpop.f32.mrf.mxu1 }
 0x4d4   :  { %v6062_v45 = vmul.f32 %v5805_v4, %v5614_v19  ;;  %v5409_v42 = vadd.f32 %v5408_v22, %v5120_v61  ;;  %v5815_v59 = vpop.permute.xlu1 %5814  ;;  %v11188_v4 = vld [vmem:[#allocation100_spill] sm:$0xff] }
 0x4d5   :  { %v5249_v41 = vpop.f32.mrf.mxu0  ;;  %v5410_v16 = vpop.f32.mrf.mxu1  ;;  %v5128_v61 = vadd.f32 %v10484_v62, %v11188_v4 }
 0x4d6   :  { %v6141_v29 = vsel %vm6111_vm9, %v6062_v45, 0.0  ;;  %v5615_v54 = vmax.f32 %v5409_v42, 0.0 }
 0x4d7   :  { %v6142_v24 = vadd.f32 %v6141_v29, %v6140_v58  ;;  %v10719_v52 = vpop.f32.mrf.mxu0  ;;  %v5411_v7 = vpop.f32.mrf.mxu1 }
 0x4d8   :  { %v6063_v32 = vmul.f32 %v5810_v3, %v5615_v54  ;;  %v5412_v37 = vadd.f32 %v5411_v7, %v5123_v57  ;;  %v5820_v29 = vpop.permute.xlu0 %5819  ;;  %v11189_v3 = vld [vmem:[#allocation20_spill] sm:$0xff] }
 0x4d9   :  { %v5252_v53 = vpop.f32.mrf.mxu0  ;;  %v5413_v1 = vpop.f32.mrf.mxu1  ;;  %v5131_v57 = vadd.f32 %v10490_v8, %v11189_v3 }
 0x4da   :  { %v6143_v19 = vsel %vm6111_vm9, %v6063_v32, 0.0  ;;  %v5616_v22 = vmax.f32 %v5412_v37, 0.0 }
 0x4db   :  { %v6144_v41 = vadd.f32 %v6143_v19, %v6142_v24  ;;  %v10724_v25 = vpop.f32.mrf.mxu0  ;;  %v5416_v45 = vpop.f32.mrf.mxu1 }
 0x4dc   :  { %v6064_v42 = vmul.f32 %v5815_v59, %v5616_v22  ;;  %v5417_v58 = vadd.f32 %v5416_v45, %v5128_v61  ;;  %v5825_v19 = vpop.permute.xlu1 %5824  ;;  %v11190_v59 = vld [vmem:[#allocation101_spill] sm:$0xff] }
 0x4dd   :  { %v5257_v16 = vpop.f32.mrf.mxu0  ;;  %v5418_v38 = vpop.f32.mrf.mxu1  ;;  %v5136_v61 = vadd.f32 %v10500_v10, %v11190_v59 }
 0x4de   :  { %v6145_v54 = vsel %vm6111_vm9, %v6064_v42, 0.0  ;;  %v5617_v7 = vmax.f32 %v5417_v58, 0.0 }
 0x4df   :  { %v6146_v53 = vadd.f32 %v6145_v54, %v6144_v41  ;;  %v10729_v62 = vpop.f32.mrf.mxu0  ;;  %v5419_v32 = vpop.f32.mrf.mxu1 }
 0x4e0   :  { %v6065_v37 = vmul.f32 %v5820_v29, %v5617_v7  ;;  %v5420_v24 = vadd.f32 %v5419_v32, %v5131_v57  ;;  %v5830_v54 = vpop.permute.xlu0 %5829  ;;  %v11191_v29 = vld [vmem:[#allocation35_spill] sm:$0xff] }
 0x4e1   :  { %v5260_v1 = vpop.f32.mrf.mxu0  ;;  %v5421_v4 = vpop.f32.mrf.mxu1  ;;  %v5139_v57 = vadd.f32 %v10504_v49, %v11191_v29 }
 0x4e2   :  { %v6147_v22 = vsel %vm6111_vm9, %v6065_v37, 0.0  ;;  %v5618_v45 = vmax.f32 %v5420_v24, 0.0 }
 0x4e3   :  { %v6148_v16 = vadd.f32 %v6147_v22, %v6146_v53  ;;  %v10734_v8 = vpop.f32.mrf.mxu0  ;;  %v5424_v42 = vpop.f32.mrf.mxu1 }
 0x4e4   :  { %v6066_v58 = vmul.f32 %v5825_v19, %v5618_v45  ;;  %v5425_v41 = vadd.f32 %v5424_v42, %v5136_v61  ;;  %v5835_v22 = vpop.permute.xlu1 %5834  ;;  %v11192_v19 = vld [vmem:[#allocation10_spill] sm:$0xff] }
 0x4e5   :  { %v5265_v38 = vpop.f32.mrf.mxu0  ;;  %v5426_v3 = vpop.f32.mrf.mxu1  ;;  %v5144_v61 = vadd.f32 %v10516_v63, %v11192_v19 }
 0x4e6   :  { %v6149_v7 = vsel %vm6111_vm9, %v6066_v58, 0.0  ;;  %v5619_v32 = vmax.f32 %v5425_v41, 0.0 }
 0x4e7   :  { %v6150_v1 = vadd.f32 %v6149_v7, %v6148_v16  ;;  %v10739_v10 = vpop.f32.mrf.mxu0  ;;  %v5427_v37 = vpop.f32.mrf.mxu1 }
 0x4e8   :  { %v6067_v24 = vmul.f32 %v5830_v54, %v5619_v32  ;;  %v5428_v53 = vadd.f32 %v5427_v37, %v5139_v57  ;;  %v5840_v7 = vpop.permute.xlu0 %5839  ;;  %v11193_v54 = vld [vmem:[#allocation21_spill] sm:$0xff] }
 0x4e9   :  { %v5268_v4 = vpop.f32.mrf.mxu0  ;;  %v5429_v59 = vpop.f32.mrf.mxu1  ;;  %v5147_v57 = vadd.f32 %v10520_v17, %v11193_v54 }
 0x4ea   :  { %v6151_v45 = vsel %vm6111_vm9, %v6067_v24, 0.0  ;;  %v5620_v42 = vmax.f32 %v5428_v53, 0.0 }
 0x4eb   :  { %v6152_v38 = vadd.f32 %v6151_v45, %v6150_v1  ;;  %v10744_v49 = vpop.f32.mrf.mxu0  ;;  %v5432_v58 = vpop.f32.mrf.mxu1 }
 0x4ec   :  { %v6068_v41 = vmul.f32 %v5835_v22, %v5620_v42  ;;  %v5433_v16 = vadd.f32 %v5432_v58, %v5144_v61  ;;  %v5845_v45 = vpop.permute.xlu1 %5844  ;;  %v11194_v22 = vld [vmem:[#allocation19_spill] sm:$0xff] }
 0x4ed   :  { %v5273_v3 = vpop.f32.mrf.mxu0  ;;  %v5434_v29 = vpop.f32.mrf.mxu1  ;;  %v5152_v61 = vadd.f32 %v10530_v56, %v11194_v22 }
 0x4ee   :  { %v6153_v32 = vsel %vm6111_vm9, %v6068_v41, 0.0  ;;  %v5621_v37 = vmax.f32 %v5433_v16, 0.0 }
 0x4ef   :  { %v6154_v4 = vadd.f32 %v6153_v32, %v6152_v38  ;;  %v10749_v63 = vpop.f32.mrf.mxu0  ;;  %v5435_v24 = vpop.f32.mrf.mxu1 }
 0x4f0   :  { %v6069_v53 = vmul.f32 %v5840_v7, %v5621_v37  ;;  %v5436_v1 = vadd.f32 %v5435_v24, %v5147_v57  ;;  %v5850_v32 = vpop.permute.xlu0 %5849  ;;  %v11195_v7 = vld [vmem:[#allocation40_spill] sm:$0xff] }
 0x4f1   :  { %v5276_v59 = vpop.f32.mrf.mxu0  ;;  %v5437_v19 = vpop.f32.mrf.mxu1  ;;  %v5155_v57 = vadd.f32 %v10536_v34, %v11195_v7 }
 0x4f2   :  { %v6155_v42 = vsel %vm6111_vm9, %v6069_v53, 0.0  ;;  %v5622_v58 = vmax.f32 %v5436_v1, 0.0 }
 0x4f3   :  { %v6156_v3 = vadd.f32 %v6155_v42, %v6154_v4  ;;  %v10754_v17 = vpop.f32.mrf.mxu0  ;;  %v5440_v41 = vpop.f32.mrf.mxu1 }
 0x4f4   :  { %v6070_v16 = vmul.f32 %v5845_v45, %v5622_v58  ;;  %v5441_v38 = vadd.f32 %v5440_v41, %v5152_v61  ;;  %v5855_v42 = vpop.permute.xlu1 %5854  ;;  %v11196_v45 = vld [vmem:[#allocation11_spill] sm:$0xff] }
 0x4f5   :  { %v5281_v29 = vpop.f32.mrf.mxu0  ;;  %v5442_v54 = vpop.f32.mrf.mxu1  ;;  %v5160_v61 = vadd.f32 %v10546_v30, %v11196_v45 }
 0x4f6   :  { %v6157_v37 = vsel %vm6111_vm9, %v6070_v16, 0.0  ;;  %v5623_v24 = vmax.f32 %v5441_v38, 0.0 }
 0x4f7   :  { %v6158_v59 = vadd.f32 %v6157_v37, %v6156_v3  ;;  %v10759_v56 = vpop.f32.mrf.mxu0  ;;  %v5443_v53 = vpop.f32.mrf.mxu1 }
 0x4f8   :  { %v6071_v1 = vmul.f32 %v5850_v32, %v5623_v24  ;;  %v5444_v4 = vadd.f32 %v5443_v53, %v5155_v57  ;;  %v5860_v37 = vpop.permute.xlu0 %5859  ;;  %v11197_v32 = vld [vmem:[#allocation22_spill] sm:$0xff] }
 0x4f9   :  { %v5284_v19 = vpop.f32.mrf.mxu0  ;;  %v5445_v22 = vpop.f32.mrf.mxu1  ;;  %v5163_v57 = vadd.f32 %v10550_v36, %v11197_v32 }
 0x4fa   :  { %v6159_v58 = vsel %vm6111_vm9, %v6071_v1, 0.0  ;;  %v5624_v41 = vmax.f32 %v5444_v4, 0.0 }
 0x4fb   :  { %v6160_v29 = vadd.f32 %v6159_v58, %v6158_v59  ;;  %v10764_v34 = vpop.f32.mrf.mxu0  ;;  %v5448_v16 = vpop.f32.mrf.mxu1 }
 0x4fc   :  { %v6072_v38 = vmul.f32 %v5855_v42, %v5624_v41  ;;  %v5449_v3 = vadd.f32 %v5448_v16, %v5160_v61  ;;  %v5865_v58 = vpop.permute.xlu1 %5864  ;;  %v11198_v42 = vld [vmem:[#allocation36_spill] sm:$0xff] }
 0x4fd   :  { %v5289_v54 = vpop.f32.mrf.mxu0  ;;  %v5450_v7 = vpop.f32.mrf.mxu1  ;;  %v5168_v61 = vadd.f32 %v10562_v2, %v11198_v42 }
 0x4fe   :  { %v6161_v24 = vsel %vm6111_vm9, %v6072_v38, 0.0  ;;  %v5625_v53 = vmax.f32 %v5449_v3, 0.0 }
 0x4ff   :  { %v6162_v19 = vadd.f32 %v6161_v24, %v6160_v29  ;;  %v10769_v30 = vpop.f32.mrf.mxu0  ;;  %v5451_v1 = vpop.f32.mrf.mxu1 }
 0x500   :  { %v6073_v4 = vmul.f32 %v5860_v37, %v5625_v53  ;;  %v5452_v59 = vadd.f32 %v5451_v1, %v5163_v57  ;;  %v5870_v24 = vpop.permute.xlu0 %5869  ;;  %v11199_v37 = vld [vmem:[#allocation12_spill] sm:$0xff] }
 0x501   :  { %v5292_v22 = vpop.f32.mrf.mxu0  ;;  %v5453_v45 = vpop.f32.mrf.mxu1  ;;  %v5171_v57 = vadd.f32 %v10566_v33, %v11199_v37 }
 0x502   :  { %v6163_v41 = vsel %vm6111_vm9, %v6073_v4, 0.0  ;;  %v5626_v16 = vmax.f32 %v5452_v59, 0.0 }
 0x503   :  { %v6164_v54 = vadd.f32 %v6163_v41, %v6162_v19  ;;  %v10774_v36 = vpop.f32.mrf.mxu0  ;;  %v5456_v38 = vpop.f32.mrf.mxu1 }
 0x504   :  { %v6074_v3 = vmul.f32 %v5865_v58, %v5626_v16  ;;  %v5457_v29 = vadd.f32 %v5456_v38, %v5168_v61  ;;  %v5875_v41 = vpop.permute.xlu1 %5874  ;;  %v11200_v58 = vld [vmem:[#allocation96_spill] sm:$0xff] }
 0x505   :  { %v5297_v7 = vpop.f32.mrf.mxu0  ;;  %v5458_v32 = vpop.f32.mrf.mxu1  ;;  %v5176_v61 = vadd.f32 %v10576_v23, %v11200_v58 }
 0x506   :  { %v6165_v53 = vsel %vm6111_vm9, %v6074_v3, 0.0  ;;  %v5627_v1 = vmax.f32 %v5457_v29, 0.0 }
 0x507   :  { %v6166_v22 = vadd.f32 %v6165_v53, %v6164_v54  ;;  %v10779_v2 = vpop.f32.mrf.mxu0  ;;  %v5459_v4 = vpop.f32.mrf.mxu1 }
 0x508   :  { %v6075_v59 = vmul.f32 %v5870_v24, %v5627_v1  ;;  %v5460_v19 = vadd.f32 %v5459_v4, %v5171_v57  ;;  %v5880_v53 = vpop.permute.xlu0 %5879  ;;  %v5179_v24 = vadd.f32 %v10582_v6, %v10395_v20 }
 0x509   :  { %v5300_v45 = vpop.f32.mrf.mxu0  ;;  %v5461_v42 = vpop.f32.mrf.mxu1 }
 0x50a   :  { %v6167_v16 = vsel %vm6111_vm9, %v6075_v59, 0.0  ;;  %v5628_v38 = vmax.f32 %v5460_v19, 0.0 }
 0x50b   :  { %v6168_v7 = vadd.f32 %v6167_v16, %v6166_v22  ;;  %v10784_v33 = vpop.f32.mrf.mxu0  ;;  %v5464_v3 = vpop.f32.mrf.mxu1 }
 0x50c   :  { %v6076_v29 = vmul.f32 %v5875_v41, %v5628_v38  ;;  %v5465_v54 = vadd.f32 %v5464_v3, %v5176_v61  ;;  %v5184_v41 = vadd.f32 %v10594_v39, %v10405_v11  ;;  %v5885_v16 = vpop.permute.xlu1 %5884 }
 0x50d   :  { %v5305_v32 = vpop.f32.mrf.mxu0  ;;  %v5466_v37 = vpop.f32.mrf.mxu1 }
 0x50e   :  { %v6169_v57 = vsel %vm6111_vm9, %v6076_v29, 0.0  ;;  %v5629_v1 = vmax.f32 %v5465_v54, 0.0  ;;  %v5890_v37 = vpop.permute.xlu0 %5889 }
 0x50f   :  { %v6170_v4 = vadd.f32 %v6169_v57, %v6168_v7  ;;  %v10789_v23 = vpop.f32.mrf.mxu0  ;;  %v5467_v59 = vpop.f32.mrf.mxu1  ;;  %v5187_v7 = vadd.f32 %v10600_v0, %v10413_v28 }
 0x510   :  { %v6077_v19 = vmul.f32 %v5880_v53, %v5629_v1  ;;  %v5468_v22 = vadd.f32 %v5467_v59, %v5179_v24  ;;  %v5192_v1 = vadd.f32 %v10610_v18, %v10417_v48 }
 0x511   :  { %v5469_v45 = vpop.f32.mrf.mxu1  ;;  %v5308_v42 = vpop.f32.mrf.mxu0 }
 0x512   :  { %v6171_v58 = vsel %vm6111_vm9, %v6077_v19, 0.0  ;;  %v5630_v61 = vmax.f32 %v5468_v22, 0.0  ;;  %v5895_v19 = vpop.permute.xlu1 %5894 }
 0x513   :  { %v6172_v38 = vadd.f32 %v6171_v58, %v6170_v4  ;;  %v5472_v20 = vpop.f32.mrf.mxu1 }
 0x514   :  { %v6078_v6 = vmul.f32 %v5885_v16, %v5630_v61  ;;  %v5473_v3 = vadd.f32 %v5472_v20, %v5184_v41  ;;  %v5195_v41 = vadd.f32 %v10616_v31, %v10427_v60  ;;  %v5900_v16 = vpop.permute.xlu0 %5899 }
 0x515   :  { %v5474_v29 = vpop.f32.mrf.mxu1 }
 0x516   :  { %v6173_v54 = vsel %vm6111_vm9, %v6078_v6, 0.0  ;;  %v5631_v32 = vmax.f32 %v5473_v3, 0.0  ;;  %v5200_v3 = vadd.f32 %v10627_v46, %v10437_v51 }
 0x517   :  { %v6174_v53 = vadd.f32 %v6173_v54, %v6172_v38  ;;  %v5475_v24 = vpop.f32.mrf.mxu1  ;;  %v5905_v54 = vpop.permute.xlu1 %5904 }
 0x518   :  { %v6079_v57 = vmul.f32 %v5890_v37, %v5631_v32  ;;  %v5476_v11 = vadd.f32 %v5475_v24, %v5187_v7  ;;  %v5203_v24 = vadd.f32 %v10632_v21, %v10439_v5 }
 0x519   :  { %v5477_v39 = vpop.f32.mrf.mxu1 }
 0x51a   :  { %v6175_v4 = vsel %vm6111_vm9, %v6079_v57, 0.0  ;;  %v5632_v59 = vmax.f32 %v5476_v11, 0.0  ;;  %v5910_v39 = vpop.permute.xlu0 %5909 }
 0x51b   :  { %v6176_v22 = vadd.f32 %v6175_v4, %v6174_v53  ;;  %v5480_v45 = vpop.f32.mrf.mxu1 }
 0x51c   :  { %v6080_v42 = vmul.f32 %v5895_v19, %v5632_v59  ;;  %v5481_v28 = vadd.f32 %v5480_v45, %v5192_v1  ;;  %v5208_v19 = vadd.f32 %v10643_v26, %v10452_v47 }
 0x51d   :  { %v5482_v0 = vpop.f32.mrf.mxu1 }
 0x51e   :  { %v6177_v58 = vsel %vm6111_vm9, %v6080_v42, 0.0  ;;  %v5633_v61 = vmax.f32 %v5481_v28, 0.0  ;;  %v5915_v42 = vpop.permute.xlu1 %5914 }
 0x51f   :  { %v6178_v38 = vadd.f32 %v6177_v58, %v6176_v22  ;;  %v5483_v20 = vpop.f32.mrf.mxu1  ;;  %v5211_v58 = vadd.f32 %v10648_v50, %v10456_v15 }
 0x520   :  { %v6081_v6 = vmul.f32 %v5900_v16, %v5633_v61  ;;  %v5484_v48 = vadd.f32 %v5483_v20, %v5195_v41 }
 0x521   :  { %v5485_v18 = vpop.f32.mrf.mxu1 }
 0x522   :  { %v6179_v29 = vsel %vm6111_vm9, %v6081_v6, 0.0  ;;  %v5634_v7 = vmax.f32 %v5484_v48, 0.0  ;;  %v5216_v18 = vadd.f32 %v10659_v44, %v10463_v35 }
 0x523   :  { %v6180_v32 = vadd.f32 %v6179_v29, %v6178_v38  ;;  %v5488_v37 = vpop.f32.mrf.mxu1  ;;  %v5920_v38 = vpop.permute.xlu0 %5919 }
 0x524   :  { %v6082_v53 = vmul.f32 %v5905_v54, %v5634_v7  ;;  %v5489_v60 = vadd.f32 %v5488_v37, %v5200_v3  ;;  %v5925_v7 = vpop.permute.xlu1 %5924 }
 0x525   :  { %v5490_v31 = vpop.f32.mrf.mxu1 }
 0x526   :  { %v6181_v57 = vsel %vm6111_vm9, %v6082_v53, 0.0  ;;  %v5635_v11 = vmax.f32 %v5489_v60, 0.0  ;;  %v5219_v53 = vadd.f32 %v10664_v40, %v10468_v13 }
 0x527   :  { %v6182_v1 = vadd.f32 %v6181_v57, %v6180_v32  ;;  %v5491_v4 = vpop.f32.mrf.mxu1 }
 0x528   :  { %v6083_v59 = vmul.f32 %v5910_v39, %v5635_v11  ;;  %v5492_v51 = vadd.f32 %v5491_v4, %v5203_v24  ;;  %v5930_v24 = vpop.permute.xlu0 %5929 }
 0x529   :  { %v5493_v46 = vpop.f32.mrf.mxu1 }
 0x52a   :  { %v6183_v22 = vsel %vm6111_vm9, %v6083_v59, 0.0  ;;  %v5636_v45 = vmax.f32 %v5492_v51, 0.0  ;;  %v5935_v46 = vpop.permute.xlu1 %5934 }
 0x52b   :  { %v6184_v28 = vadd.f32 %v6183_v22, %v6182_v1  ;;  %v5496_v0 = vpop.f32.mrf.mxu1  ;;  %v11201_v1 = vld [vmem:[#allocation31_spill] sm:$0xff] }
 0x52c   :  { %v6084_v41 = vmul.f32 %v5915_v42, %v5636_v45  ;;  %v5497_v5 = vadd.f32 %v5496_v0, %v5208_v19  ;;  %v5224_v4 = vadd.f32 %v10675_v27, %v11201_v1  ;;  %v11202_v42 = vld [vmem:[#allocation13_spill] sm:$0xff] }
 0x52d   :  { %v5498_v21 = vpop.f32.mrf.mxu1 }
 0x52e   :  { %v6185_v61 = vsel %vm6111_vm9, %v6084_v41, 0.0  ;;  %v5637_v16 = vmax.f32 %v5497_v5, 0.0  ;;  %v5940_v5 = vpop.permute.xlu0 %5939 }
 0x52f   :  { %v6186_v20 = vadd.f32 %v6185_v61, %v6184_v28  ;;  %v5499_v6 = vpop.f32.mrf.mxu1  ;;  %v5227_v28 = vadd.f32 %v10680_v14, %v11202_v42 }
 0x530   :  { %v6085_v48 = vmul.f32 %v5920_v38, %v5637_v16  ;;  %v5500_v47 = vadd.f32 %v5499_v6, %v5211_v58  ;;  %v11203_v38 = vld [vmem:[#allocation93_spill] sm:$0xff] }
 0x531   :  { %v5501_v26 = vpop.f32.mrf.mxu1 }
 0x532   :  { %v6187_v3 = vsel %vm6111_vm9, %v6085_v48, 0.0  ;;  %v5638_v29 = vmax.f32 %v5500_v47, 0.0  ;;  %v5945_v47 = vpop.permute.xlu1 %5944 }
 0x533   :  { %v6188_v54 = vadd.f32 %v6187_v3, %v6186_v20  ;;  %v5504_v32 = vpop.f32.mrf.mxu1  ;;  %v5232_v20 = vadd.f32 %v10691_v12, %v11203_v38 }
 0x534   :  { %v6086_v37 = vmul.f32 %v5925_v7, %v5638_v29  ;;  %v5505_v15 = vadd.f32 %v5504_v32, %v5216_v18  ;;  %v11204_v7 = vld [vmem:[#allocation29_spill] sm:$0xff] }
 0x535   :  { %v5506_v50 = vpop.f32.mrf.mxu1 }
 0x536   :  { %v6189_v60 = vsel %vm6111_vm9, %v6086_v37, 0.0  ;;  %v5639_v31 = vmax.f32 %v5505_v15, 0.0  ;;  %v5950_v50 = vpop.permute.xlu0 %5949 }
 0x537   :  { %v6190_v57 = vadd.f32 %v6189_v60, %v6188_v54  ;;  %v5507_v11 = vpop.f32.mrf.mxu1  ;;  %v11205_v54 = vld [vmem:[#allocation62_spill] sm:$0xff] }
 0x538   :  { %v6087_v39 = vmul.f32 %v5930_v24, %v5639_v31  ;;  %v5508_v35 = vadd.f32 %v5507_v11, %v5219_v53  ;;  %v5235_v32 = vadd.f32 %v11205_v54, %v11204_v7 }
 0x539   :  { %v5509_v44 = vpop.f32.mrf.mxu1 }
 0x53a   :  { %v6191_v59 = vsel %vm6111_vm9, %v6087_v39, 0.0  ;;  %v5640_v51 = vmax.f32 %v5508_v35, 0.0  ;;  %v5955_v44 = vpop.permute.xlu1 %5954 }
 0x53b   :  { %v6192_v19 = vadd.f32 %v6191_v59, %v6190_v57  ;;  %v5512_v22 = vpop.f32.mrf.mxu1  ;;  %v11206_v57 = vld [vmem:[#allocation14_spill] sm:$0xff] }
 0x53c   :  { %v6088_v45 = vmul.f32 %v5935_v46, %v5640_v51  ;;  %v5513_v13 = vadd.f32 %v5512_v22, %v5224_v4  ;;  %v5240_v11 = vadd.f32 %v10704_v9, %v11206_v57  ;;  %v11211_v57 = vld [vmem:[#allocation30_spill] sm:$0xff] }
 0x53d   :  { %v5514_v40 = vpop.f32.mrf.mxu1 }
 0x53e   :  { %v6193_v0 = vsel %vm6111_vm9, %v6088_v45, 0.0  ;;  %v5641_v41 = vmax.f32 %v5513_v13, 0.0  ;;  %v5960_v40 = vpop.permute.xlu0 %5959 }
 0x53f   :  { %v6194_v21 = vadd.f32 %v6193_v0, %v6192_v19  ;;  %v5515_v58 = vpop.f32.mrf.mxu1  ;;  %v11207_v19 = vld [vmem:[#allocation25_spill] sm:$0xff] }
 0x540   :  { %v6089_v61 = vmul.f32 %v5940_v5, %v5641_v41  ;;  %v5516_v27 = vadd.f32 %v5515_v58, %v5227_v28  ;;  %v5243_v22 = vadd.f32 %v10709_v43, %v11207_v19  ;;  %v11208_v5 = vld [vmem:[#allocation34_spill] sm:$0xff] }
 0x541   :  { %v5517_v16 = vpop.f32.mrf.mxu1 }
 0x542   :  { %v6195_v6 = vsel %vm6111_vm9, %v6089_v61, 0.0  ;;  %v5642_v48 = vmax.f32 %v5516_v27, 0.0  ;;  %v5965_v27 = vpop.permute.xlu1 %5964 }
 0x543   :  { %v6196_v26 = vadd.f32 %v6195_v6, %v6194_v21  ;;  %v5520_v18 = vpop.f32.mrf.mxu1  ;;  %v5248_v21 = vadd.f32 %v10714_v55, %v11208_v5 }
 0x544   :  { %v6090_v3 = vmul.f32 %v5945_v47, %v5642_v48  ;;  %v5521_v14 = vadd.f32 %v5520_v18, %v5232_v20  ;;  %v11209_v48 = vld [vmem:[#allocation15_spill] sm:$0xff] }
 0x545   :  { %v5522_v29 = vpop.f32.mrf.mxu1  ;;  %v5251_v47 = vadd.f32 %v10719_v52, %v11209_v48 }
 0x546   :  { %v6197_v37 = vsel %vm6111_vm9, %v6090_v3, 0.0  ;;  %v5643_v15 = vmax.f32 %v5521_v14, 0.0  ;;  %v5970_v3 = vpop.permute.xlu0 %5969 }
 0x547   :  { %v6198_v53 = vadd.f32 %v6197_v37, %v6196_v26  ;;  %v5523_v60 = vpop.f32.mrf.mxu1 }
 0x548   :  { %v6091_v31 = vmul.f32 %v5950_v50, %v5643_v15  ;;  %v5524_v12 = vadd.f32 %v5523_v60, %v5235_v32  ;;  %v11210_v32 = vld [vmem:[#allocation26_spill] sm:$0xff] }
 0x549   :  { %v5525_v24 = vpop.f32.mrf.mxu1  ;;  %v5256_v37 = vadd.f32 %v10724_v25, %v11210_v32 }
 0x54a   :  { %v6199_v39 = vsel %vm6111_vm9, %v6091_v31, 0.0  ;;  %v5644_v35 = vmax.f32 %v5524_v12, 0.0 }
 0x54b   :  { %v6200_v1 = vadd.f32 %v6199_v39, %v6198_v53  ;;  %v5528_v4 = vpop.f32.mrf.mxu1  ;;  %v5975_v53 = vpop.permute.xlu1 %5974 }
 0x54c   :  { %v6092_v59 = vmul.f32 %v5955_v44, %v5644_v35  ;;  %v5529_v51 = vadd.f32 %v5528_v4, %v5240_v11  ;;  %v5259_v11 = vadd.f32 %v10729_v62, %v11211_v57  ;;  %v5980_v44 = vpop.permute.xlu0 %5979 }
 0x54d   :  { %v5530_v46 = vpop.f32.mrf.mxu1 }
 0x54e   :  { %v6201_v45 = vsel %vm6111_vm9, %v6092_v59, 0.0  ;;  %v5645_v13 = vmax.f32 %v5529_v51, 0.0  ;;  %v11212_v46 = vld [vmem:[#allocation16_spill] sm:$0xff] }
 0x54f   :  { %v6202_v42 = vadd.f32 %v6201_v45, %v6200_v1  ;;  %v5531_v28 = vpop.f32.mrf.mxu1  ;;  %v5264_v19 = vadd.f32 %v10734_v8, %v11212_v46 }
 0x550   :  { %v6093_v0 = vmul.f32 %v5960_v40, %v5645_v13  ;;  %v5532_v9 = vadd.f32 %v5531_v28, %v5243_v22  ;;  %v5985_v13 = vpop.permute.xlu1 %5984 }
 0x551   :  { %v5533_v41 = vpop.f32.mrf.mxu1 }
 0x552   :  { %v6203_v58 = vsel %vm6111_vm9, %v6093_v0, 0.0  ;;  %v5646_v61 = vmax.f32 %v5532_v9, 0.0  ;;  %v11213_v9 = vld [vmem:[#allocation90_spill] sm:$0xff] }
 0x553   :  { %v6204_v16 = vadd.f32 %v6203_v58, %v6202_v42  ;;  %v5536_v38 = vpop.f32.mrf.mxu1  ;;  %v5267_v41 = vadd.f32 %v10739_v10, %v11213_v9  ;;  %v5990_v58 = vpop.permute.xlu0 %5989 }
 0x554   :  { %v6094_v20 = vmul.f32 %v5965_v27, %v5646_v61  ;;  %v5537_v43 = vadd.f32 %v5536_v38, %v5248_v21 }
 0x555   :  { %v5538_v6 = vpop.f32.mrf.mxu1 }
 0x556   :  { %v6205_v26 = vsel %vm6111_vm9, %v6094_v20, 0.0  ;;  %v5647_v18 = vmax.f32 %v5537_v43, 0.0  ;;  %v11214_v20 = vld [vmem:[#allocation17_spill] sm:$0xff] }
 0x557   :  { %v6206_v14 = vadd.f32 %v6205_v26, %v6204_v16  ;;  %v5539_v29 = vpop.f32.mrf.mxu1  ;;  %v5272_v43 = vadd.f32 %v10744_v49, %v11214_v20  ;;  %v6000_v32 = vpop.permute.xlu0 %5999 }
 0x558   :  { %v6095_v7 = vmul.f32 %v5970_v3, %v5647_v18  ;;  %v5540_v55 = vadd.f32 %v5539_v29, %v5251_v47  ;;  %v5995_v47 = vpop.permute.xlu1 %5994  ;;  %v11215_v29 = vld [vmem:[#allocation18_spill] sm:$0xff] }
 0x559   :  { %v5541_v54 = vpop.f32.mrf.mxu1 }
 0x55a   :  { %v6207_v15 = vsel %vm6111_vm9, %v6095_v7, 0.0  ;;  %v5648_v50 = vmax.f32 %v5540_v55, 0.0  ;;  %v5275_v7 = vadd.f32 %v10749_v63, %v11215_v29  ;;  %v11221_v29 = vld [vmem:[#allocation69_spill] sm:$0xff] }
 0x55b   :  { %v6208_v60 = vadd.f32 %v6207_v15, %v6206_v14  ;;  %v5544_v31 = vpop.f32.mrf.mxu1 }
 0x55c   :  { %v6096_v12 = vmul.f32 %v5975_v53, %v5648_v50  ;;  %v5545_v52 = vadd.f32 %v5544_v31, %v5256_v37 }
 0x55d   :  { %v5546_v24 = vpop.f32.mrf.mxu1 }
 0x55e   :  { %v6209_v39 = vsel %vm6111_vm9, %v6096_v12, 0.0  ;;  %v5649_v35 = vmax.f32 %v5545_v52, 0.0  ;;  %v6005_v24 = vpop.permute.xlu1 %6004 }
 0x55f   :  { %v6210_v1 = vadd.f32 %v6209_v39, %v6208_v60  ;;  %v5547_v4 = vpop.f32.mrf.mxu1  ;;  %v11216_v60 = vld [vmem:[#allocation27_spill] sm:$0xff] }
 0x560   :  { %v6097_v59 = vmul.f32 %v5980_v44, %v5649_v35  ;;  %v5548_v25 = vadd.f32 %v5547_v4, %v5259_v11  ;;  %v5280_v31 = vadd.f32 %v10754_v17, %v11216_v60  ;;  %v11217_v44 = vld [vmem:[#allocation28_spill] sm:$0xff] }
 0x561   :  { %v5549_v51 = vpop.f32.mrf.mxu1 }
 0x562   :  { %v6211_v22 = vsel %vm6111_vm9, %v6097_v59, 0.0  ;;  %v5650_v45 = vmax.f32 %v5548_v25, 0.0  ;;  %v6010_v25 = vpop.permute.xlu0 %6009 }
 0x563   :  { %v6212_v40 = vadd.f32 %v6211_v22, %v6210_v1  ;;  %v5552_v42 = vpop.f32.mrf.mxu1  ;;  %v5283_v1 = vadd.f32 %v10759_v56, %v11217_v44 }
 0x564   :  { %v6098_v28 = vmul.f32 %v5985_v13, %v5650_v45  ;;  %v5553_v62 = vadd.f32 %v5552_v42, %v5264_v19  ;;  %v11218_v45 = vld [vmem:[#allocation75_spill] sm:$0xff] }
 0x565   :  { %v5554_v0 = vpop.f32.mrf.mxu1  ;;  %v5288_v13 = vadd.f32 %v10764_v34, %v11218_v45 }
 0x566   :  { %v6213_v5 = vsel %vm6111_vm9, %v6098_v28, 0.0  ;;  %v5651_v21 = vmax.f32 %v5553_v62, 0.0  ;;  %v6015_v28 = vpop.permute.xlu1 %6014 }
 0x567   :  { %v6214_v61 = vadd.f32 %v6213_v5, %v6212_v40  ;;  %v5555_v27 = vpop.f32.mrf.mxu1  ;;  %v11219_v5 = vld [vmem:[#allocation74_spill] sm:$0xff] }
 0x568   :  { %v6099_v16 = vmul.f32 %v5990_v58, %v5651_v21  ;;  %v5556_v8 = vadd.f32 %v5555_v27, %v5267_v41  ;;  %v5291_v21 = vadd.f32 %v10769_v30, %v11219_v5  ;;  %v6020_v27 = vpop.permute.xlu0 %6019 }
 0x569   :  { %v5557_v38 = vpop.f32.mrf.mxu1 }
 0x56a   :  { %v6215_v6 = vsel %vm6111_vm9, %v6099_v16, 0.0  ;;  %v5652_v48 = vmax.f32 %v5556_v8, 0.0 }
 0x56b   :  { %v6216_v26 = vadd.f32 %v6215_v6, %v6214_v61  ;;  %v5560_v18 = vpop.f32.mrf.mxu1 }
 0x56c   :  { %v6100_v3 = vmul.f32 %v5995_v47, %v5652_v48  ;;  %v5561_v10 = vadd.f32 %v5560_v18, %v5272_v43  ;;  %v11220_v43 = vld [vmem:[#allocation68_spill] sm:$0xff] }
 0x56d   :  { %v5562_v14 = vpop.f32.mrf.mxu1  ;;  %v5296_v6 = vadd.f32 %v10774_v36, %v11220_v43 }
 0x56e   :  { %v6217_v55 = vsel %vm6111_vm9, %v6100_v3, 0.0  ;;  %v5653_v54 = vmax.f32 %v5561_v10, 0.0 }
 0x56f   :  { %v6218_v37 = vadd.f32 %v6217_v55, %v6216_v26  ;;  %v5563_v15 = vpop.f32.mrf.mxu1  ;;  %v6025_v26 = vpop.permute.xlu1 %6024 }
 0x570   :  { %v6101_v50 = vmul.f32 %v6000_v32, %v5653_v54  ;;  %v5564_v49 = vadd.f32 %v5563_v15, %v5275_v7  ;;  %v5299_v7 = vadd.f32 %v10779_v2, %v11221_v29  ;;  %v6030_v32 = vpop.permute.xlu0 %6029 }
 0x571   :  { %v5565_v53 = vpop.f32.mrf.mxu1 }
 0x572   :  { %v6219_v12 = vsel %vm6111_vm9, %v6101_v50, 0.0  ;;  %v5654_v52 = vmax.f32 %v5564_v49, 0.0  ;;  %v11222_v53 = vld [vmem:[#allocation54_spill] sm:$0xff] }
 0x573   :  { %v6220_v57 = vadd.f32 %v6219_v12, %v6218_v37  ;;  %v5568_v11 = vpop.f32.mrf.mxu1  ;;  %v5304_v60 = vadd.f32 %v10784_v33, %v11222_v53 }
 0x574   :  { %v6102_v39 = vmul.f32 %v6005_v24, %v5654_v52  ;;  %v5569_v63 = vadd.f32 %v5568_v11, %v5280_v31  ;;  %v6035_v52 = vpop.permute.xlu1 %6034 }
 0x575   :  { %v5570_v35 = vpop.f32.mrf.mxu1 }
 0x576   :  { %v6221_v4 = vsel %vm6111_vm9, %v6102_v39, 0.0  ;;  %v5655_v59 = vmax.f32 %v5569_v63, 0.0  ;;  %v11223_v63 = vld [vmem:[#allocation51_spill] sm:$0xff] }
 0x577   :  { %v6222_v51 = vadd.f32 %v6221_v4, %v6220_v57  ;;  %v5571_v46 = vpop.f32.mrf.mxu1  ;;  %v5307_v35 = vadd.f32 %v10789_v23, %v11223_v63  ;;  %v6040_v4 = vpop.permute.xlu0 %6039 }
 0x578   :  { %v6103_v19 = vmul.f32 %v6010_v25, %v5655_v59  ;;  %v5572_v17 = vadd.f32 %v5571_v46, %v5283_v1 }
 0x579   :  { %v5573_v22 = vpop.f32.mrf.mxu1 }
 0x57a   :  { %v6223_v40 = vsel %vm6111_vm9, %v6103_v19, 0.0  ;;  %v5656_v42 = vmax.f32 %v5572_v17, 0.0  ;;  %v6045_v22 = vpop.permute.xlu1 %6044 }
 0x57b   :  { %v6224_v62 = vadd.f32 %v6223_v40, %v6222_v51  ;;  %v5576_v0 = vpop.f32.mrf.mxu1 }
 0x57c   :  { %v6104_v9 = vmul.f32 %v6015_v28, %v5656_v42  ;;  %v5577_v56 = vadd.f32 %v5576_v0, %v5288_v13  ;;  %v11224_v0 = vld [vmem:[#allocation6_spill] sm:$0xff] }
 0x57d   :  { %v5578_v41 = vpop.f32.mrf.mxu1 }
 0x57e   :  { %v6225_v58 = vsel %vm6111_vm9, %v6104_v9, 0.0  ;;  %v5657_v61 = vmax.f32 %v5577_v56, 0.0  ;;  %v6253_v9 = vsub.s32 0, %v11224_v0  ;;  %v6249_v41 = vpop.permute.xlu0 %6248 }
 0x57f   :  { %v6226_v16 = vadd.f32 %v6225_v58, %v6224_v62  ;;  %v5579_v8 = vpop.f32.mrf.mxu1 }
 0x580   :  { %v6105_v38 = vmul.f32 %v6020_v27, %v5657_v61  ;;  %v5580_v34 = vadd.f32 %v5579_v8, %v5291_v21  ;;  %v6254_v21 = vrot.slane %v6249_v41, %v6253_v9 }
 0x581   :  { %v5581_v20 = vpop.f32.mrf.mxu1 }
 0x582   :  { %v6227_v48 = vsel %vm6111_vm9, %v6105_v38, 0.0  ;;  %v5658_v47 = vmax.f32 %v5580_v34, 0.0 }
 0x583   :  { %v6228_v18 = vadd.f32 %v6227_v48, %v6226_v16  ;;  %v5584_v3 = vpop.f32.mrf.mxu1 }
 0x584   :  { %v6106_v10 = vmul.f32 %v6025_v26, %v5658_v47  ;;  %v5585_v30 = vadd.f32 %v5584_v3, %v5296_v6 }
 0x585   :  { %v5586_v14 = vpop.f32.mrf.mxu1 }
 0x586   :  { %v6229_v55 = vsel %vm6111_vm9, %v6106_v10, 0.0  ;;  %v5659_v54 = vmax.f32 %v5585_v30, 0.0 }
 0x587   :  { %v6230_v37 = vadd.f32 %v6229_v55, %v6228_v18  ;;  %v5587_v15 = vpop.f32.mrf.mxu1 }
 0x588   :  { %v6107_v50 = vmul.f32 %v6030_v32, %v5659_v54  ;;  %v5588_v36 = vadd.f32 %v5587_v15, %v5299_v7 }
 0x589   :  { %v5589_v49 = vpop.f32.mrf.mxu1 }
 0x58a   :  { %v6231_v31 = vsel %vm6111_vm9, %v6107_v50, 0.0  ;;  %v5660_v12 = vmax.f32 %v5588_v36, 0.0 }
 0x58b   :  { %v6232_v24 = vadd.f32 %v6231_v31, %v6230_v37  ;;  %v5592_v57 = vpop.f32.mrf.mxu1 }
 0x58c   :  { %v6108_v11 = vmul.f32 %v6035_v52, %v5660_v12  ;;  %v5593_v2 = vadd.f32 %v5592_v57, %v5304_v60 }
 0x58d   :  { %v5594_v39 = vpop.f32.mrf.mxu1 }
 0x58e   :  { %v6233_v44 = vsel %vm6111_vm9, %v6108_v11, 0.0  ;;  %v5661_v1 = vmax.f32 %v5593_v2, 0.0 }
 0x58f   :  { %v6234_v59 = vadd.f32 %v6233_v44, %v6232_v24  ;;  %v5595_v25 = vpop.f32.mrf.mxu1 }
 0x590   :  { %v6109_v51 = vmul.f32 %v6040_v4, %v5661_v1  ;;  %v5596_v33 = vadd.f32 %v5595_v25, %v5307_v35 }
 0x591   :  { %v5597_v46 = vpop.f32.mrf.mxu1 }
 0x592   :  { %v6235_v19 = vsel %vm6111_vm9, %v6109_v51, 0.0  ;;  %v5662_v17 = vmax.f32 %v5596_v33, 0.0 }
 0x593   :  { %v6236_v45 = vadd.f32 %v6235_v19, %v6234_v59 }
 0x594   :  { %v6110_v13 = vmul.f32 %v6045_v22, %v5662_v17 }
 0x596   :  { %v6237_v40 = vsel %vm6111_vm9, %v6110_v13, 0.0 }
 0x597   :  { %v6238_v42 = vadd.f32 %v6237_v40, %v6236_v45 }
 0x599   :  { %v6239_v28 = vrot.slane %v6238_v42, 4 }
 0x59b   :  { %v6240_v23 = vadd.f32 %v6239_v28, %v6238_v42 }
 0x59d   :  { %v6241_v62 = vrot.slane %v6240_v23, 2 }
 0x59f   :  { %v6242_v56 = vadd.f32 %v6241_v62, %v6240_v23 }
 0x5a1   :  { %v6243_v5 = vrot.slane %v6242_v56, 1 }
 0x5a3   :  { %v6244_v58 = vadd.f32 %v6243_v5, %v6242_v56 }
 0x5a5   :  { %v6255_v61 = vadd.f32 %v6254_v21, %v6244_v58 }
 0x5a7   :  { %6257 = vst.msk [vmem:[#allocation3] sm:$0x1] %vm6256_vm10, %v6255_v61 }
 0x5a8   :  { %7385 = shalt.err (!%p7382_p4)
}
 0x5a9   :  { %6267 = dma.vmem_to_hbm [thread:$0]  %s6265_s28, 16, %s10904_s11, [#allocation4]  }
 0x5aa   :  { %7394 = dma.done.wait [#allocation4], 16  }
 0x5ab   :  { %7395 = vsyncadd [#allocation4], 4294967280 }
 0x5ac   :  { %6271 = vsyncpa [#allocation4], 1 }

</bundles_post_ra>
